<compile_context>
chip_gen: v7x
topology: tpu7x:2x2x1
jax: 0.10.0
libtpu: 0.0.40
codegen_flags: <defaults>
</compile_context>

<pallas_src>
from functools import partial

import jax
import jax.numpy as jnp
from jax.experimental import pallas as pl
from jax.experimental.pallas import tpu as pltpu


def _lstm_kernel(num_layers, seq_len, t_chunk, b_pad, h_pad, *refs):
    # refs layout:
    #   x2d_ref                       (S*B_pad, I)        f32, time-major rows
    #   w_x0_ref                      (I, 4*H_pad)        f32  layer-0 input weights (pre-T)
    #   b0_ref                        (1, 4*H_pad)        f32  layer-0 bias (b_ih + b_hh)
    #   w_hh0_ref                     (H_pad, 4*H_pad)    bf16 layer-0 hidden weights (pre-T)
    #   [w_ih_l, w_hh_l, b_l]*(L-1)   (H_pad,4*H_pad)bf16 x2, (1,4*H_pad)f32
    #   out_ref                       (B_pad, H_pad)      f32  last-step hidden, top layer
    #   xg_sc (scratch)               (T_CHUNK*B_pad, 4*H_pad) f32 chunked layer-0 input proj
    n_in = 4 + 3 * (num_layers - 1)
    x_ref = refs[0]
    w_x0_ref = refs[1]
    b0_ref = refs[2]
    w_hh0_ref = refs[3]
    layer_refs = refs[4:n_in]
    out_ref = refs[n_in]
    xg_sc = refs[n_in + 1]

    # Hoist per-layer bias broadcasts out of the recurrence (no CSE of
    # broadcast_in_dim -> without this the unrolled loop re-broadcasts per step).
    b0 = b0_ref[...]                                        # (1, 4*H_pad)
    b_hoist = [
        jnp.broadcast_to(layer_refs[3 * (l - 1) + 2][...], (b_pad, 4 * h_pad))
        for l in range(1, num_layers)
    ]

    def lstm_cell(gates, c_prev):
        # Gate blocks are H_pad(=128)-lane aligned -> vreg-aligned slices.
        i_g = jax.nn.sigmoid(gates[:, 0 * h_pad:1 * h_pad])
        f_g = jax.nn.sigmoid(gates[:, 1 * h_pad:2 * h_pad])
        g_g = jnp.tanh(gates[:, 2 * h_pad:3 * h_pad])
        o_g = jax.nn.sigmoid(gates[:, 3 * h_pad:4 * h_pad])
        c_new = f_g * c_prev + i_g * g_g
        h_new = o_g * jnp.tanh(c_new)
        return h_new, c_new

    def step(t, carry):
        hs, cs = carry
        off = pl.multiple_of(t * b_pad, b_pad)

        # Layer 0: input contribution precomputed into xg_sc; only the
        # recurrent matmul here (bf16 weights, f32 accumulate on the MXU).
        g0 = xg_sc[pl.ds(off, b_pad), :] + jnp.dot(
            hs[0].astype(jnp.bfloat16), w_hh0_ref[...],
            preferred_element_type=jnp.float32)
        h_new, c_new = lstm_cell(g0, cs[0])
        new_hs = [h_new]
        new_cs = [c_new]
        inp = h_new

        # Layers >= 1: two K=128 dots (no per-step lane-dim concat copy).
        for l in range(1, num_layers):
            w_ih_ref = layer_refs[3 * (l - 1) + 0]
            w_hh_ref = layer_refs[3 * (l - 1) + 1]
            g = (jnp.dot(inp.astype(jnp.bfloat16), w_ih_ref[...],
                         preferred_element_type=jnp.float32)
                 + jnp.dot(hs[l].astype(jnp.bfloat16), w_hh_ref[...],
                           preferred_element_type=jnp.float32)
                 + b_hoist[l - 1])
            h_new, c_new = lstm_cell(g, cs[l])
            new_hs.append(h_new)
            new_cs.append(c_new)
            inp = h_new

        return (tuple(new_hs), tuple(new_cs))

    zeros = tuple(jnp.zeros((b_pad, h_pad), jnp.float32) for _ in range(num_layers))
    carry = (zeros, zeros)

    # Time-chunked recurrence: per chunk, hoist the layer-0 input projection
    # for up to T_CHUNK timesteps (one tall f32 matmul), then run the
    # recurrence over those timesteps with a bounded unroll.
    for c0 in range(0, seq_len, t_chunk):
        steps = min(t_chunk, seq_len - c0)
        rows = steps * b_pad
        xg_sc[0:rows, :] = (
            jnp.dot(x_ref[c0 * b_pad:c0 * b_pad + rows, :], w_x0_ref[...],
                    preferred_element_type=jnp.float32)
            + b0)
        carry = jax.lax.fori_loop(0, steps, step, carry, unroll=min(8, steps))

    hs, _ = carry
    # Lane-dense output slab; the 1-wide FC is done in the wrapper.
    out_ref[...] = hs[num_layers - 1]


def lstm_pallas(x, params, hidden_size, num_layers, t_chunk=64):
    """x: (batch, seq, input) float32, PyTorch batch_first convention."""
    B, S, I = x.shape
    H = hidden_size
    B_pad = ((B + 7) // 8) * 8            # full sublanes
    H_pad = ((H + 127) // 128) * 128      # each gate = full 128-lane blocks
    T_CHUNK = min(S, t_chunk)             # bounds projection scratch VMEM

    # Time-major, batch padded, flattened to (S*B_pad, I): row = t*B_pad + b.
    x_t = jnp.transpose(x.astype(jnp.float32), (1, 0, 2))     # (S, B, I)
    x_t = jnp.pad(x_t, ((0, 0), (0, B_pad - B), (0, 0)))       # (S, B_pad, I)
    x2d = x_t.reshape(S * B_pad, I)

    def pack_w(w, in_pad, dtype):
        # torch (4H, in) -> (in_pad, 4*H_pad); per-gate column padding, zero
        # rows for padded input lanes.  Gate order i, f, g, o preserved.
        in_f = w.shape[1]
        w4 = w.astype(jnp.float32).reshape(4, H, in_f)
        w4 = jnp.pad(w4, ((0, 0), (0, H_pad - H), (0, in_pad - in_f)))
        return jnp.transpose(w4, (2, 0, 1)).reshape(in_pad, 4 * H_pad).astype(dtype)

    def pack_b(b_ih, b_hh):
        b = (b_ih + b_hh).astype(jnp.float32).reshape(4, H)
        b = jnp.pad(b, ((0, 0), (0, H_pad - H)))
        return b.reshape(1, 4 * H_pad)

    w_ih0, w_hh0, b_ih0, b_hh0 = params["layer0"]
    args = [
        x2d,
        pack_w(w_ih0, I, jnp.float32),          # hoisted projection stays f32
        pack_b(b_ih0, b_hh0),
        pack_w(w_hh0, H_pad, jnp.bfloat16),     # recurrent weights in bf16
    ]
    for l in range(1, num_layers):
        w_ih, w_hh, b_ih, b_hh = params[f"layer{l}"]
        args += [pack_w(w_ih, H_pad, jnp.bfloat16),
                 pack_w(w_hh, H_pad, jnp.bfloat16),
                 pack_b(b_ih, b_hh)]

    # VMEM budget: actual resident bytes (inputs + output + chunk scratch) with
    # headroom, capped at 48 MiB so it stays safe on v7x's 64 MiB VMEM.
    def nbytes(a):
        return a.size * a.dtype.itemsize

    resident = (sum(nbytes(a) for a in args)
                + B_pad * H_pad * 4
                + T_CHUNK * B_pad * 4 * H_pad * 4)
    vmem_limit = int(min(max(2 * resident, 16 * 2**20) + 2 * 2**20, 48 * 2**20))

    vmem_spec = pl.BlockSpec(memory_space=pltpu.MemorySpace.VMEM)
    h_last_pad = pl.pallas_call(
        partial(_lstm_kernel, num_layers, S, T_CHUNK, B_pad, H_pad),
        out_shape=jax.ShapeDtypeStruct((B_pad, H_pad), jnp.float32),
        in_specs=[vmem_spec] * len(args),
        out_specs=vmem_spec,
        scratch_shapes=[pltpu.VMEM((T_CHUNK * B_pad, 4 * H_pad), jnp.float32)],
        compiler_params=pltpu.CompilerParams(vmem_limit_bytes=vmem_limit),
    )(*args)

    # Final Linear (hidden -> 1) on the last hidden state, outside the kernel
    # (avoids a lane-width-1 masked store).
    w_fc, b_fc = params["fc"]
    h_last = h_last_pad[:B, :H]
    return h_last @ w_fc.T + b_fc        # (B, 1)


def lstm_ref(x, params, hidden_size, num_layers):
    """Pure-JAX f32 reference matching torch.nn.LSTM(batch_first=True) + Linear."""
    B, S, I = x.shape
    H = hidden_size
    h0 = jnp.zeros((num_layers, B, H), jnp.float32)
    c0 = jnp.zeros((num_layers, B, H), jnp.float32)

    def step(carry, x_t):
        h, c = carry
        inp = x_t
        hs, cs = [], []
        for l in range(num_layers):
            w_ih, w_hh, b_ih, b_hh = params[f"layer{l}"]
            gates = inp @ w_ih.T + h[l] @ w_hh.T + b_ih + b_hh
            i_g = jax.nn.sigmoid(gates[:, 0 * H:1 * H])
            f_g = jax.nn.sigmoid(gates[:, 1 * H:2 * H])
            g_g = jnp.tanh(gates[:, 2 * H:3 * H])
            o_g = jax.nn.sigmoid(gates[:, 3 * H:4 * H])
            c_new = f_g * c[l] + i_g * g_g
            h_new = o_g * jnp.tanh(c_new)
            hs.append(h_new)
            cs.append(c_new)
            inp = h_new
        return (jnp.stack(hs), jnp.stack(cs)), inp

    (_, _), outs = jax.lax.scan(step, (h0, c0), jnp.transpose(x, (1, 0, 2)))
    last = outs[-1]  # out[:, -1, :]
    w_fc, b_fc = params["fc"]
    return last @ w_fc.T + b_fc


def init_params(key, input_size, hidden_size, num_layers):
    """Deterministic init mirroring PyTorch shapes: U(-1/sqrt(H), 1/sqrt(H))."""
    k = 1.0 / jnp.sqrt(jnp.float32(hidden_size))
    params = {}
    for l in range(num_layers):
        in_sz = input_size if l == 0 else hidden_size
        key, k1, k2, k3, k4 = jax.random.split(key, 5)
        params[f"layer{l}"] = (
            jax.random.uniform(k1, (4 * hidden_size, in_sz), jnp.float32, -k, k),
            jax.random.uniform(k2, (4 * hidden_size, hidden_size), jnp.float32, -k, k),
            jax.random.uniform(k3, (4 * hidden_size,), jnp.float32, -k, k),
            jax.random.uniform(k4, (4 * hidden_size,), jnp.float32, -k, k),
        )
    key, k1, k2 = jax.random.split(key, 3)
    params["fc"] = (
        jax.random.uniform(k1, (1, hidden_size), jnp.float32, -k, k),
        jax.random.uniform(k2, (1,), jnp.float32, -k, k),
    )
    return params


if __name__ == "__main__":
    BATCH, SEQ, INPUT_SIZE, HIDDEN, LAYERS = 2, 8, 4, 32, 2

    root = jax.random.PRNGKey(0)
    kx, kp = jax.random.split(root)
    x = jax.random.normal(kx, (BATCH, SEQ, INPUT_SIZE), jnp.float32)
    params = init_params(kp, INPUT_SIZE, HIDDEN, LAYERS)

    lstm_jit = jax.jit(lstm_pallas, static_argnums=(2, 3))
    out = jax.block_until_ready(lstm_jit(x, params, HIDDEN, LAYERS))

    ref = jax.block_until_ready(lstm_ref(x, params, HIDDEN, LAYERS))
    assert out.shape == (BATCH, 1), out.shape
    # Tolerance loosened from 1e-4: recurrent weights / hidden operands are
    # bf16 on the MXU (f32 accumulation), per the performance review.
    assert jnp.allclose(out, ref, atol=2e-2, rtol=2e-2), (out, ref)

    print("KERNEL_OK")
</pallas_src>

<mosaic_0001>
module attributes {stable_mosaic.version = 11 : i64} {
  func.func @_lstm_kernel(%arg0: memref<64x4xf32, #tpu.memory_space<vmem>>, %arg1: memref<4x512xf32, #tpu.memory_space<vmem>>, %arg2: memref<1x512xf32, #tpu.memory_space<vmem>>, %arg3: memref<128x512xbf16, #tpu.memory_space<vmem>>, %arg4: memref<128x512xbf16, #tpu.memory_space<vmem>>, %arg5: memref<128x512xbf16, #tpu.memory_space<vmem>>, %arg6: memref<1x512xf32, #tpu.memory_space<vmem>>, %arg7: memref<8x128xf32, #tpu.memory_space<vmem>>, %arg8: memref<64x512xf32, #tpu.memory_space<vmem>>) attributes {dimension_semantics = [], scalar_prefetch = 0 : i64, scratch_operands = 1 : i64, tpu.core_type = #tpu.core_type<tc>} {
    %c0 = arith.constant 0 : index
    %c0_0 = arith.constant 0 : index
    %0 = vector.load %arg2[%c0, %c0_0] : memref<1x512xf32, #tpu.memory_space<vmem>>, vector<1x512xf32>
    %c0_1 = arith.constant 0 : index
    %c0_2 = arith.constant 0 : index
    %1 = vector.load %arg6[%c0_1, %c0_2] : memref<1x512xf32, #tpu.memory_space<vmem>>, vector<1x512xf32>
    %2 = vector.shape_cast %1 : vector<1x512xf32> to vector<1x512xf32>
    %3 = vector.broadcast %2 : vector<1x512xf32> to vector<8x512xf32>
    %cst = arith.constant 0.000000e+00 : f32
    %4 = vector.broadcast %cst : f32 to vector<8x128xf32>
    %cst_3 = arith.constant 0.000000e+00 : f32
    %5 = vector.broadcast %cst_3 : f32 to vector<8x128xf32>
    %c0_4 = arith.constant 0 : index
    %c0_5 = arith.constant 0 : index
    %6 = vector.load %arg0[%c0_4, %c0_5] : memref<64x4xf32, #tpu.memory_space<vmem>>, vector<64x4xf32>
    %c0_6 = arith.constant 0 : index
    %c0_7 = arith.constant 0 : index
    %7 = vector.load %arg1[%c0_6, %c0_7] : memref<4x512xf32, #tpu.memory_space<vmem>>, vector<4x512xf32>
    %cst_8 = arith.constant dense<0.000000e+00> : vector<64x512xf32>
    %8 = tpu.matmul %6, %7, %cst_8 {dimension_numbers = #tpu.dot_dimension_numbers<[1], [0], [0], [1], [0, 0, 1, 1], [], []>} : vector<64x4xf32>, vector<4x512xf32>, vector<64x512xf32> -> vector<64x512xf32>
    %9 = vector.broadcast %0 : vector<1x512xf32> to vector<64x512xf32>
    %10 = arith.addf %8, %9 : vector<64x512xf32>
    %c0_9 = arith.constant 0 : index
    %c0_10 = arith.constant 0 : index
    %11 = vector.load %arg8[%c0_9, %c0_10] : memref<64x512xf32, #tpu.memory_space<vmem>>, vector<64x512xf32>
    tpu.vector_store %arg8[%c0_9, %c0_10], %10 {strides = array<i32>} : memref<64x512xf32, #tpu.memory_space<vmem>>, vector<64x512xf32>,
    %c0_i32 = arith.constant 0 : i32
    %c8_i32 = arith.constant 8 : i32
    %12 = arith.muli %c0_i32, %c8_i32 : i32
    %13 = tpu.assume_multiple %12, 8 : i32
    %14 = arith.index_cast %13 : i32 to index
    %c0_11 = arith.constant 0 : index
    %15 = vector.load %arg8[%14, %c0_11] : memref<64x512xf32, #tpu.memory_space<vmem>>, vector<8x512xf32>
    %16 = arith.truncf %4 : vector<8x128xf32> to vector<8x128xbf16>
    %c0_12 = arith.constant 0 : index
    %c0_13 = arith.constant 0 : index
    %17 = vector.load %arg3[%c0_12, %c0_13] : memref<128x512xbf16, #tpu.memory_space<vmem>>, vector<128x512xbf16>
    %cst_14 = arith.constant dense<0.000000e+00> : vector<8x512xf32>
    %18 = tpu.matmul %16, %17, %cst_14 {dimension_numbers = #tpu.dot_dimension_numbers<[1], [0], [0], [1], [0, 0, 1, 1], [], []>} : vector<8x128xbf16>, vector<128x512xbf16>, vector<8x512xf32> -> vector<8x512xf32>
    %19 = arith.addf %15, %18 : vector<8x512xf32>
    %20 = vector.extract_strided_slice %19 {offsets = [0, 0], sizes = [8, 128], strides = [1, 1]} : vector<8x512xf32> to vector<8x128xf32>
    %21 = arith.negf %20 : vector<8x128xf32>
    %22 = math.exp %21 : vector<8x128xf32>
    %cst_15 = arith.constant 1.000000e+00 : f32
    %23 = vector.broadcast %cst_15 : f32 to vector<8x128xf32>
    %24 = arith.addf %23, %22 : vector<8x128xf32>
    %25 = arith.divf %23, %24 : vector<8x128xf32>
    %26 = vector.extract_strided_slice %19 {offsets = [0, 128], sizes = [8, 128], strides = [1, 1]} : vector<8x512xf32> to vector<8x128xf32>
    %27 = arith.negf %26 : vector<8x128xf32>
    %28 = math.exp %27 : vector<8x128xf32>
    %cst_16 = arith.constant 1.000000e+00 : f32
    %29 = vector.broadcast %cst_16 : f32 to vector<8x128xf32>
    %30 = arith.addf %29, %28 : vector<8x128xf32>
    %31 = arith.divf %29, %30 : vector<8x128xf32>
    %32 = vector.extract_strided_slice %19 {offsets = [0, 256], sizes = [8, 128], strides = [1, 1]} : vector<8x512xf32> to vector<8x128xf32>
    %33 = math.tanh %32 : vector<8x128xf32>
    %34 = vector.extract_strided_slice %19 {offsets = [0, 384], sizes = [8, 128], strides = [1, 1]} : vector<8x512xf32> to vector<8x128xf32>
    %35 = arith.negf %34 : vector<8x128xf32>
    %36 = math.exp %35 : vector<8x128xf32>
    %cst_17 = arith.constant 1.000000e+00 : f32
    %37 = vector.broadcast %cst_17 : f32 to vector<8x128xf32>
    %38 = arith.addf %37, %36 : vector<8x128xf32>
    %39 = arith.divf %37, %38 : vector<8x128xf32>
    %40 = arith.mulf %31, %4 : vector<8x128xf32>
    %41 = arith.mulf %25, %33 : vector<8x128xf32>
    %42 = arith.addf %40, %41 : vector<8x128xf32>
    %43 = math.tanh %42 : vector<8x128xf32>
    %44 = arith.mulf %39, %43 : vector<8x128xf32>
    %45 = arith.truncf %44 : vector<8x128xf32> to vector<8x128xbf16>
    %c0_18 = arith.constant 0 : index
    %c0_19 = arith.constant 0 : index
    %46 = vector.load %arg4[%c0_18, %c0_19] : memref<128x512xbf16, #tpu.memory_space<vmem>>, vector<128x512xbf16>
    %cst_20 = arith.constant dense<0.000000e+00> : vector<8x512xf32>
    %47 = tpu.matmul %45, %46, %cst_20 {dimension_numbers = #tpu.dot_dimension_numbers<[1], [0], [0], [1], [0, 0, 1, 1], [], []>} : vector<8x128xbf16>, vector<128x512xbf16>, vector<8x512xf32> -> vector<8x512xf32>
    %48 = arith.truncf %5 : vector<8x128xf32> to vector<8x128xbf16>
    %c0_21 = arith.constant 0 : index
    %c0_22 = arith.constant 0 : index
    %49 = vector.load %arg5[%c0_21, %c0_22] : memref<128x512xbf16, #tpu.memory_space<vmem>>, vector<128x512xbf16>
    %cst_23 = arith.constant dense<0.000000e+00> : vector<8x512xf32>
    %50 = tpu.matmul %48, %49, %cst_23 {dimension_numbers = #tpu.dot_dimension_numbers<[1], [0], [0], [1], [0, 0, 1, 1], [], []>} : vector<8x128xbf16>, vector<128x512xbf16>, vector<8x512xf32> -> vector<8x512xf32>
    %51 = arith.addf %47, %50 : vector<8x512xf32>
    %52 = arith.addf %51, %3 : vector<8x512xf32>
    %53 = vector.extract_strided_slice %52 {offsets = [0, 0], sizes = [8, 128], strides = [1, 1]} : vector<8x512xf32> to vector<8x128xf32>
    %54 = arith.negf %53 : vector<8x128xf32>
    %55 = math.exp %54 : vector<8x128xf32>
    %cst_24 = arith.constant 1.000000e+00 : f32
    %56 = vector.broadcast %cst_24 : f32 to vector<8x128xf32>
    %57 = arith.addf %56, %55 : vector<8x128xf32>
    %58 = arith.divf %56, %57 : vector<8x128xf32>
    %59 = vector.extract_strided_slice %52 {offsets = [0, 128], sizes = [8, 128], strides = [1, 1]} : vector<8x512xf32> to vector<8x128xf32>
    %60 = arith.negf %59 : vector<8x128xf32>
    %61 = math.exp %60 : vector<8x128xf32>
    %cst_25 = arith.constant 1.000000e+00 : f32
    %62 = vector.broadcast %cst_25 : f32 to vector<8x128xf32>
    %63 = arith.addf %62, %61 : vector<8x128xf32>
    %64 = arith.divf %62, %63 : vector<8x128xf32>
    %65 = vector.extract_strided_slice %52 {offsets = [0, 256], sizes = [8, 128], strides = [1, 1]} : vector<8x512xf32> to vector<8x128xf32>
    %66 = math.tanh %65 : vector<8x128xf32>
    %67 = vector.extract_strided_slice %52 {offsets = [0, 384], sizes = [8, 128], strides = [1, 1]} : vector<8x512xf32> to vector<8x128xf32>
    %68 = arith.negf %67 : vector<8x128xf32>
    %69 = math.exp %68 : vector<8x128xf32>
    %cst_26 = arith.constant 1.000000e+00 : f32
    %70 = vector.broadcast %cst_26 : f32 to vector<8x128xf32>
    %71 = arith.addf %70, %69 : vector<8x128xf32>
    %72 = arith.divf %70, %71 : vector<8x128xf32>
    %73 = arith.mulf %64, %5 : vector<8x128xf32>
    %74 = arith.mulf %58, %66 : vector<8x128xf32>
    %75 = arith.addf %73, %74 : vector<8x128xf32>
    %76 = math.tanh %75 : vector<8x128xf32>
    %77 = arith.mulf %72, %76 : vector<8x128xf32>
    %c1_i32 = arith.constant 1 : i32
    %c8_i32_27 = arith.constant 8 : i32
    %78 = arith.muli %c1_i32, %c8_i32_27 : i32
    %79 = tpu.assume_multiple %78, 8 : i32
    %80 = arith.index_cast %79 : i32 to index
    %c0_28 = arith.constant 0 : index
    %81 = vector.load %arg8[%80, %c0_28] : memref<64x512xf32, #tpu.memory_space<vmem>>, vector<8x512xf32>
    %82 = arith.truncf %44 : vector<8x128xf32> to vector<8x128xbf16>
    %c0_29 = arith.constant 0 : index
    %c0_30 = arith.constant 0 : index
    %83 = vector.load %arg3[%c0_29, %c0_30] : memref<128x512xbf16, #tpu.memory_space<vmem>>, vector<128x512xbf16>
    %cst_31 = arith.constant dense<0.000000e+00> : vector<8x512xf32>
    %84 = tpu.matmul %82, %83, %cst_31 {dimension_numbers = #tpu.dot_dimension_numbers<[1], [0], [0], [1], [0, 0, 1, 1], [], []>} : vector<8x128xbf16>, vector<128x512xbf16>, vector<8x512xf32> -> vector<8x512xf32>
    %85 = arith.addf %81, %84 : vector<8x512xf32>
    %86 = vector.extract_strided_slice %85 {offsets = [0, 0], sizes = [8, 128], strides = [1, 1]} : vector<8x512xf32> to vector<8x128xf32>
    %87 = arith.negf %86 : vector<8x128xf32>
    %88 = math.exp %87 : vector<8x128xf32>
    %cst_32 = arith.constant 1.000000e+00 : f32
    %89 = vector.broadcast %cst_32 : f32 to vector<8x128xf32>
    %90 = arith.addf %89, %88 : vector<8x128xf32>
    %91 = arith.divf %89, %90 : vector<8x128xf32>
    %92 = vector.extract_strided_slice %85 {offsets = [0, 128], sizes = [8, 128], strides = [1, 1]} : vector<8x512xf32> to vector<8x128xf32>
    %93 = arith.negf %92 : vector<8x128xf32>
    %94 = math.exp %93 : vector<8x128xf32>
    %cst_33 = arith.constant 1.000000e+00 : f32
    %95 = vector.broadcast %cst_33 : f32 to vector<8x128xf32>
    %96 = arith.addf %95, %94 : vector<8x128xf32>
    %97 = arith.divf %95, %96 : vector<8x128xf32>
    %98 = vector.extract_strided_slice %85 {offsets = [0, 256], sizes = [8, 128], strides = [1, 1]} : vector<8x512xf32> to vector<8x128xf32>
    %99 = math.tanh %98 : vector<8x128xf32>
    %100 = vector.extract_strided_slice %85 {offsets = [0, 384], sizes = [8, 128], strides = [1, 1]} : vector<8x512xf32> to vector<8x128xf32>
    %101 = arith.negf %100 : vector<8x128xf32>
    %102 = math.exp %101 : vector<8x128xf32>
    %cst_34 = arith.constant 1.000000e+00 : f32
    %103 = vector.broadcast %cst_34 : f32 to vector<8x128xf32>
    %104 = arith.addf %103, %102 : vector<8x128xf32>
    %105 = arith.divf %103, %104 : vector<8x128xf32>
    %106 = arith.mulf %97, %42 : vector<8x128xf32>
    %107 = arith.mulf %91, %99 : vector<8x128xf32>
    %108 = arith.addf %106, %107 : vector<8x128xf32>
    %109 = math.tanh %108 : vector<8x128xf32>
    %110 = arith.mulf %105, %109 : vector<8x128xf32>
    %111 = arith.truncf %110 : vector<8x128xf32> to vector<8x128xbf16>
    %c0_35 = arith.constant 0 : index
    %c0_36 = arith.constant 0 : index
    %112 = vector.load %arg4[%c0_35, %c0_36] : memref<128x512xbf16, #tpu.memory_space<vmem>>, vector<128x512xbf16>
    %cst_37 = arith.constant dense<0.000000e+00> : vector<8x512xf32>
    %113 = tpu.matmul %111, %112, %cst_37 {dimension_numbers = #tpu.dot_dimension_numbers<[1], [0], [0], [1], [0, 0, 1, 1], [], []>} : vector<8x128xbf16>, vector<128x512xbf16>, vector<8x512xf32> -> vector<8x512xf32>
    %114 = arith.truncf %77 : vector<8x128xf32> to vector<8x128xbf16>
    %c0_38 = arith.constant 0 : index
    %c0_39 = arith.constant 0 : index
    %115 = vector.load %arg5[%c0_38, %c0_39] : memref<128x512xbf16, #tpu.memory_space<vmem>>, vector<128x512xbf16>
    %cst_40 = arith.constant dense<0.000000e+00> : vector<8x512xf32>
    %116 = tpu.matmul %114, %115, %cst_40 {dimension_numbers = #tpu.dot_dimension_numbers<[1], [0], [0], [1], [0, 0, 1, 1], [], []>} : vector<8x128xbf16>, vector<128x512xbf16>, vector<8x512xf32> -> vector<8x512xf32>
    %117 = arith.addf %113, %116 : vector<8x512xf32>
    %118 = arith.addf %117, %3 : vector<8x512xf32>
    %119 = vector.extract_strided_slice %118 {offsets = [0, 0], sizes = [8, 128], strides = [1, 1]} : vector<8x512xf32> to vector<8x128xf32>
    %120 = arith.negf %119 : vector<8x128xf32>
    %121 = math.exp %120 : vector<8x128xf32>
    %cst_41 = arith.constant 1.000000e+00 : f32
    %122 = vector.broadcast %cst_41 : f32 to vector<8x128xf32>
    %123 = arith.addf %122, %121 : vector<8x128xf32>
    %124 = arith.divf %122, %123 : vector<8x128xf32>
    %125 = vector.extract_strided_slice %118 {offsets = [0, 128], sizes = [8, 128], strides = [1, 1]} : vector<8x512xf32> to vector<8x128xf32>
    %126 = arith.negf %125 : vector<8x128xf32>
    %127 = math.exp %126 : vector<8x128xf32>
    %cst_42 = arith.constant 1.000000e+00 : f32
    %128 = vector.broadcast %cst_42 : f32 to vector<8x128xf32>
    %129 = arith.addf %128, %127 : vector<8x128xf32>
    %130 = arith.divf %128, %129 : vector<8x128xf32>
    %131 = vector.extract_strided_slice %118 {offsets = [0, 256], sizes = [8, 128], strides = [1, 1]} : vector<8x512xf32> to vector<8x128xf32>
    %132 = math.tanh %131 : vector<8x128xf32>
    %133 = vector.extract_strided_slice %118 {offsets = [0, 384], sizes = [8, 128], strides = [1, 1]} : vector<8x512xf32> to vector<8x128xf32>
    %134 = arith.negf %133 : vector<8x128xf32>
    %135 = math.exp %134 : vector<8x128xf32>
    %cst_43 = arith.constant 1.000000e+00 : f32
    %136 = vector.broadcast %cst_43 : f32 to vector<8x128xf32>
    %137 = arith.addf %136, %135 : vector<8x128xf32>
    %138 = arith.divf %136, %137 : vector<8x128xf32>
    %139 = arith.mulf %130, %75 : vector<8x128xf32>
    %140 = arith.mulf %124, %132 : vector<8x128xf32>
    %141 = arith.addf %139, %140 : vector<8x128xf32>
    %142 = math.tanh %141 : vector<8x128xf32>
    %143 = arith.mulf %138, %142 : vector<8x128xf32>
    %c2_i32 = arith.constant 2 : i32
    %c8_i32_44 = arith.constant 8 : i32
    %144 = arith.muli %c2_i32, %c8_i32_44 : i32
    %145 = tpu.assume_multiple %144, 8 : i32
    %146 = arith.index_cast %145 : i32 to index
    %c0_45 = arith.constant 0 : index
    %147 = vector.load %arg8[%146, %c0_45] : memref<64x512xf32, #tpu.memory_space<vmem>>, vector<8x512xf32>
    %148 = arith.truncf %110 : vector<8x128xf32> to vector<8x128xbf16>
    %c0_46 = arith.constant 0 : index
    %c0_47 = arith.constant 0 : index
    %149 = vector.load %arg3[%c0_46, %c0_47] : memref<128x512xbf16, #tpu.memory_space<vmem>>, vector<128x512xbf16>
    %cst_48 = arith.constant dense<0.000000e+00> : vector<8x512xf32>
    %150 = tpu.matmul %148, %149, %cst_48 {dimension_numbers = #tpu.dot_dimension_numbers<[1], [0], [0], [1], [0, 0, 1, 1], [], []>} : vector<8x128xbf16>, vector<128x512xbf16>, vector<8x512xf32> -> vector<8x512xf32>
    %151 = arith.addf %147, %150 : vector<8x512xf32>
    %152 = vector.extract_strided_slice %151 {offsets = [0, 0], sizes = [8, 128], strides = [1, 1]} : vector<8x512xf32> to vector<8x128xf32>
    %153 = arith.negf %152 : vector<8x128xf32>
    %154 = math.exp %153 : vector<8x128xf32>
    %cst_49 = arith.constant 1.000000e+00 : f32
    %155 = vector.broadcast %cst_49 : f32 to vector<8x128xf32>
    %156 = arith.addf %155, %154 : vector<8x128xf32>
    %157 = arith.divf %155, %156 : vector<8x128xf32>
    %158 = vector.extract_strided_slice %151 {offsets = [0, 128], sizes = [8, 128], strides = [1, 1]} : vector<8x512xf32> to vector<8x128xf32>
    %159 = arith.negf %158 : vector<8x128xf32>
    %160 = math.exp %159 : vector<8x128xf32>
    %cst_50 = arith.constant 1.000000e+00 : f32
    %161 = vector.broadcast %cst_50 : f32 to vector<8x128xf32>
    %162 = arith.addf %161, %160 : vector<8x128xf32>
    %163 = arith.divf %161, %162 : vector<8x128xf32>
    %164 = vector.extract_strided_slice %151 {offsets = [0, 256], sizes = [8, 128], strides = [1, 1]} : vector<8x512xf32> to vector<8x128xf32>
    %165 = math.tanh %164 : vector<8x128xf32>
    %166 = vector.extract_strided_slice %151 {offsets = [0, 384], sizes = [8, 128], strides = [1, 1]} : vector<8x512xf32> to vector<8x128xf32>
    %167 = arith.negf %166 : vector<8x128xf32>
    %168 = math.exp %167 : vector<8x128xf32>
    %cst_51 = arith.constant 1.000000e+00 : f32
    %169 = vector.broadcast %cst_51 : f32 to vector<8x128xf32>
    %170 = arith.addf %169, %168 : vector<8x128xf32>
    %171 = arith.divf %169, %170 : vector<8x128xf32>
    %172 = arith.mulf %163, %108 : vector<8x128xf32>
    %173 = arith.mulf %157, %165 : vector<8x128xf32>
    %174 = arith.addf %172, %173 : vector<8x128xf32>
    %175 = math.tanh %174 : vector<8x128xf32>
    %176 = arith.mulf %171, %175 : vector<8x128xf32>
    %177 = arith.truncf %176 : vector<8x128xf32> to vector<8x128xbf16>
    %c0_52 = arith.constant 0 : index
    %c0_53 = arith.constant 0 : index
    %178 = vector.load %arg4[%c0_52, %c0_53] : memref<128x512xbf16, #tpu.memory_space<vmem>>, vector<128x512xbf16>
    %cst_54 = arith.constant dense<0.000000e+00> : vector<8x512xf32>
    %179 = tpu.matmul %177, %178, %cst_54 {dimension_numbers = #tpu.dot_dimension_numbers<[1], [0], [0], [1], [0, 0, 1, 1], [], []>} : vector<8x128xbf16>, vector<128x512xbf16>, vector<8x512xf32> -> vector<8x512xf32>
    %180 = arith.truncf %143 : vector<8x128xf32> to vector<8x128xbf16>
    %c0_55 = arith.constant 0 : index
    %c0_56 = arith.constant 0 : index
    %181 = vector.load %arg5[%c0_55, %c0_56] : memref<128x512xbf16, #tpu.memory_space<vmem>>, vector<128x512xbf16>
    %cst_57 = arith.constant dense<0.000000e+00> : vector<8x512xf32>
    %182 = tpu.matmul %180, %181, %cst_57 {dimension_numbers = #tpu.dot_dimension_numbers<[1], [0], [0], [1], [0, 0, 1, 1], [], []>} : vector<8x128xbf16>, vector<128x512xbf16>, vector<8x512xf32> -> vector<8x512xf32>
    %183 = arith.addf %179, %182 : vector<8x512xf32>
    %184 = arith.addf %183, %3 : vector<8x512xf32>
    %185 = vector.extract_strided_slice %184 {offsets = [0, 0], sizes = [8, 128], strides = [1, 1]} : vector<8x512xf32> to vector<8x128xf32>
    %186 = arith.negf %185 : vector<8x128xf32>
    %187 = math.exp %186 : vector<8x128xf32>
    %cst_58 = arith.constant 1.000000e+00 : f32
    %188 = vector.broadcast %cst_58 : f32 to vector<8x128xf32>
    %189 = arith.addf %188, %187 : vector<8x128xf32>
    %190 = arith.divf %188, %189 : vector<8x128xf32>
    %191 = vector.extract_strided_slice %184 {offsets = [0, 128], sizes = [8, 128], strides = [1, 1]} : vector<8x512xf32> to vector<8x128xf32>
    %192 = arith.negf %191 : vector<8x128xf32>
    %193 = math.exp %192 : vector<8x128xf32>
    %cst_59 = arith.constant 1.000000e+00 : f32
    %194 = vector.broadcast %cst_59 : f32 to vector<8x128xf32>
    %195 = arith.addf %194, %193 : vector<8x128xf32>
    %196 = arith.divf %194, %195 : vector<8x128xf32>
    %197 = vector.extract_strided_slice %184 {offsets = [0, 256], sizes = [8, 128], strides = [1, 1]} : vector<8x512xf32> to vector<8x128xf32>
    %198 = math.tanh %197 : vector<8x128xf32>
    %199 = vector.extract_strided_slice %184 {offsets = [0, 384], sizes = [8, 128], strides = [1, 1]} : vector<8x512xf32> to vector<8x128xf32>
    %200 = arith.negf %199 : vector<8x128xf32>
    %201 = math.exp %200 : vector<8x128xf32>
    %cst_60 = arith.constant 1.000000e+00 : f32
    %202 = vector.broadcast %cst_60 : f32 to vector<8x128xf32>
    %203 = arith.addf %202, %201 : vector<8x128xf32>
    %204 = arith.divf %202, %203 : vector<8x128xf32>
    %205 = arith.mulf %196, %141 : vector<8x128xf32>
    %206 = arith.mulf %190, %198 : vector<8x128xf32>
    %207 = arith.addf %205, %206 : vector<8x128xf32>
    %208 = math.tanh %207 : vector<8x128xf32>
    %209 = arith.mulf %204, %208 : vector<8x128xf32>
    %c3_i32 = arith.constant 3 : i32
    %c8_i32_61 = arith.constant 8 : i32
    %210 = arith.muli %c3_i32, %c8_i32_61 : i32
    %211 = tpu.assume_multiple %210, 8 : i32
    %212 = arith.index_cast %211 : i32 to index
    %c0_62 = arith.constant 0 : index
    %213 = vector.load %arg8[%212, %c0_62] : memref<64x512xf32, #tpu.memory_space<vmem>>, vector<8x512xf32>
    %214 = arith.truncf %176 : vector<8x128xf32> to vector<8x128xbf16>
    %c0_63 = arith.constant 0 : index
    %c0_64 = arith.constant 0 : index
    %215 = vector.load %arg3[%c0_63, %c0_64] : memref<128x512xbf16, #tpu.memory_space<vmem>>, vector<128x512xbf16>
    %cst_65 = arith.constant dense<0.000000e+00> : vector<8x512xf32>
    %216 = tpu.matmul %214, %215, %cst_65 {dimension_numbers = #tpu.dot_dimension_numbers<[1], [0], [0], [1], [0, 0, 1, 1], [], []>} : vector<8x128xbf16>, vector<128x512xbf16>, vector<8x512xf32> -> vector<8x512xf32>
    %217 = arith.addf %213, %216 : vector<8x512xf32>
    %218 = vector.extract_strided_slice %217 {offsets = [0, 0], sizes = [8, 128], strides = [1, 1]} : vector<8x512xf32> to vector<8x128xf32>
    %219 = arith.negf %218 : vector<8x128xf32>
    %220 = math.exp %219 : vector<8x128xf32>
    %cst_66 = arith.constant 1.000000e+00 : f32
    %221 = vector.broadcast %cst_66 : f32 to vector<8x128xf32>
    %222 = arith.addf %221, %220 : vector<8x128xf32>
    %223 = arith.divf %221, %222 : vector<8x128xf32>
    %224 = vector.extract_strided_slice %217 {offsets = [0, 128], sizes = [8, 128], strides = [1, 1]} : vector<8x512xf32> to vector<8x128xf32>
    %225 = arith.negf %224 : vector<8x128xf32>
    %226 = math.exp %225 : vector<8x128xf32>
    %cst_67 = arith.constant 1.000000e+00 : f32
    %227 = vector.broadcast %cst_67 : f32 to vector<8x128xf32>
    %228 = arith.addf %227, %226 : vector<8x128xf32>
    %229 = arith.divf %227, %228 : vector<8x128xf32>
    %230 = vector.extract_strided_slice %217 {offsets = [0, 256], sizes = [8, 128], strides = [1, 1]} : vector<8x512xf32> to vector<8x128xf32>
    %231 = math.tanh %230 : vector<8x128xf32>
    %232 = vector.extract_strided_slice %217 {offsets = [0, 384], sizes = [8, 128], strides = [1, 1]} : vector<8x512xf32> to vector<8x128xf32>
    %233 = arith.negf %232 : vector<8x128xf32>
    %234 = math.exp %233 : vector<8x128xf32>
    %cst_68 = arith.constant 1.000000e+00 : f32
    %235 = vector.broadcast %cst_68 : f32 to vector<8x128xf32>
    %236 = arith.addf %235, %234 : vector<8x128xf32>
    %237 = arith.divf %235, %236 : vector<8x128xf32>
    %238 = arith.mulf %229, %174 : vector<8x128xf32>
    %239 = arith.mulf %223, %231 : vector<8x128xf32>
    %240 = arith.addf %238, %239 : vector<8x128xf32>
    %241 = math.tanh %240 : vector<8x128xf32>
    %242 = arith.mulf %237, %241 : vector<8x128xf32>
    %243 = arith.truncf %242 : vector<8x128xf32> to vector<8x128xbf16>
    %c0_69 = arith.constant 0 : index
    %c0_70 = arith.constant 0 : index
    %244 = vector.load %arg4[%c0_69, %c0_70] : memref<128x512xbf16, #tpu.memory_space<vmem>>, vector<128x512xbf16>
    %cst_71 = arith.constant dense<0.000000e+00> : vector<8x512xf32>
    %245 = tpu.matmul %243, %244, %cst_71 {dimension_numbers = #tpu.dot_dimension_numbers<[1], [0], [0], [1], [0, 0, 1, 1], [], []>} : vector<8x128xbf16>, vector<128x512xbf16>, vector<8x512xf32> -> vector<8x512xf32>
    %246 = arith.truncf %209 : vector<8x128xf32> to vector<8x128xbf16>
    %c0_72 = arith.constant 0 : index
    %c0_73 = arith.constant 0 : index
    %247 = vector.load %arg5[%c0_72, %c0_73] : memref<128x512xbf16, #tpu.memory_space<vmem>>, vector<128x512xbf16>
    %cst_74 = arith.constant dense<0.000000e+00> : vector<8x512xf32>
    %248 = tpu.matmul %246, %247, %cst_74 {dimension_numbers = #tpu.dot_dimension_numbers<[1], [0], [0], [1], [0, 0, 1, 1], [], []>} : vector<8x128xbf16>, vector<128x512xbf16>, vector<8x512xf32> -> vector<8x512xf32>
    %249 = arith.addf %245, %248 : vector<8x512xf32>
    %250 = arith.addf %249, %3 : vector<8x512xf32>
    %251 = vector.extract_strided_slice %250 {offsets = [0, 0], sizes = [8, 128], strides = [1, 1]} : vector<8x512xf32> to vector<8x128xf32>
    %252 = arith.negf %251 : vector<8x128xf32>
    %253 = math.exp %252 : vector<8x128xf32>
    %cst_75 = arith.constant 1.000000e+00 : f32
    %254 = vector.broadcast %cst_75 : f32 to vector<8x128xf32>
    %255 = arith.addf %254, %253 : vector<8x128xf32>
    %256 = arith.divf %254, %255 : vector<8x128xf32>
    %257 = vector.extract_strided_slice %250 {offsets = [0, 128], sizes = [8, 128], strides = [1, 1]} : vector<8x512xf32> to vector<8x128xf32>
    %258 = arith.negf %257 : vector<8x128xf32>
    %259 = math.exp %258 : vector<8x128xf32>
    %cst_76 = arith.constant 1.000000e+00 : f32
    %260 = vector.broadcast %cst_76 : f32 to vector<8x128xf32>
    %261 = arith.addf %260, %259 : vector<8x128xf32>
    %262 = arith.divf %260, %261 : vector<8x128xf32>
    %263 = vector.extract_strided_slice %250 {offsets = [0, 256], sizes = [8, 128], strides = [1, 1]} : vector<8x512xf32> to vector<8x128xf32>
    %264 = math.tanh %263 : vector<8x128xf32>
    %265 = vector.extract_strided_slice %250 {offsets = [0, 384], sizes = [8, 128], strides = [1, 1]} : vector<8x512xf32> to vector<8x128xf32>
    %266 = arith.negf %265 : vector<8x128xf32>
    %267 = math.exp %266 : vector<8x128xf32>
    %cst_77 = arith.constant 1.000000e+00 : f32
    %268 = vector.broadcast %cst_77 : f32 to vector<8x128xf32>
    %269 = arith.addf %268, %267 : vector<8x128xf32>
    %270 = arith.divf %268, %269 : vector<8x128xf32>
    %271 = arith.mulf %262, %207 : vector<8x128xf32>
    %272 = arith.mulf %256, %264 : vector<8x128xf32>
    %273 = arith.addf %271, %272 : vector<8x128xf32>
    %274 = math.tanh %273 : vector<8x128xf32>
    %275 = arith.mulf %270, %274 : vector<8x128xf32>
    %c4_i32 = arith.constant 4 : i32
    %c8_i32_78 = arith.constant 8 : i32
    %276 = arith.muli %c4_i32, %c8_i32_78 : i32
    %277 = tpu.assume_multiple %276, 8 : i32
    %278 = arith.index_cast %277 : i32 to index
    %c0_79 = arith.constant 0 : index
    %279 = vector.load %arg8[%278, %c0_79] : memref<64x512xf32, #tpu.memory_space<vmem>>, vector<8x512xf32>
    %280 = arith.truncf %242 : vector<8x128xf32> to vector<8x128xbf16>
    %c0_80 = arith.constant 0 : index
    %c0_81 = arith.constant 0 : index
    %281 = vector.load %arg3[%c0_80, %c0_81] : memref<128x512xbf16, #tpu.memory_space<vmem>>, vector<128x512xbf16>
    %cst_82 = arith.constant dense<0.000000e+00> : vector<8x512xf32>
    %282 = tpu.matmul %280, %281, %cst_82 {dimension_numbers = #tpu.dot_dimension_numbers<[1], [0], [0], [1], [0, 0, 1, 1], [], []>} : vector<8x128xbf16>, vector<128x512xbf16>, vector<8x512xf32> -> vector<8x512xf32>
    %283 = arith.addf %279, %282 : vector<8x512xf32>
    %284 = vector.extract_strided_slice %283 {offsets = [0, 0], sizes = [8, 128], strides = [1, 1]} : vector<8x512xf32> to vector<8x128xf32>
    %285 = arith.negf %284 : vector<8x128xf32>
    %286 = math.exp %285 : vector<8x128xf32>
    %cst_83 = arith.constant 1.000000e+00 : f32
    %287 = vector.broadcast %cst_83 : f32 to vector<8x128xf32>
    %288 = arith.addf %287, %286 : vector<8x128xf32>
    %289 = arith.divf %287, %288 : vector<8x128xf32>
    %290 = vector.extract_strided_slice %283 {offsets = [0, 128], sizes = [8, 128], strides = [1, 1]} : vector<8x512xf32> to vector<8x128xf32>
    %291 = arith.negf %290 : vector<8x128xf32>
    %292 = math.exp %291 : vector<8x128xf32>
    %cst_84 = arith.constant 1.000000e+00 : f32
    %293 = vector.broadcast %cst_84 : f32 to vector<8x128xf32>
    %294 = arith.addf %293, %292 : vector<8x128xf32>
    %295 = arith.divf %293, %294 : vector<8x128xf32>
    %296 = vector.extract_strided_slice %283 {offsets = [0, 256], sizes = [8, 128], strides = [1, 1]} : vector<8x512xf32> to vector<8x128xf32>
    %297 = math.tanh %296 : vector<8x128xf32>
    %298 = vector.extract_strided_slice %283 {offsets = [0, 384], sizes = [8, 128], strides = [1, 1]} : vector<8x512xf32> to vector<8x128xf32>
    %299 = arith.negf %298 : vector<8x128xf32>
    %300 = math.exp %299 : vector<8x128xf32>
    %cst_85 = arith.constant 1.000000e+00 : f32
    %301 = vector.broadcast %cst_85 : f32 to vector<8x128xf32>
    %302 = arith.addf %301, %300 : vector<8x128xf32>
    %303 = arith.divf %301, %302 : vector<8x128xf32>
    %304 = arith.mulf %295, %240 : vector<8x128xf32>
    %305 = arith.mulf %289, %297 : vector<8x128xf32>
    %306 = arith.addf %304, %305 : vector<8x128xf32>
    %307 = math.tanh %306 : vector<8x128xf32>
    %308 = arith.mulf %303, %307 : vector<8x128xf32>
    %309 = arith.truncf %308 : vector<8x128xf32> to vector<8x128xbf16>
    %c0_86 = arith.constant 0 : index
    %c0_87 = arith.constant 0 : index
    %310 = vector.load %arg4[%c0_86, %c0_87] : memref<128x512xbf16, #tpu.memory_space<vmem>>, vector<128x512xbf16>
    %cst_88 = arith.constant dense<0.000000e+00> : vector<8x512xf32>
    %311 = tpu.matmul %309, %310, %cst_88 {dimension_numbers = #tpu.dot_dimension_numbers<[1], [0], [0], [1], [0, 0, 1, 1], [], []>} : vector<8x128xbf16>, vector<128x512xbf16>, vector<8x512xf32> -> vector<8x512xf32>
    %312 = arith.truncf %275 : vector<8x128xf32> to vector<8x128xbf16>
    %c0_89 = arith.constant 0 : index
    %c0_90 = arith.constant 0 : index
    %313 = vector.load %arg5[%c0_89, %c0_90] : memref<128x512xbf16, #tpu.memory_space<vmem>>, vector<128x512xbf16>
    %cst_91 = arith.constant dense<0.000000e+00> : vector<8x512xf32>
    %314 = tpu.matmul %312, %313, %cst_91 {dimension_numbers = #tpu.dot_dimension_numbers<[1], [0], [0], [1], [0, 0, 1, 1], [], []>} : vector<8x128xbf16>, vector<128x512xbf16>, vector<8x512xf32> -> vector<8x512xf32>
    %315 = arith.addf %311, %314 : vector<8x512xf32>
    %316 = arith.addf %315, %3 : vector<8x512xf32>
    %317 = vector.extract_strided_slice %316 {offsets = [0, 0], sizes = [8, 128], strides = [1, 1]} : vector<8x512xf32> to vector<8x128xf32>
    %318 = arith.negf %317 : vector<8x128xf32>
    %319 = math.exp %318 : vector<8x128xf32>
    %cst_92 = arith.constant 1.000000e+00 : f32
    %320 = vector.broadcast %cst_92 : f32 to vector<8x128xf32>
    %321 = arith.addf %320, %319 : vector<8x128xf32>
    %322 = arith.divf %320, %321 : vector<8x128xf32>
    %323 = vector.extract_strided_slice %316 {offsets = [0, 128], sizes = [8, 128], strides = [1, 1]} : vector<8x512xf32> to vector<8x128xf32>
    %324 = arith.negf %323 : vector<8x128xf32>
    %325 = math.exp %324 : vector<8x128xf32>
    %cst_93 = arith.constant 1.000000e+00 : f32
    %326 = vector.broadcast %cst_93 : f32 to vector<8x128xf32>
    %327 = arith.addf %326, %325 : vector<8x128xf32>
    %328 = arith.divf %326, %327 : vector<8x128xf32>
    %329 = vector.extract_strided_slice %316 {offsets = [0, 256], sizes = [8, 128], strides = [1, 1]} : vector<8x512xf32> to vector<8x128xf32>
    %330 = math.tanh %329 : vector<8x128xf32>
    %331 = vector.extract_strided_slice %316 {offsets = [0, 384], sizes = [8, 128], strides = [1, 1]} : vector<8x512xf32> to vector<8x128xf32>
    %332 = arith.negf %331 : vector<8x128xf32>
    %333 = math.exp %332 : vector<8x128xf32>
    %cst_94 = arith.constant 1.000000e+00 : f32
    %334 = vector.broadcast %cst_94 : f32 to vector<8x128xf32>
    %335 = arith.addf %334, %333 : vector<8x128xf32>
    %336 = arith.divf %334, %335 : vector<8x128xf32>
    %337 = arith.mulf %328, %273 : vector<8x128xf32>
    %338 = arith.mulf %322, %330 : vector<8x128xf32>
    %339 = arith.addf %337, %338 : vector<8x128xf32>
    %340 = math.tanh %339 : vector<8x128xf32>
    %341 = arith.mulf %336, %340 : vector<8x128xf32>
    %c5_i32 = arith.constant 5 : i32
    %c8_i32_95 = arith.constant 8 : i32
    %342 = arith.muli %c5_i32, %c8_i32_95 : i32
    %343 = tpu.assume_multiple %342, 8 : i32
    %344 = arith.index_cast %343 : i32 to index
    %c0_96 = arith.constant 0 : index
    %345 = vector.load %arg8[%344, %c0_96] : memref<64x512xf32, #tpu.memory_space<vmem>>, vector<8x512xf32>
    %346 = arith.truncf %308 : vector<8x128xf32> to vector<8x128xbf16>
    %c0_97 = arith.constant 0 : index
    %c0_98 = arith.constant 0 : index
    %347 = vector.load %arg3[%c0_97, %c0_98] : memref<128x512xbf16, #tpu.memory_space<vmem>>, vector<128x512xbf16>
    %cst_99 = arith.constant dense<0.000000e+00> : vector<8x512xf32>
    %348 = tpu.matmul %346, %347, %cst_99 {dimension_numbers = #tpu.dot_dimension_numbers<[1], [0], [0], [1], [0, 0, 1, 1], [], []>} : vector<8x128xbf16>, vector<128x512xbf16>, vector<8x512xf32> -> vector<8x512xf32>
    %349 = arith.addf %345, %348 : vector<8x512xf32>
    %350 = vector.extract_strided_slice %349 {offsets = [0, 0], sizes = [8, 128], strides = [1, 1]} : vector<8x512xf32> to vector<8x128xf32>
    %351 = arith.negf %350 : vector<8x128xf32>
    %352 = math.exp %351 : vector<8x128xf32>
    %cst_100 = arith.constant 1.000000e+00 : f32
    %353 = vector.broadcast %cst_100 : f32 to vector<8x128xf32>
    %354 = arith.addf %353, %352 : vector<8x128xf32>
    %355 = arith.divf %353, %354 : vector<8x128xf32>
    %356 = vector.extract_strided_slice %349 {offsets = [0, 128], sizes = [8, 128], strides = [1, 1]} : vector<8x512xf32> to vector<8x128xf32>
    %357 = arith.negf %356 : vector<8x128xf32>
    %358 = math.exp %357 : vector<8x128xf32>
    %cst_101 = arith.constant 1.000000e+00 : f32
    %359 = vector.broadcast %cst_101 : f32 to vector<8x128xf32>
    %360 = arith.addf %359, %358 : vector<8x128xf32>
    %361 = arith.divf %359, %360 : vector<8x128xf32>
    %362 = vector.extract_strided_slice %349 {offsets = [0, 256], sizes = [8, 128], strides = [1, 1]} : vector<8x512xf32> to vector<8x128xf32>
    %363 = math.tanh %362 : vector<8x128xf32>
    %364 = vector.extract_strided_slice %349 {offsets = [0, 384], sizes = [8, 128], strides = [1, 1]} : vector<8x512xf32> to vector<8x128xf32>
    %365 = arith.negf %364 : vector<8x128xf32>
    %366 = math.exp %365 : vector<8x128xf32>
    %cst_102 = arith.constant 1.000000e+00 : f32
    %367 = vector.broadcast %cst_102 : f32 to vector<8x128xf32>
    %368 = arith.addf %367, %366 : vector<8x128xf32>
    %369 = arith.divf %367, %368 : vector<8x128xf32>
    %370 = arith.mulf %361, %306 : vector<8x128xf32>
    %371 = arith.mulf %355, %363 : vector<8x128xf32>
    %372 = arith.addf %370, %371 : vector<8x128xf32>
    %373 = math.tanh %372 : vector<8x128xf32>
    %374 = arith.mulf %369, %373 : vector<8x128xf32>
    %375 = arith.truncf %374 : vector<8x128xf32> to vector<8x128xbf16>
    %c0_103 = arith.constant 0 : index
    %c0_104 = arith.constant 0 : index
    %376 = vector.load %arg4[%c0_103, %c0_104] : memref<128x512xbf16, #tpu.memory_space<vmem>>, vector<128x512xbf16>
    %cst_105 = arith.constant dense<0.000000e+00> : vector<8x512xf32>
    %377 = tpu.matmul %375, %376, %cst_105 {dimension_numbers = #tpu.dot_dimension_numbers<[1], [0], [0], [1], [0, 0, 1, 1], [], []>} : vector<8x128xbf16>, vector<128x512xbf16>, vector<8x512xf32> -> vector<8x512xf32>
    %378 = arith.truncf %341 : vector<8x128xf32> to vector<8x128xbf16>
    %c0_106 = arith.constant 0 : index
    %c0_107 = arith.constant 0 : index
    %379 = vector.load %arg5[%c0_106, %c0_107] : memref<128x512xbf16, #tpu.memory_space<vmem>>, vector<128x512xbf16>
    %cst_108 = arith.constant dense<0.000000e+00> : vector<8x512xf32>
    %380 = tpu.matmul %378, %379, %cst_108 {dimension_numbers = #tpu.dot_dimension_numbers<[1], [0], [0], [1], [0, 0, 1, 1], [], []>} : vector<8x128xbf16>, vector<128x512xbf16>, vector<8x512xf32> -> vector<8x512xf32>
    %381 = arith.addf %377, %380 : vector<8x512xf32>
    %382 = arith.addf %381, %3 : vector<8x512xf32>
    %383 = vector.extract_strided_slice %382 {offsets = [0, 0], sizes = [8, 128], strides = [1, 1]} : vector<8x512xf32> to vector<8x128xf32>
    %384 = arith.negf %383 : vector<8x128xf32>
    %385 = math.exp %384 : vector<8x128xf32>
    %cst_109 = arith.constant 1.000000e+00 : f32
    %386 = vector.broadcast %cst_109 : f32 to vector<8x128xf32>
    %387 = arith.addf %386, %385 : vector<8x128xf32>
    %388 = arith.divf %386, %387 : vector<8x128xf32>
    %389 = vector.extract_strided_slice %382 {offsets = [0, 128], sizes = [8, 128], strides = [1, 1]} : vector<8x512xf32> to vector<8x128xf32>
    %390 = arith.negf %389 : vector<8x128xf32>
    %391 = math.exp %390 : vector<8x128xf32>
    %cst_110 = arith.constant 1.000000e+00 : f32
    %392 = vector.broadcast %cst_110 : f32 to vector<8x128xf32>
    %393 = arith.addf %392, %391 : vector<8x128xf32>
    %394 = arith.divf %392, %393 : vector<8x128xf32>
    %395 = vector.extract_strided_slice %382 {offsets = [0, 256], sizes = [8, 128], strides = [1, 1]} : vector<8x512xf32> to vector<8x128xf32>
    %396 = math.tanh %395 : vector<8x128xf32>
    %397 = vector.extract_strided_slice %382 {offsets = [0, 384], sizes = [8, 128], strides = [1, 1]} : vector<8x512xf32> to vector<8x128xf32>
    %398 = arith.negf %397 : vector<8x128xf32>
    %399 = math.exp %398 : vector<8x128xf32>
    %cst_111 = arith.constant 1.000000e+00 : f32
    %400 = vector.broadcast %cst_111 : f32 to vector<8x128xf32>
    %401 = arith.addf %400, %399 : vector<8x128xf32>
    %402 = arith.divf %400, %401 : vector<8x128xf32>
    %403 = arith.mulf %394, %339 : vector<8x128xf32>
    %404 = arith.mulf %388, %396 : vector<8x128xf32>
    %405 = arith.addf %403, %404 : vector<8x128xf32>
    %406 = math.tanh %405 : vector<8x128xf32>
    %407 = arith.mulf %402, %406 : vector<8x128xf32>
    %c6_i32 = arith.constant 6 : i32
    %c8_i32_112 = arith.constant 8 : i32
    %408 = arith.muli %c6_i32, %c8_i32_112 : i32
    %409 = tpu.assume_multiple %408, 8 : i32
    %410 = arith.index_cast %409 : i32 to index
    %c0_113 = arith.constant 0 : index
    %411 = vector.load %arg8[%410, %c0_113] : memref<64x512xf32, #tpu.memory_space<vmem>>, vector<8x512xf32>
    %412 = arith.truncf %374 : vector<8x128xf32> to vector<8x128xbf16>
    %c0_114 = arith.constant 0 : index
    %c0_115 = arith.constant 0 : index
    %413 = vector.load %arg3[%c0_114, %c0_115] : memref<128x512xbf16, #tpu.memory_space<vmem>>, vector<128x512xbf16>
    %cst_116 = arith.constant dense<0.000000e+00> : vector<8x512xf32>
    %414 = tpu.matmul %412, %413, %cst_116 {dimension_numbers = #tpu.dot_dimension_numbers<[1], [0], [0], [1], [0, 0, 1, 1], [], []>} : vector<8x128xbf16>, vector<128x512xbf16>, vector<8x512xf32> -> vector<8x512xf32>
    %415 = arith.addf %411, %414 : vector<8x512xf32>
    %416 = vector.extract_strided_slice %415 {offsets = [0, 0], sizes = [8, 128], strides = [1, 1]} : vector<8x512xf32> to vector<8x128xf32>
    %417 = arith.negf %416 : vector<8x128xf32>
    %418 = math.exp %417 : vector<8x128xf32>
    %cst_117 = arith.constant 1.000000e+00 : f32
    %419 = vector.broadcast %cst_117 : f32 to vector<8x128xf32>
    %420 = arith.addf %419, %418 : vector<8x128xf32>
    %421 = arith.divf %419, %420 : vector<8x128xf32>
    %422 = vector.extract_strided_slice %415 {offsets = [0, 128], sizes = [8, 128], strides = [1, 1]} : vector<8x512xf32> to vector<8x128xf32>
    %423 = arith.negf %422 : vector<8x128xf32>
    %424 = math.exp %423 : vector<8x128xf32>
    %cst_118 = arith.constant 1.000000e+00 : f32
    %425 = vector.broadcast %cst_118 : f32 to vector<8x128xf32>
    %426 = arith.addf %425, %424 : vector<8x128xf32>
    %427 = arith.divf %425, %426 : vector<8x128xf32>
    %428 = vector.extract_strided_slice %415 {offsets = [0, 256], sizes = [8, 128], strides = [1, 1]} : vector<8x512xf32> to vector<8x128xf32>
    %429 = math.tanh %428 : vector<8x128xf32>
    %430 = vector.extract_strided_slice %415 {offsets = [0, 384], sizes = [8, 128], strides = [1, 1]} : vector<8x512xf32> to vector<8x128xf32>
    %431 = arith.negf %430 : vector<8x128xf32>
    %432 = math.exp %431 : vector<8x128xf32>
    %cst_119 = arith.constant 1.000000e+00 : f32
    %433 = vector.broadcast %cst_119 : f32 to vector<8x128xf32>
    %434 = arith.addf %433, %432 : vector<8x128xf32>
    %435 = arith.divf %433, %434 : vector<8x128xf32>
    %436 = arith.mulf %427, %372 : vector<8x128xf32>
    %437 = arith.mulf %421, %429 : vector<8x128xf32>
    %438 = arith.addf %436, %437 : vector<8x128xf32>
    %439 = math.tanh %438 : vector<8x128xf32>
    %440 = arith.mulf %435, %439 : vector<8x128xf32>
    %441 = arith.truncf %440 : vector<8x128xf32> to vector<8x128xbf16>
    %c0_120 = arith.constant 0 : index
    %c0_121 = arith.constant 0 : index
    %442 = vector.load %arg4[%c0_120, %c0_121] : memref<128x512xbf16, #tpu.memory_space<vmem>>, vector<128x512xbf16>
    %cst_122 = arith.constant dense<0.000000e+00> : vector<8x512xf32>
    %443 = tpu.matmul %441, %442, %cst_122 {dimension_numbers = #tpu.dot_dimension_numbers<[1], [0], [0], [1], [0, 0, 1, 1], [], []>} : vector<8x128xbf16>, vector<128x512xbf16>, vector<8x512xf32> -> vector<8x512xf32>
    %444 = arith.truncf %407 : vector<8x128xf32> to vector<8x128xbf16>
    %c0_123 = arith.constant 0 : index
    %c0_124 = arith.constant 0 : index
    %445 = vector.load %arg5[%c0_123, %c0_124] : memref<128x512xbf16, #tpu.memory_space<vmem>>, vector<128x512xbf16>
    %cst_125 = arith.constant dense<0.000000e+00> : vector<8x512xf32>
    %446 = tpu.matmul %444, %445, %cst_125 {dimension_numbers = #tpu.dot_dimension_numbers<[1], [0], [0], [1], [0, 0, 1, 1], [], []>} : vector<8x128xbf16>, vector<128x512xbf16>, vector<8x512xf32> -> vector<8x512xf32>
    %447 = arith.addf %443, %446 : vector<8x512xf32>
    %448 = arith.addf %447, %3 : vector<8x512xf32>
    %449 = vector.extract_strided_slice %448 {offsets = [0, 0], sizes = [8, 128], strides = [1, 1]} : vector<8x512xf32> to vector<8x128xf32>
    %450 = arith.negf %449 : vector<8x128xf32>
    %451 = math.exp %450 : vector<8x128xf32>
    %cst_126 = arith.constant 1.000000e+00 : f32
    %452 = vector.broadcast %cst_126 : f32 to vector<8x128xf32>
    %453 = arith.addf %452, %451 : vector<8x128xf32>
    %454 = arith.divf %452, %453 : vector<8x128xf32>
    %455 = vector.extract_strided_slice %448 {offsets = [0, 128], sizes = [8, 128], strides = [1, 1]} : vector<8x512xf32> to vector<8x128xf32>
    %456 = arith.negf %455 : vector<8x128xf32>
    %457 = math.exp %456 : vector<8x128xf32>
    %cst_127 = arith.constant 1.000000e+00 : f32
    %458 = vector.broadcast %cst_127 : f32 to vector<8x128xf32>
    %459 = arith.addf %458, %457 : vector<8x128xf32>
    %460 = arith.divf %458, %459 : vector<8x128xf32>
    %461 = vector.extract_strided_slice %448 {offsets = [0, 256], sizes = [8, 128], strides = [1, 1]} : vector<8x512xf32> to vector<8x128xf32>
    %462 = math.tanh %461 : vector<8x128xf32>
    %463 = vector.extract_strided_slice %448 {offsets = [0, 384], sizes = [8, 128], strides = [1, 1]} : vector<8x512xf32> to vector<8x128xf32>
    %464 = arith.negf %463 : vector<8x128xf32>
    %465 = math.exp %464 : vector<8x128xf32>
    %cst_128 = arith.constant 1.000000e+00 : f32
    %466 = vector.broadcast %cst_128 : f32 to vector<8x128xf32>
    %467 = arith.addf %466, %465 : vector<8x128xf32>
    %468 = arith.divf %466, %467 : vector<8x128xf32>
    %469 = arith.mulf %460, %405 : vector<8x128xf32>
    %470 = arith.mulf %454, %462 : vector<8x128xf32>
    %471 = arith.addf %469, %470 : vector<8x128xf32>
    %472 = math.tanh %471 : vector<8x128xf32>
    %473 = arith.mulf %468, %472 : vector<8x128xf32>
    %c7_i32 = arith.constant 7 : i32
    %c8_i32_129 = arith.constant 8 : i32
    %474 = arith.muli %c7_i32, %c8_i32_129 : i32
    %475 = tpu.assume_multiple %474, 8 : i32
    %476 = arith.index_cast %475 : i32 to index
    %c0_130 = arith.constant 0 : index
    %477 = vector.load %arg8[%476, %c0_130] : memref<64x512xf32, #tpu.memory_space<vmem>>, vector<8x512xf32>
    %478 = arith.truncf %440 : vector<8x128xf32> to vector<8x128xbf16>
    %c0_131 = arith.constant 0 : index
    %c0_132 = arith.constant 0 : index
    %479 = vector.load %arg3[%c0_131, %c0_132] : memref<128x512xbf16, #tpu.memory_space<vmem>>, vector<128x512xbf16>
    %cst_133 = arith.constant dense<0.000000e+00> : vector<8x512xf32>
    %480 = tpu.matmul %478, %479, %cst_133 {dimension_numbers = #tpu.dot_dimension_numbers<[1], [0], [0], [1], [0, 0, 1, 1], [], []>} : vector<8x128xbf16>, vector<128x512xbf16>, vector<8x512xf32> -> vector<8x512xf32>
    %481 = arith.addf %477, %480 : vector<8x512xf32>
    %482 = vector.extract_strided_slice %481 {offsets = [0, 0], sizes = [8, 128], strides = [1, 1]} : vector<8x512xf32> to vector<8x128xf32>
    %483 = arith.negf %482 : vector<8x128xf32>
    %484 = math.exp %483 : vector<8x128xf32>
    %cst_134 = arith.constant 1.000000e+00 : f32
    %485 = vector.broadcast %cst_134 : f32 to vector<8x128xf32>
    %486 = arith.addf %485, %484 : vector<8x128xf32>
    %487 = arith.divf %485, %486 : vector<8x128xf32>
    %488 = vector.extract_strided_slice %481 {offsets = [0, 128], sizes = [8, 128], strides = [1, 1]} : vector<8x512xf32> to vector<8x128xf32>
    %489 = arith.negf %488 : vector<8x128xf32>
    %490 = math.exp %489 : vector<8x128xf32>
    %cst_135 = arith.constant 1.000000e+00 : f32
    %491 = vector.broadcast %cst_135 : f32 to vector<8x128xf32>
    %492 = arith.addf %491, %490 : vector<8x128xf32>
    %493 = arith.divf %491, %492 : vector<8x128xf32>
    %494 = vector.extract_strided_slice %481 {offsets = [0, 256], sizes = [8, 128], strides = [1, 1]} : vector<8x512xf32> to vector<8x128xf32>
    %495 = math.tanh %494 : vector<8x128xf32>
    %496 = vector.extract_strided_slice %481 {offsets = [0, 384], sizes = [8, 128], strides = [1, 1]} : vector<8x512xf32> to vector<8x128xf32>
    %497 = arith.negf %496 : vector<8x128xf32>
    %498 = math.exp %497 : vector<8x128xf32>
    %cst_136 = arith.constant 1.000000e+00 : f32
    %499 = vector.broadcast %cst_136 : f32 to vector<8x128xf32>
    %500 = arith.addf %499, %498 : vector<8x128xf32>
    %501 = arith.divf %499, %500 : vector<8x128xf32>
    %502 = arith.mulf %493, %438 : vector<8x128xf32>
    %503 = arith.mulf %487, %495 : vector<8x128xf32>
    %504 = arith.addf %502, %503 : vector<8x128xf32>
    %505 = math.tanh %504 : vector<8x128xf32>
    %506 = arith.mulf %501, %505 : vector<8x128xf32>
    %507 = arith.truncf %506 : vector<8x128xf32> to vector<8x128xbf16>
    %c0_137 = arith.constant 0 : index
    %c0_138 = arith.constant 0 : index
    %508 = vector.load %arg4[%c0_137, %c0_138] : memref<128x512xbf16, #tpu.memory_space<vmem>>, vector<128x512xbf16>
    %cst_139 = arith.constant dense<0.000000e+00> : vector<8x512xf32>
    %509 = tpu.matmul %507, %508, %cst_139 {dimension_numbers = #tpu.dot_dimension_numbers<[1], [0], [0], [1], [0, 0, 1, 1], [], []>} : vector<8x128xbf16>, vector<128x512xbf16>, vector<8x512xf32> -> vector<8x512xf32>
    %510 = arith.truncf %473 : vector<8x128xf32> to vector<8x128xbf16>
    %c0_140 = arith.constant 0 : index
    %c0_141 = arith.constant 0 : index
    %511 = vector.load %arg5[%c0_140, %c0_141] : memref<128x512xbf16, #tpu.memory_space<vmem>>, vector<128x512xbf16>
    %cst_142 = arith.constant dense<0.000000e+00> : vector<8x512xf32>
    %512 = tpu.matmul %510, %511, %cst_142 {dimension_numbers = #tpu.dot_dimension_numbers<[1], [0], [0], [1], [0, 0, 1, 1], [], []>} : vector<8x128xbf16>, vector<128x512xbf16>, vector<8x512xf32> -> vector<8x512xf32>
    %513 = arith.addf %509, %512 : vector<8x512xf32>
    %514 = arith.addf %513, %3 : vector<8x512xf32>
    %515 = vector.extract_strided_slice %514 {offsets = [0, 0], sizes = [8, 128], strides = [1, 1]} : vector<8x512xf32> to vector<8x128xf32>
    %516 = arith.negf %515 : vector<8x128xf32>
    %517 = math.exp %516 : vector<8x128xf32>
    %cst_143 = arith.constant 1.000000e+00 : f32
    %518 = vector.broadcast %cst_143 : f32 to vector<8x128xf32>
    %519 = arith.addf %518, %517 : vector<8x128xf32>
    %520 = arith.divf %518, %519 : vector<8x128xf32>
    %521 = vector.extract_strided_slice %514 {offsets = [0, 128], sizes = [8, 128], strides = [1, 1]} : vector<8x512xf32> to vector<8x128xf32>
    %522 = arith.negf %521 : vector<8x128xf32>
    %523 = math.exp %522 : vector<8x128xf32>
    %cst_144 = arith.constant 1.000000e+00 : f32
    %524 = vector.broadcast %cst_144 : f32 to vector<8x128xf32>
    %525 = arith.addf %524, %523 : vector<8x128xf32>
    %526 = arith.divf %524, %525 : vector<8x128xf32>
    %527 = vector.extract_strided_slice %514 {offsets = [0, 256], sizes = [8, 128], strides = [1, 1]} : vector<8x512xf32> to vector<8x128xf32>
    %528 = math.tanh %527 : vector<8x128xf32>
    %529 = vector.extract_strided_slice %514 {offsets = [0, 384], sizes = [8, 128], strides = [1, 1]} : vector<8x512xf32> to vector<8x128xf32>
    %530 = arith.negf %529 : vector<8x128xf32>
    %531 = math.exp %530 : vector<8x128xf32>
    %cst_145 = arith.constant 1.000000e+00 : f32
    %532 = vector.broadcast %cst_145 : f32 to vector<8x128xf32>
    %533 = arith.addf %532, %531 : vector<8x128xf32>
    %534 = arith.divf %532, %533 : vector<8x128xf32>
    %535 = arith.mulf %526, %471 : vector<8x128xf32>
    %536 = arith.mulf %520, %528 : vector<8x128xf32>
    %537 = arith.addf %535, %536 : vector<8x128xf32>
    %538 = math.tanh %537 : vector<8x128xf32>
    %539 = arith.mulf %534, %538 : vector<8x128xf32>
    %c8_i32_146 = arith.constant 8 : i32
    %c0_147 = arith.constant 0 : index
    %c0_148 = arith.constant 0 : index
    %540 = vector.load %arg7[%c0_147, %c0_148] : memref<8x128xf32, #tpu.memory_space<vmem>>, vector<8x128xf32>
    tpu.vector_store %arg7[%c0_147, %c0_148], %539 {strides = array<i32>} : memref<8x128xf32, #tpu.memory_space<vmem>>, vector<8x128xf32>,
    return
  }
}

</mosaic_0001>

<bundles_post_ra>
// kernel: lstm_pallas.1
= control target key start
LH: loop header
LB: loop body
LE: loop exit
PB: predicated region body
PF: predicated region fallthrough
CT: control target
= control target key end

     0   :  { %vm110_vm0 = vcmask 1043456   ;;  %v4212_v2 = vmov 0.0   ;;  %vm85_vm1 = vcmask 31744   ;;  %v6823_v45 = vmov 0   ;;  %s6815_s1 = inlined_call_operand.vmem [shape: f32[4,512], index: 1, kind: input, shape index: {}]   ;;  %s6816_s0 = inlined_call_operand.vmem [shape: f32[64,4], index: 0, kind: input, shape index: {}]   ;;  %s6817_s3 = inlined_call_operand.vmem [shape: bf16[128,512], index: 3, kind: input, shape index: {}]   ;;  %s6818_s5 = inlined_call_operand.vmem [shape: bf16[128,512], index: 5, kind: input, shape index: {}]   ;;  %s6819_s4 = inlined_call_operand.vmem [shape: bf16[128,512], index: 4, kind: input, shape index: {}]   ;;  %s6820_s2 = inlined_call_operand.vmem [shape: f32[1,512], index: 2, kind: input, shape index: {}]   ;;  %s6821_s6 = inlined_call_operand.vmem [shape: f32[1,512], index: 6, kind: input, shape index: {}]   ;;  %s6822_s7 = inlined_call_operand.vmem [shape: f32[8,128], index: 7, kind: output, shape index: {}]  }
   0x1   :  { %v58_v0 = vld [vmem:[%s6815_s1] sm:$0xff]  ;;  %v59_v1 = vld [vmem:[%s6815_s1 + $0x8] sm:$0xff]  ;;  %183 = vmatprep.mubr.f32.mxu0 %v4212_v2  ;;  %296 = vmatprep.mubr.f32.mxu1 %v4212_v2  ;;  %v52_v15 = vld [vmem:[%s6816_s0 + $0x10] sm:$0xff] }
   0x2   :  { %v50_v3 = vld [vmem:[%s6816_s0] sm:$0xff]  ;;  %v83_v4 = vcombine.high %v58_v0, %v58_v0  ;;  %v84_v5 = vcombine.high %v59_v1, %v59_v1  ;;  %v4273_v7 = vld [vmem:[%s6817_s3 + $0xc] ss:$16 sps:$4 sm:$0xff]   ;;  %v4285_v9 = vld [vmem:[%s6817_s3 + $0x8] ss:$16 sps:$4 sm:$0xff]  }
   0x3   :  { %v4268_v6 = vld [vmem:[%s6817_s3 + $0x4] ss:$16 sps:$4 sm:$0xff]   ;;  %v4280_v8 = vld [vmem:[%s6817_s3] ss:$16 sps:$4 sm:$0xff]   ;;  %v51_v10 = vld [vmem:[%s6816_s0 + $0x8] sm:$0xff] }
   0x4   :  { %3452 = vmatprep.subr.msk.mxu0 %vm110_vm0, %v83_v4  ;;  %3462 = vmatprep.subr.msk.mxu1 %vm110_vm0, %v84_v5  ;;  %v4299_v11 = vld [vmem:[%s6817_s3 + $0x24] ss:$16 sps:$4 sm:$0xff]   ;;  %v4304_v12 = vld [vmem:[%s6817_s3 + $0x2c] ss:$16 sps:$4 sm:$0xff]   ;;  %v4309_v13 = vld [vmem:[%s6817_s3 + $0x20] ss:$16 sps:$4 sm:$0xff]  }
   0x5   :  { %3453 = vmatpush1.msk.msra.mxu0 %vm110_vm0, %v58_v0  ;;  %3463 = vmatpush1.msk.msra.mxu1 %vm110_vm0, %v59_v1  ;;  %v4316_v14 = vld [vmem:[%s6817_s3 + $0x28] ss:$16 sps:$4 sm:$0xff]   ;;  %v4328_v16 = vld [vmem:[%s6817_s3 + $0x44] ss:$16 sps:$4 sm:$0xff]   ;;  %v4333_v17 = vld [vmem:[%s6817_s3 + $0x4c] ss:$16 sps:$4 sm:$0xff]  }
   0x6   :  { %3454 = vmatmul.mubr.msk.f32.vlgmr.msra.gmra.mrb[0].mxu0 %vm85_vm1, %v50_v3  ;;  %3464 = vmatmul.mubr.msk.f32.vlgmr.msra.gmra.mrb[0].mxu1 %vm85_vm1, %v50_v3  ;;  %v4340_v18 = vld [vmem:[%s6817_s3 + $0x40] ss:$16 sps:$4 sm:$0xff]   ;;  %v4347_v19 = vld [vmem:[%s6817_s3 + $0x48] ss:$16 sps:$4 sm:$0xff]   ;;  %v4359_v21 = vld [vmem:[%s6817_s3 + $0x64] ss:$16 sps:$4 sm:$0xff]  }
   0x7   :  { %576 = vmatprep.subr.bf16.mxu0 %v4268_v6  ;;  %617 = vmatprep.subr.bf16.mxu1 %v4273_v7  ;;  %v53_v20 = vld [vmem:[%s6816_s0 + $0x18] sm:$0xff]  ;;  %v4373_v23 = vld [vmem:[%s6817_s3 + $0x60] ss:$16 sps:$4 sm:$0xff]   ;;  %v4392_v26 = vld [vmem:[%s6817_s3 + $0x84] ss:$16 sps:$4 sm:$0xff]  }
   0x8   :  { %577 = vmatpush1.bf16.msra.mxu0 %v4280_v8  ;;  %618 = vmatpush1.bf16.msra.mxu1 %v4285_v9  ;;  %v4366_v22 = vld [vmem:[%s6817_s3 + $0x6c] ss:$16 sps:$4 sm:$0xff]   ;;  %v4378_v24 = vld [vmem:[%s6817_s3 + $0x68] ss:$16 sps:$4 sm:$0xff]   ;;  %v54_v25 = vld [vmem:[%s6816_s0 + $0x20] sm:$0xff] }
   0x9   :  { %189 = vmatprep.mubr.f32.mxu0 %v4212_v2  ;;  %302 = vmatprep.mubr.f32.mxu1 %v4212_v2  ;;  %v4397_v27 = vld [vmem:[%s6817_s3 + $0x8c] ss:$16 sps:$4 sm:$0xff]   ;;  %v4402_v28 = vld [vmem:[%s6817_s3 + $0x80] ss:$16 sps:$4 sm:$0xff]   ;;  %v4409_v29 = vld [vmem:[%s6817_s3 + $0x88] ss:$16 sps:$4 sm:$0xff]  }
   0xa   :  { %3455 = vmatmul.mubr.msk.f32.gmra.mrb[2].mxu0 %vm85_vm1, %v51_v10  ;;  %3465 = vmatmul.mubr.msk.f32.gmra.mrb[2].mxu1 %vm85_vm1, %v51_v10  ;;  %v55_v30 = vld [vmem:[%s6816_s0 + $0x28] sm:$0xff]  ;;  %v4421_v31 = vld [vmem:[%s6817_s3 + $0xa4] ss:$16 sps:$4 sm:$0xff]   ;;  %v4433_v33 = vld [vmem:[%s6817_s3 + $0xa0] ss:$16 sps:$4 sm:$0xff]  }
   0xb   :  { %578 = vmatprep.subr.bf16.mxu0 %v4299_v11  ;;  %619 = vmatprep.subr.bf16.mxu1 %v4304_v12  ;;  %v4426_v32 = vld [vmem:[%s6817_s3 + $0xac] ss:$16 sps:$4 sm:$0xff]   ;;  %v4440_v34 = vld [vmem:[%s6817_s3 + $0xa8] ss:$16 sps:$4 sm:$0xff]   ;;  %v56_v35 = vld [vmem:[%s6816_s0 + $0x30] sm:$0xff] }
   0xc   :  { %579 = vmatpush1.bf16.msra.mxu0 %v4309_v13  ;;  %620 = vmatpush1.bf16.msra.mxu1 %v4316_v14  ;;  %v4454_v36 = vld [vmem:[%s6817_s3 + $0xc4] ss:$16 sps:$4 sm:$0xff]   ;;  %v4459_v37 = vld [vmem:[%s6817_s3 + $0xcc] ss:$16 sps:$4 sm:$0xff]   ;;  %v4466_v38 = vld [vmem:[%s6817_s3 + $0xc0] ss:$16 sps:$4 sm:$0xff]  }
   0xd   :  { %195 = vmatprep.mubr.f32.mxu0 %v4212_v2  ;;  %308 = vmatprep.mubr.f32.mxu1 %v4212_v2  ;;  %v4471_v39 = vld [vmem:[%s6817_s3 + $0xc8] ss:$16 sps:$4 sm:$0xff]   ;;  %v4485_v41 = vld [vmem:[%s6817_s3 + $0xe4] ss:$16 sps:$4 sm:$0xff]   ;;  %v4490_v42 = vld [vmem:[%s6817_s3 + $0xec] ss:$16 sps:$4 sm:$0xff]  }
   0xe   :  { %3456 = vmatmul.mubr.msk.f32.gmra.mrb[4].mxu0 %vm85_vm1, %v52_v15  ;;  %3466 = vmatmul.mubr.msk.f32.gmra.mrb[4].mxu1 %vm85_vm1, %v52_v15  ;;  %v57_v40 = vld [vmem:[%s6816_s0 + $0x38] sm:$0xff]  ;;  %v4497_v43 = vld [vmem:[%s6817_s3 + $0xe0] ss:$16 sps:$4 sm:$0xff]   ;;  %v4521_v46 = vld [vmem:[%s6818_s5 + $0x4] ss:$16 sps:$4 sm:$0xff]  }
   0xf   :  { %580 = vmatprep.subr.bf16.mxu0 %v4328_v16  ;;  %621 = vmatprep.subr.bf16.mxu1 %v4333_v17  ;;  %v4502_v44 = vld [vmem:[%s6817_s3 + $0xe8] ss:$16 sps:$4 sm:$0xff]   ;;  %v4526_v47 = vld [vmem:[%s6818_s5 + $0xc] ss:$16 sps:$4 sm:$0xff]   ;;  %v4532_v48 = vld [vmem:[%s6818_s5] ss:$16 sps:$4 sm:$0xff]  }
  0x10   :  { %581 = vmatpush1.bf16.msra.mxu0 %v4340_v18  ;;  %622 = vmatpush1.bf16.msra.mxu1 %v4347_v19  ;;  %v4537_v49 = vld [vmem:[%s6818_s5 + $0x8] ss:$16 sps:$4 sm:$0xff]   ;;  %v4545_v50 = vld [vmem:[%s6818_s5 + $0x24] ss:$16 sps:$4 sm:$0xff]   ;;  %v4550_v51 = vld [vmem:[%s6818_s5 + $0x2c] ss:$16 sps:$4 sm:$0xff]  }
  0x11   :  { %201 = vmatprep.mubr.f32.mxu0 %v4212_v2  ;;  %314 = vmatprep.mubr.f32.mxu1 %v4212_v2  ;;  %v4555_v52 = vld [vmem:[%s6818_s5 + $0x20] ss:$16 sps:$4 sm:$0xff]   ;;  %v4561_v53 = vld [vmem:[%s6818_s5 + $0x28] ss:$16 sps:$4 sm:$0xff]   ;;  %v4569_v54 = vld [vmem:[%s6818_s5 + $0x44] ss:$16 sps:$4 sm:$0xff]  }
  0x12   :  { %3457 = vmatmul.mubr.msk.f32.gmra.mrb[6].mxu0 %vm85_vm1, %v53_v20  ;;  %3467 = vmatmul.mubr.msk.f32.gmra.mrb[6].mxu1 %vm85_vm1, %v53_v20  ;;  %7095 = vst [vmem:[#allocation3_spill] sm:$0xff] %v4569_v54  ;;  %v4574_v55 = vld [vmem:[%s6818_s5 + $0x4c] ss:$16 sps:$4 sm:$0xff]   ;;  %v4579_v56 = vld [vmem:[%s6818_s5 + $0x40] ss:$16 sps:$4 sm:$0xff]  }
  0x13   :  { %582 = vmatprep.subr.bf16.mxu0 %v4359_v21  ;;  %623 = vmatprep.subr.bf16.mxu1 %v4366_v22  ;;  %7096 = vst [vmem:[#allocation4_spill] sm:$0xff] %v4574_v55  ;;  %7097 = vst [vmem:[#allocation5_spill] sm:$0xff] %v4579_v56  ;;  %v4585_v57 = vld [vmem:[%s6818_s5 + $0x48] ss:$16 sps:$4 sm:$0xff]   ;;  %v4593_v58 = vld [vmem:[%s6818_s5 + $0x64] ss:$16 sps:$4 sm:$0xff]  }
  0x14   :  { %583 = vmatpush1.bf16.msra.mxu0 %v4373_v23  ;;  %624 = vmatpush1.bf16.msra.mxu1 %v4378_v24  ;;  %7098 = vst [vmem:[#allocation6_spill] sm:$0xff] %v4585_v57  ;;  %7099 = vst [vmem:[#allocation7_spill] sm:$0xff] %v4593_v58  ;;  %v4598_v59 = vld [vmem:[%s6818_s5 + $0x6c] ss:$16 sps:$4 sm:$0xff]   ;;  %v4603_v60 = vld [vmem:[%s6818_s5 + $0x60] ss:$16 sps:$4 sm:$0xff]  }
  0x15   :  { %207 = vmatprep.mubr.f32.mxu0 %v4212_v2  ;;  %320 = vmatprep.mubr.f32.mxu1 %v4212_v2  ;;  %7100 = vst [vmem:[#allocation8_spill] sm:$0xff] %v4598_v59  ;;  %7101 = vst [vmem:[#allocation9_spill] sm:$0xff] %v4603_v60  ;;  %v4609_v61 = vld [vmem:[%s6818_s5 + $0x68] ss:$16 sps:$4 sm:$0xff]   ;;  %v4617_v62 = vld [vmem:[%s6818_s5 + $0x84] ss:$16 sps:$4 sm:$0xff]  }
  0x16   :  { %3458 = vmatmul.mubr.msk.f32.gmra.mrb[8].mxu0 %vm85_vm1, %v54_v25  ;;  %3468 = vmatmul.mubr.msk.f32.gmra.mrb[8].mxu1 %vm85_vm1, %v54_v25  ;;  %7102 = vst [vmem:[#allocation10_spill] sm:$0xff] %v4609_v61  ;;  %7103 = vst [vmem:[#allocation11_spill] sm:$0xff] %v4617_v62  ;;  %v4622_v63 = vld [vmem:[%s6818_s5 + $0x8c] ss:$16 sps:$4 sm:$0xff]   ;;  %v4628_v0 = vld [vmem:[%s6818_s5 + $0x80] ss:$16 sps:$4 sm:$0xff]  }
  0x17   :  { %584 = vmatprep.subr.bf16.mxu0 %v4392_v26  ;;  %625 = vmatprep.subr.bf16.mxu1 %v4397_v27  ;;  %7104 = vst [vmem:[#allocation12_spill] sm:$0xff] %v4622_v63  ;;  %7105 = vst [vmem:[#allocation13_spill] sm:$0xff] %v4628_v0  ;;  %v4634_v1 = vld [vmem:[%s6818_s5 + $0x88] ss:$16 sps:$4 sm:$0xff]   ;;  %v4646_v3 = vld [vmem:[%s6818_s5 + $0xac] ss:$16 sps:$4 sm:$0xff]  }
  0x18   :  { %585 = vmatpush1.bf16.msra.mxu0 %v4402_v28  ;;  %626 = vmatpush1.bf16.msra.mxu1 %v4409_v29  ;;  %7106 = vst [vmem:[#allocation14_spill] sm:$0xff] %v4634_v1  ;;  %7108 = vst [vmem:[#allocation16_spill] sm:$0xff] %v4646_v3  ;;  %v4651_v4 = vld [vmem:[%s6818_s5 + $0xa0] ss:$16 sps:$4 sm:$0xff]   ;;  %v4657_v5 = vld [vmem:[%s6818_s5 + $0xa8] ss:$16 sps:$4 sm:$0xff]  }
  0x19   :  { %213 = vmatprep.mubr.f32.mxu0 %v4212_v2  ;;  %326 = vmatprep.mubr.f32.mxu1 %v4212_v2  ;;  %7109 = vst [vmem:[#allocation17_spill] sm:$0xff] %v4651_v4  ;;  %7110 = vst [vmem:[#allocation18_spill] sm:$0xff] %v4657_v5  ;;  %v4665_v10 = vld [vmem:[%s6818_s5 + $0xc4] ss:$16 sps:$4 sm:$0xff]   ;;  %v4670_v15 = vld [vmem:[%s6818_s5 + $0xcc] ss:$16 sps:$4 sm:$0xff]  }
  0x1a   :  { %3459 = vmatmul.mubr.msk.f32.gmra.mrb[10].mxu0 %vm85_vm1, %v55_v30  ;;  %3469 = vmatmul.mubr.msk.f32.gmra.mrb[10].mxu1 %vm85_vm1, %v55_v30  ;;  %7111 = vst [vmem:[#allocation19_spill] sm:$0xff] %v4665_v10  ;;  %7112 = vst [vmem:[#allocation20_spill] sm:$0xff] %v4670_v15  ;;  %v4675_v20 = vld [vmem:[%s6818_s5 + $0xc0] ss:$16 sps:$4 sm:$0xff]   ;;  %v4681_v25 = vld [vmem:[%s6818_s5 + $0xc8] ss:$16 sps:$4 sm:$0xff]  }
  0x1b   :  { %586 = vmatprep.subr.bf16.mxu0 %v4421_v31  ;;  %627 = vmatprep.subr.bf16.mxu1 %v4426_v32  ;;  %7113 = vst [vmem:[#allocation21_spill] sm:$0xff] %v4675_v20  ;;  %7114 = vst [vmem:[#allocation22_spill] sm:$0xff] %v4681_v25  ;;  %v4689_v30 = vld [vmem:[%s6818_s5 + $0xe4] ss:$16 sps:$4 sm:$0xff]  }
  0x1c   :  { %587 = vmatpush1.bf16.msra.mxu0 %v4433_v33  ;;  %628 = vmatpush1.bf16.msra.mxu1 %v4440_v34  ;;  %7115 = vst [vmem:[#allocation23_spill] sm:$0xff] %v4689_v30 }
  0x1d   :  { %219 = vmatprep.mubr.f32.mxu0 %v4212_v2  ;;  %332 = vmatprep.mubr.f32.mxu1 %v4212_v2 }
  0x1e   :  { %3460 = vmatmul.mubr.msk.f32.gmra.mrb[12].mxu0 %vm85_vm1, %v56_v35  ;;  %3470 = vmatmul.mubr.msk.f32.gmra.mrb[12].mxu1 %vm85_vm1, %v56_v35  ;;  %v4694_v35 = vld [vmem:[%s6818_s5 + $0xec] ss:$16 sps:$4 sm:$0xff]  }
  0x1f   :  { %588 = vmatprep.subr.bf16.mxu0 %v4454_v36  ;;  %629 = vmatprep.subr.bf16.mxu1 %v4459_v37  ;;  %7116 = vst [vmem:[#allocation24_spill] sm:$0xff] %v4694_v35 }
  0x20   :  { %589 = vmatpush1.bf16.msra.mxu0 %v4466_v38  ;;  %630 = vmatpush1.bf16.msra.mxu1 %v4471_v39 }
  0x21   :  { %225 = vmatprep.mubr.f32.mxu0 %v4212_v2  ;;  %338 = vmatprep.mubr.f32.mxu1 %v4212_v2  ;;  %v4641_v2 = vld [vmem:[%s6818_s5 + $0xa4] ss:$16 sps:$4 sm:$0xff]  }
  0x22   :  { %3461 = vmatmul.mubr.msk.f32.gmra.mrb[14].mxu0 %vm85_vm1, %v57_v40  ;;  %3471 = vmatmul.mubr.msk.f32.gmra.mrb[14].mxu1 %vm85_vm1, %v57_v40  ;;  %7107 = vst [vmem:[#allocation15_spill] sm:$0xff] %v4641_v2  ;;  %v4699_v40 = vld [vmem:[%s6818_s5 + $0xe0] ss:$16 sps:$4 sm:$0xff]  }
  0x23   :  { %590 = vmatprep.subr.bf16.mxu0 %v4485_v41  ;;  %631 = vmatprep.subr.bf16.mxu1 %v4490_v42  ;;  %7117 = vst [vmem:[#allocation25_spill] sm:$0xff] %v4699_v40 }
  0x24   :  { %591 = vmatpush1.bf16.msra.mxu0 %v4497_v43  ;;  %632 = vmatpush1.bf16.msra.mxu1 %v4502_v44 }
  0x25   :  { %608 = vmatprep.mubr.bf16.mxu0 %v6823_v45  ;;  %649 = vmatprep.mubr.bf16.mxu1 %v6823_v45 }
  0x26   :  { %911 = vmatprep.subr.bf16.mxu0 %v4521_v46  ;;  %952 = vmatprep.subr.bf16.mxu1 %v4526_v47 }
  0x27   :  { %609 = vmatmul.mubr.bf16.vlgmr.msra.gmra.mrb[16].mxu0 %v6823_v45  ;;  %650 = vmatmul.mubr.bf16.vlgmr.msra.gmra.mrb[16].mxu1 %v6823_v45 }
  0x28   :  { %943 = vmatprep.mubr.bf16.mxu0 %v6823_v45  ;;  %984 = vmatprep.mubr.bf16.mxu1 %v6823_v45  ;;  %v4705_v45 = vld [vmem:[%s6818_s5 + $0xe8] ss:$16 sps:$4 sm:$0xff]  }
  0x29   :  { %912 = vmatpush1.bf16.msra.mxu0 %v4532_v48  ;;  %953 = vmatpush1.bf16.msra.mxu1 %v4537_v49  ;;  %7118 = vst [vmem:[#allocation26_spill] sm:$0xff] %v4705_v45 }
  0x2a   :  { %913 = vmatprep.subr.bf16.mxu0 %v4545_v50  ;;  %954 = vmatprep.subr.bf16.mxu1 %v4550_v51 }
  0x2d   :  { %914 = vmatpush1.bf16.msra.mxu0 %v4555_v52  ;;  %955 = vmatpush1.bf16.msra.mxu1 %v4561_v53 }
  0x2e   :  { %915 = vmatprep.subr.bf16.mxu0 %v4569_v54  ;;  %956 = vmatprep.subr.bf16.mxu1 %v4574_v55 }
  0x31   :  { %916 = vmatpush1.bf16.msra.mxu0 %v4579_v56  ;;  %957 = vmatpush1.bf16.msra.mxu1 %v4585_v57 }
  0x32   :  { %917 = vmatprep.subr.bf16.mxu0 %v4593_v58  ;;  %958 = vmatprep.subr.bf16.mxu1 %v4598_v59 }
  0x35   :  { %918 = vmatpush1.bf16.msra.mxu0 %v4603_v60  ;;  %959 = vmatpush1.bf16.msra.mxu1 %v4609_v61 }
  0x36   :  { %919 = vmatprep.subr.bf16.mxu0 %v4617_v62  ;;  %960 = vmatprep.subr.bf16.mxu1 %v4622_v63 }
  0x39   :  { %920 = vmatpush1.bf16.msra.mxu0 %v4628_v0  ;;  %961 = vmatpush1.bf16.msra.mxu1 %v4634_v1 }
  0x3a   :  { %921 = vmatprep.subr.bf16.mxu0 %v4641_v2  ;;  %962 = vmatprep.subr.bf16.mxu1 %v4646_v3 }
  0x3d   :  { %922 = vmatpush1.bf16.msra.mxu0 %v4651_v4  ;;  %963 = vmatpush1.bf16.msra.mxu1 %v4657_v5 }
  0x3e   :  { %923 = vmatprep.subr.bf16.mxu0 %v4665_v10  ;;  %964 = vmatprep.subr.bf16.mxu1 %v4670_v15  ;;  %v4770_v15 = vld [vmem:[%s6819_s4 + $0x4c] ss:$16 sps:$4 sm:$0xff]  }
  0x3f   :  { %7129 = vst [vmem:[#allocation36_spill] sm:$0xff] %v4770_v15 }
  0x41   :  { %924 = vmatpush1.bf16.msra.mxu0 %v4675_v20  ;;  %965 = vmatpush1.bf16.msra.mxu1 %v4681_v25  ;;  %v4713_v25 = vld [vmem:[%s6819_s4 + $0x4] ss:$16 sps:$4 sm:$0xff]   ;;  %v7120_v20 = vmov 0  }
  0x42   :  { %925 = vmatprep.subr.bf16.mxu0 %v4689_v30  ;;  %966 = vmatprep.subr.bf16.mxu1 %v4694_v35  ;;  %7119 = vst [vmem:[#allocation27_spill] sm:$0xff] %v4713_v25  ;;  %v4719_v30 = vld [vmem:[%s6819_s4 + $0xc] ss:$16 sps:$4 sm:$0xff]  }
  0x43   :  { %7121 = vst [vmem:[#allocation28_spill] sm:$0xff] %v4719_v30  ;;  %v4745_v35 = vld [vmem:[%s6819_s4 + $0x2c] ss:$16 sps:$4 sm:$0xff]  }
  0x44   :  { %7125 = vst [vmem:[#allocation32_spill] sm:$0xff] %v4745_v35 }
  0x45   :  { %926 = vmatpush1.bf16.msra.mxu0 %v4699_v40  ;;  %967 = vmatpush1.bf16.msra.mxu1 %v4705_v45  ;;  %v4726_v45 = vld [vmem:[%s6819_s4] ss:$16 sps:$4 sm:$0xff]   ;;  %v4731_v40 = vld [vmem:[%s6819_s4 + $0x8] ss:$16 sps:$4 sm:$0xff]  }
  0x46   :  { %1153 = vmatprep.subr.bf16.mxu0 %v4713_v25  ;;  %7122 = vst [vmem:[#allocation29_spill] sm:$0xff] %v4726_v45  ;;  %7123 = vst [vmem:[#allocation30_spill] sm:$0xff] %v4731_v40  ;;  %1194 = vmatprep.subr.bf16.mxu1 %v4719_v30  ;;  %v4740_v25 = vld [vmem:[%s6819_s4 + $0x24] ss:$16 sps:$4 sm:$0xff]   ;;  %v4750_v30 = vld [vmem:[%s6819_s4 + $0x20] ss:$16 sps:$4 sm:$0xff]  }
  0x47   :  { %7124 = vst [vmem:[#allocation31_spill] sm:$0xff] %v4740_v25  ;;  %7126 = vst [vmem:[#allocation33_spill] sm:$0xff] %v4750_v30 }
  0x48   :  { %944 = vmatmul.mubr.bf16.vlgmr.msra.gmra.mrb[20].mxu0 %v7120_v20  ;;  %985 = vmatmul.mubr.bf16.vlgmr.msra.gmra.mrb[20].mxu1 %v7120_v20 }
  0x49   :  { %1185 = vmatprep.mubr.bf16.mxu0 %v7120_v20  ;;  %1154 = vmatpush1.bf16.msra.mxu0 %v4726_v45  ;;  %v4755_v45 = vld [vmem:[%s6819_s4 + $0x28] ss:$16 sps:$4 sm:$0xff]  }
  0x4a   :  { %1195 = vmatpush1.bf16.msra.mxu1 %v4731_v40  ;;  %7127 = vst [vmem:[#allocation34_spill] sm:$0xff] %v4755_v45  ;;  %1226 = vmatprep.mubr.bf16.mxu1 %v7120_v20  ;;  %v4765_v40 = vld [vmem:[%s6819_s4 + $0x44] ss:$16 sps:$4 sm:$0xff]  }
  0x4b   :  { %1155 = vmatprep.subr.bf16.mxu0 %v4740_v25  ;;  %1196 = vmatprep.subr.bf16.mxu1 %v4745_v35  ;;  %7128 = vst [vmem:[#allocation35_spill] sm:$0xff] %v4765_v40  ;;  %v4775_v25 = vld [vmem:[%s6819_s4 + $0x40] ss:$16 sps:$4 sm:$0xff]   ;;  %v4794_v35 = vld [vmem:[%s6819_s4 + $0x6c] ss:$16 sps:$4 sm:$0xff]  }
  0x4c   :  { %7130 = vst [vmem:[#allocation37_spill] sm:$0xff] %v4775_v25  ;;  %7133 = vst [vmem:[#allocation40_spill] sm:$0xff] %v4794_v35 }
  0x4d   :  { %1156 = vmatpush1.bf16.msra.mxu0 %v4750_v30  ;;  %v4780_v30 = vld [vmem:[%s6819_s4 + $0x48] ss:$16 sps:$4 sm:$0xff]  }
  0x4e   :  { %1197 = vmatpush1.bf16.msra.mxu1 %v4755_v45  ;;  %7131 = vst [vmem:[#allocation38_spill] sm:$0xff] %v4780_v30  ;;  %1157 = vmatprep.subr.bf16.mxu0 %v4765_v40  ;;  %v4789_v45 = vld [vmem:[%s6819_s4 + $0x64] ss:$16 sps:$4 sm:$0xff]   ;;  %v4799_v40 = vld [vmem:[%s6819_s4 + $0x60] ss:$16 sps:$4 sm:$0xff]  }
  0x4f   :  { %1198 = vmatprep.subr.bf16.mxu1 %v4770_v15  ;;  %7132 = vst [vmem:[#allocation39_spill] sm:$0xff] %v4789_v45  ;;  %7134 = vst [vmem:[#allocation41_spill] sm:$0xff] %v4799_v40  ;;  %v4818_v15 = vld [vmem:[%s6819_s4 + $0x8c] ss:$16 sps:$4 sm:$0xff]  }
  0x50   :  { %7137 = vst [vmem:[#allocation44_spill] sm:$0xff] %v4818_v15 }
  0x51   :  { %1158 = vmatpush1.bf16.msra.mxu0 %v4775_v25  ;;  %v4804_v25 = vld [vmem:[%s6819_s4 + $0x68] ss:$16 sps:$4 sm:$0xff]  }
  0x52   :  { %1199 = vmatpush1.bf16.msra.mxu1 %v4780_v30  ;;  %7135 = vst [vmem:[#allocation42_spill] sm:$0xff] %v4804_v25  ;;  %1159 = vmatprep.subr.bf16.mxu0 %v4789_v45  ;;  %v4813_v30 = vld [vmem:[%s6819_s4 + $0x84] ss:$16 sps:$4 sm:$0xff]   ;;  %v4823_v45 = vld [vmem:[%s6819_s4 + $0x80] ss:$16 sps:$4 sm:$0xff]  }
  0x53   :  { %1200 = vmatprep.subr.bf16.mxu1 %v4794_v35  ;;  %7136 = vst [vmem:[#allocation43_spill] sm:$0xff] %v4813_v30  ;;  %7138 = vst [vmem:[#allocation45_spill] sm:$0xff] %v4823_v45  ;;  %v4840_v35 = vld [vmem:[%s6819_s4 + $0xac] ss:$16 sps:$4 sm:$0xff]  }
  0x54   :  { %7141 = vst [vmem:[#allocation48_spill] sm:$0xff] %v4840_v35 }
  0x55   :  { %1160 = vmatpush1.bf16.msra.mxu0 %v4799_v40  ;;  %v4828_v40 = vld [vmem:[%s6819_s4 + $0x88] ss:$16 sps:$4 sm:$0xff]  }
  0x56   :  { %1201 = vmatpush1.bf16.msra.mxu1 %v4804_v25  ;;  %7139 = vst [vmem:[#allocation46_spill] sm:$0xff] %v4828_v40  ;;  %1161 = vmatprep.subr.bf16.mxu0 %v4813_v30  ;;  %v4835_v25 = vld [vmem:[%s6819_s4 + $0xa4] ss:$16 sps:$4 sm:$0xff]   ;;  %v4847_v30 = vld [vmem:[%s6819_s4 + $0xa0] ss:$16 sps:$4 sm:$0xff]  }
  0x57   :  { %1202 = vmatprep.subr.bf16.mxu1 %v4818_v15  ;;  %7140 = vst [vmem:[#allocation47_spill] sm:$0xff] %v4835_v25  ;;  %7142 = vst [vmem:[#allocation49_spill] sm:$0xff] %v4847_v30  ;;  %v4852_v15 = vld [vmem:[%s6819_s4 + $0xa8] ss:$16 sps:$4 sm:$0xff]  }
  0x58   :  { %7143 = vst [vmem:[#allocation50_spill] sm:$0xff] %v4852_v15 }
  0x59   :  { %1162 = vmatpush1.bf16.msra.mxu0 %v4823_v45  ;;  %v4859_v45 = vld [vmem:[%s6819_s4 + $0xc4] ss:$16 sps:$4 sm:$0xff]  }
  0x5a   :  { %1203 = vmatpush1.bf16.msra.mxu1 %v4828_v40  ;;  %1163 = vmatprep.subr.bf16.mxu0 %v4835_v25  ;;  %7144 = vst [vmem:[#allocation51_spill] sm:$0xff] %v4859_v45  ;;  %v4864_v40 = vld [vmem:[%s6819_s4 + $0xcc] ss:$16 sps:$4 sm:$0xff]   ;;  %v4871_v25 = vld [vmem:[%s6819_s4 + $0xc0] ss:$16 sps:$4 sm:$0xff]  }
  0x5b   :  { %1204 = vmatprep.subr.bf16.mxu1 %v4840_v35  ;;  %7145 = vst [vmem:[#allocation52_spill] sm:$0xff] %v4864_v40  ;;  %7146 = vst [vmem:[#allocation53_spill] sm:$0xff] %v4871_v25  ;;  %v4876_v35 = vld [vmem:[%s6819_s4 + $0xc8] ss:$16 sps:$4 sm:$0xff]  }
  0x5c   :  { %7147 = vst [vmem:[#allocation54_spill] sm:$0xff] %v4876_v35 }
  0x5d   :  { %1164 = vmatpush1.bf16.msra.mxu0 %v4847_v30  ;;  %v4883_v30 = vld [vmem:[%s6819_s4 + $0xe4] ss:$16 sps:$4 sm:$0xff]  }
  0x5e   :  { %1205 = vmatpush1.bf16.msra.mxu1 %v4852_v15  ;;  %1165 = vmatprep.subr.bf16.mxu0 %v4859_v45  ;;  %7148 = vst [vmem:[#allocation55_spill] sm:$0xff] %v4883_v30  ;;  %v4888_v15 = vld [vmem:[%s6819_s4 + $0xec] ss:$16 sps:$4 sm:$0xff]   ;;  %v4895_v45 = vld [vmem:[%s6819_s4 + $0xe0] ss:$16 sps:$4 sm:$0xff]  }
  0x5f   :  { %1206 = vmatprep.subr.bf16.mxu1 %v4864_v40  ;;  %7149 = vst [vmem:[#allocation56_spill] sm:$0xff] %v4888_v15  ;;  %7150 = vst [vmem:[#allocation57_spill] sm:$0xff] %v4895_v45  ;;  %v4900_v40 = vld [vmem:[%s6819_s4 + $0xe8] ss:$16 sps:$4 sm:$0xff]  }
  0x60   :  { %7151 = vst [vmem:[#allocation58_spill] sm:$0xff] %v4900_v40 }
  0x61   :  { %1166 = vmatpush1.bf16.msra.mxu0 %v4871_v25 }
  0x62   :  { %1207 = vmatpush1.bf16.msra.mxu1 %v4876_v35  ;;  %1167 = vmatprep.subr.bf16.mxu0 %v4883_v30  ;;  %v30_v35 = vlaneseq  ;;  %v27_v30 = vld [vmem:[%s6820_s2] sm:$0xf] }
  0x63   :  { %1208 = vmatprep.subr.bf16.mxu1 %v4888_v15 }
  0x64   :  { %v4908_v25 = vshrl.u32 %v30_v35, 7 }
  0x65   :  { %1168 = vmatpush1.bf16.msra.mxu0 %v4895_v45 }
  0x66   :  { %1209 = vmatpush1.bf16.msra.mxu1 %v4900_v40  ;;  %1270 = vmatprep.subr.bf16.mxu0 %v4268_v6  ;;  %7152 = vst [vmem:[#allocation59_spill] sm:$0xff] %v4908_v25  ;;  %v6895_v10 = vsub.s32 0, %v4908_v25  ;;  %v6897_v5 = vsub.s32 2, %v4908_v25  ;;  %v6899_v45 = vsub.s32 1, %v4908_v25  ;;  %v6903_v6 = vsub.s32 3, %v4908_v25 }
  0x67   :  { %1311 = vmatprep.subr.bf16.mxu1 %v4273_v7 }
  0x68   :  { %v64_v4 = vrot.slane %v27_v30, %v6895_v10  ;;  %v72_v3 = vrot.slane %v27_v30, %v6897_v5  ;;  %v68_v2 = vrot.slane %v27_v30, %v6899_v45  ;;  %v76_v0 = vrot.slane %v27_v30, %v6903_v6 }
  0xd9   :  { %v4915_v15 = vpop.f32.mrb[0].mxu0  ;;  %v4918_v40 = vpop.f32.mrb[0].mxu1 }
  0xda   :  { %v4921_v7 = vpop.f32.mrb[1].mxu0  ;;  %v4923_v35 = vpop.f32.mrb[1].mxu1 }
  0xdd   :  { %v191_v1 = vpop.f32.mrb[2].mxu0  ;;  %v304_v63 = vpop.f32.mrb[2].mxu1 }
  0xde   :  { %v4933_v62 = vadd.f32 %v191_v1, %v64_v4  ;;  %v193_v61 = vpop.f32.mrb[3].mxu0  ;;  %v4935_v60 = vadd.f32 %v304_v63, %v72_v3  ;;  %v306_v59 = vpop.f32.mrb[3].mxu1 }
  0xdf   :  { %v4937_v58 = vadd.f32 %v193_v61, %v68_v2  ;;  %v4939_v10 = vadd.f32 %v306_v59, %v76_v0 }
  0xe0   :  { %7153 = vst [vmem:[#allocation60_spill] sm:$0xff] %v4933_v62  ;;  %7154 = vst [vmem:[#allocation61_spill] sm:$0xff] %v4935_v60 }
  0xe1   :  { %7155 = vst [vmem:[#allocation62_spill] sm:$0xff] %v4937_v58  ;;  %7156 = vst [vmem:[#allocation63_spill] sm:$0xff] %v4939_v10  ;;  %v197_v57 = vpop.f32.mrb[4].mxu0  ;;  %v310_v5 = vpop.f32.mrb[4].mxu1 }
  0xe2   :  { %v4941_v56 = vadd.f32 %v197_v57, %v64_v4  ;;  %v199_v45 = vpop.f32.mrb[5].mxu0  ;;  %v4943_v55 = vadd.f32 %v310_v5, %v72_v3  ;;  %v312_v25 = vpop.f32.mrb[5].mxu1 }
  0xe3   :  { %v4945_v30 = vadd.f32 %v199_v45, %v68_v2  ;;  %v4947_v1 = vadd.f32 %v312_v25, %v76_v0 }
  0xe4   :  { %7157 = vst [vmem:[#allocation64_spill] sm:$0xff] %v4941_v56  ;;  %7158 = vst [vmem:[#allocation65_spill] sm:$0xff] %v4943_v55 }
  0xe5   :  { %7159 = vst [vmem:[#allocation66_spill] sm:$0xff] %v4945_v30  ;;  %7160 = vst [vmem:[#allocation67_spill] sm:$0xff] %v4947_v1  ;;  %v203_v6 = vpop.f32.mrb[6].mxu0  ;;  %v316_v63 = vpop.f32.mrb[6].mxu1 }
  0xe6   :  { %v4949_v60 = vadd.f32 %v203_v6, %v64_v4  ;;  %v205_v61 = vpop.f32.mrb[7].mxu0  ;;  %v4951_v58 = vadd.f32 %v316_v63, %v72_v3  ;;  %v318_v59 = vpop.f32.mrb[7].mxu1 }
  0xe7   :  { %v4953_v10 = vadd.f32 %v205_v61, %v68_v2  ;;  %v4955_v57 = vadd.f32 %v318_v59, %v76_v0 }
  0xe8   :  { %7161 = vst [vmem:[#allocation68_spill] sm:$0xff] %v4949_v60  ;;  %7162 = vst [vmem:[#allocation69_spill] sm:$0xff] %v4951_v58 }
  0xe9   :  { %7163 = vst [vmem:[#allocation70_spill] sm:$0xff] %v4953_v10  ;;  %7164 = vst [vmem:[#allocation71_spill] sm:$0xff] %v4955_v57  ;;  %v209_v56 = vpop.f32.mrb[8].mxu0  ;;  %v322_v5 = vpop.f32.mrb[8].mxu1 }
  0xea   :  { %v4957_v55 = vadd.f32 %v209_v56, %v64_v4  ;;  %v211_v45 = vpop.f32.mrb[9].mxu0  ;;  %v4959_v30 = vadd.f32 %v322_v5, %v72_v3  ;;  %v324_v25 = vpop.f32.mrb[9].mxu1 }
  0xeb   :  { %v4961_v1 = vadd.f32 %v211_v45, %v68_v2  ;;  %v4963_v6 = vadd.f32 %v324_v25, %v76_v0 }
  0xec   :  { %7165 = vst [vmem:[#allocation72_spill] sm:$0xff] %v4957_v55  ;;  %7166 = vst [vmem:[#allocation73_spill] sm:$0xff] %v4959_v30 }
  0xed   :  { %7167 = vst [vmem:[#allocation74_spill] sm:$0xff] %v4961_v1  ;;  %7168 = vst [vmem:[#allocation75_spill] sm:$0xff] %v4963_v6  ;;  %v215_v60 = vpop.f32.mrb[10].mxu0  ;;  %v328_v63 = vpop.f32.mrb[10].mxu1 }
  0xee   :  { %v4965_v58 = vadd.f32 %v215_v60, %v64_v4  ;;  %v217_v61 = vpop.f32.mrb[11].mxu0  ;;  %v4967_v10 = vadd.f32 %v328_v63, %v72_v3  ;;  %v330_v59 = vpop.f32.mrb[11].mxu1 }
  0xef   :  { %v4969_v57 = vadd.f32 %v217_v61, %v68_v2  ;;  %v4971_v56 = vadd.f32 %v330_v59, %v76_v0 }
  0xf0   :  { %7169 = vst [vmem:[#allocation76_spill] sm:$0xff] %v4965_v58  ;;  %7170 = vst [vmem:[#allocation77_spill] sm:$0xff] %v4967_v10 }
  0xf1   :  { %7171 = vst [vmem:[#allocation78_spill] sm:$0xff] %v4969_v57  ;;  %7172 = vst [vmem:[#allocation79_spill] sm:$0xff] %v4971_v56  ;;  %v221_v55 = vpop.f32.mrb[12].mxu0  ;;  %v334_v5 = vpop.f32.mrb[12].mxu1 }
  0xf2   :  { %v4973_v30 = vadd.f32 %v221_v55, %v64_v4  ;;  %v223_v45 = vpop.f32.mrb[13].mxu0  ;;  %v4975_v1 = vadd.f32 %v334_v5, %v72_v3  ;;  %v336_v25 = vpop.f32.mrb[13].mxu1  ;;  %v186_v5 = vadd.f32 %v4915_v15, %v64_v4 }
  0xf3   :  { %v4977_v6 = vadd.f32 %v223_v45, %v68_v2  ;;  %v4979_v60 = vadd.f32 %v336_v25, %v76_v0  ;;  %v188_v45 = vadd.f32 %v4921_v7, %v68_v2  ;;  %v301_v25 = vadd.f32 %v4923_v35, %v76_v0 }
  0xf4   :  { %7173 = vst [vmem:[#allocation80_spill] sm:$0xff] %v4973_v30  ;;  %7174 = vst [vmem:[#allocation81_spill] sm:$0xff] %v4975_v1  ;;  %v299_v1 = vadd.f32 %v4918_v40, %v72_v3 }
  0xf5   :  { %7175 = vst [vmem:[#allocation82_spill] sm:$0xff] %v4977_v6  ;;  %7176 = vst [vmem:[#allocation83_spill] sm:$0xff] %v4979_v60  ;;  %v227_v58 = vpop.f32.mrb[14].mxu0  ;;  %v340_v63 = vpop.f32.mrb[14].mxu1 }
  0xf6   :  { %v4981_v10 = vadd.f32 %v227_v58, %v64_v4  ;;  %v229_v61 = vpop.f32.mrb[15].mxu0  ;;  %v4983_v57 = vadd.f32 %v340_v63, %v72_v3  ;;  %v342_v59 = vpop.f32.mrb[15].mxu1 }
  0xf7   :  { %v4985_v56 = vadd.f32 %v229_v61, %v68_v2  ;;  %v4987_v55 = vadd.f32 %v342_v59, %v76_v0 }
  0xf8   :  { %7177 = vst [vmem:[#allocation84_spill] sm:$0xff] %v4981_v10  ;;  %7178 = vst [vmem:[#allocation85_spill] sm:$0xff] %v4983_v57 }
  0xf9   :  { %7179 = vst [vmem:[#allocation86_spill] sm:$0xff] %v4985_v56  ;;  %7180 = vst [vmem:[#allocation87_spill] sm:$0xff] %v4987_v55 }
  0xfa   :  { %v610_v60 = vpop.f32.mrb[16].mxu0  ;;  %v651_v6 = vpop.f32.mrb[16].mxu1 }
  0xfb   :  { %v658_v58 = vadd.f32 %v610_v60, %v186_v5  ;;  %v660_v10 = vadd.f32 %v651_v6, %v299_v1  ;;  %v612_v30 = vpop.f32.mrb[17].mxu0  ;;  %v653_v63 = vpop.f32.mrb[17].mxu1 }
  0xfc   :  { %v659_v57 = vadd.f32 %v612_v30, %v188_v45  ;;  %v661_v62 = vadd.f32 %v653_v63, %v301_v25  ;;  %v614_v61 = vpop.f32.mrb[18].mxu0  ;;  %v655_v56 = vpop.f32.mrb[18].mxu1 }
  0xfd   :  { %v3504_v59 = vmul.f32 -1.442695, %v658_v58  ;;  %v615_v55 = vpop.f32.mrb[19].mxu0  ;;  %v656_v54 = vpop.f32.mrb[19].mxu1 }
  0xfe   :  { %v3505_v4 = vmul.f32 -1.442695, %v659_v57  ;;  %v3506_v3 = vmul.f32 -1.442695, %v661_v62 }
  0xff   :  { %3764 = vpow2.f32 %v3504_v59 }
 0x100   :  { %3766 = vpow2.f32 %v3505_v4 }
 0x101   :  { %3768 = vpow2.f32 %v3506_v3 }
 0x102   :  { %3770 = vtanh.f32 %v660_v10 }
 0x109   :  { %v3765_v2 = vpop.eup %3764 }
 0x10a   :  { %v3767_v15 = vpop.eup %3766  ;;  %v665_v0 = vadd.f32 1.0, %v3765_v2 }
 0x10b   :  { %v671_v40 = vadd.f32 1.0, %v3767_v15  ;;  %v3769_v7 = vpop.eup %3768 }
 0x10c   :  { %3772 = vrcp.f32 %v665_v0  ;;  %v3771_v35 = vpop.eup %3770  ;;  %v678_v56 = vadd.f32 1.0, %v3769_v7 }
 0x10d   :  { %3774 = vrcp.f32 %v671_v40 }
 0x10e   :  { %3776 = vrcp.f32 %v678_v56 }
 0x116   :  { %v3773_v30 = vpop.eup %3772 }
 0x117   :  { %v3775_v1 = vpop.eup %3774  ;;  %v682_v6 = vmul.f32 %v3773_v30, %v3771_v35 }
 0x118   :  { %v681_v60 = vmul.f32 0.0, %v3775_v1  ;;  %v3777_v62 = vpop.eup %3776 }
 0x11a   :  { %v4993_v54 = vadd.f32 %v682_v6, %v681_v60 }
 0x11c   :  { %3778 = vtanh.f32 %v4993_v54 }
 0x126   :  { %v3779_v57 = vpop.eup %3778 }
 0x127   :  { %v685_v55 = vmul.f32 %v3779_v57, %v3777_v62 }
 0x129   :  { %v686_v5 = vpack.c.bf16 %v685_v55, %v685_v55 }
 0x12b   :  { %1186 = vmatmul.mubr.bf16.vlgmr.msra.gmra.mrb[24].mxu0 %v686_v5  ;;  %1227 = vmatmul.mubr.bf16.vlgmr.msra.gmra.mrb[24].mxu1 %v686_v5 }
 0x12c   :  { %1271 = vmatpush1.bf16.msra.mxu0 %v4280_v8  ;;  %1312 = vmatpush1.bf16.msra.mxu1 %v4285_v9  ;;  %v7181_v8 = vld [vmem:[#allocation3_spill] sm:$0xff]  ;;  %v7182_v9 = vld [vmem:[#allocation4_spill] sm:$0xff] }
 0x12d   :  { %1272 = vmatprep.subr.bf16.mxu0 %v4299_v11  ;;  %1313 = vmatprep.subr.bf16.mxu1 %v4304_v12  ;;  %v7183_v11 = vld [vmem:[#allocation5_spill] sm:$0xff]  ;;  %v7184_v12 = vld [vmem:[#allocation6_spill] sm:$0xff] }
 0x12e   :  { %1302 = vmatprep.mubr.bf16.mxu0 %v7120_v20  ;;  %1343 = vmatprep.mubr.bf16.mxu1 %v7120_v20 }
 0x130   :  { %1273 = vmatpush1.bf16.msra.mxu0 %v4309_v13  ;;  %1314 = vmatpush1.bf16.msra.mxu1 %v4316_v14  ;;  %v7185_v13 = vld [vmem:[#allocation7_spill] sm:$0xff]  ;;  %v7186_v14 = vld [vmem:[#allocation8_spill] sm:$0xff] }
 0x131   :  { %1274 = vmatprep.subr.bf16.mxu0 %v4328_v16  ;;  %1315 = vmatprep.subr.bf16.mxu1 %v4333_v17  ;;  %v7187_v16 = vld [vmem:[#allocation9_spill] sm:$0xff]  ;;  %v7188_v17 = vld [vmem:[#allocation10_spill] sm:$0xff] }
 0x134   :  { %1275 = vmatpush1.bf16.msra.mxu0 %v4340_v18  ;;  %1316 = vmatpush1.bf16.msra.mxu1 %v4347_v19  ;;  %v7189_v18 = vld [vmem:[#allocation11_spill] sm:$0xff]  ;;  %v7190_v19 = vld [vmem:[#allocation12_spill] sm:$0xff] }
 0x135   :  { %1276 = vmatprep.subr.bf16.mxu0 %v4359_v21  ;;  %1317 = vmatprep.subr.bf16.mxu1 %v4366_v22  ;;  %v7191_v21 = vld [vmem:[#allocation13_spill] sm:$0xff]  ;;  %v7192_v22 = vld [vmem:[#allocation14_spill] sm:$0xff] }
 0x138   :  { %1277 = vmatpush1.bf16.msra.mxu0 %v4373_v23  ;;  %1318 = vmatpush1.bf16.msra.mxu1 %v4378_v24  ;;  %v945_v23 = vpop.f32.mrb[20].mxu0  ;;  %v7193_v24 = vld [vmem:[#allocation15_spill] sm:$0xff] }
 0x139   :  { %1278 = vmatprep.subr.bf16.mxu0 %v4392_v26  ;;  %1319 = vmatprep.subr.bf16.mxu1 %v4397_v27  ;;  %v7194_v26 = vld [vmem:[#allocation16_spill] sm:$0xff]  ;;  %v947_v27 = vpop.f32.mrb[21].mxu0 }
 0x13c   :  { %1279 = vmatpush1.bf16.msra.mxu0 %v4402_v28  ;;  %1320 = vmatpush1.bf16.msra.mxu1 %v4409_v29  ;;  %v986_v28 = vpop.f32.mrb[20].mxu1  ;;  %v949_v29 = vpop.f32.mrb[22].mxu0 }
 0x13d   :  { %1280 = vmatprep.subr.bf16.mxu0 %v4421_v31  ;;  %1321 = vmatprep.subr.bf16.mxu1 %v4426_v32  ;;  %v988_v31 = vpop.f32.mrb[21].mxu1  ;;  %v950_v32 = vpop.f32.mrb[23].mxu0 }
 0x140   :  { %1281 = vmatpush1.bf16.msra.mxu0 %v4433_v33  ;;  %1322 = vmatpush1.bf16.msra.mxu1 %v4440_v34  ;;  %v990_v33 = vpop.f32.mrb[22].mxu1  ;;  %v7195_v34 = vld [vmem:[#allocation17_spill] sm:$0xff] }
 0x141   :  { %1282 = vmatprep.subr.bf16.mxu0 %v4454_v36  ;;  %1323 = vmatprep.subr.bf16.mxu1 %v4459_v37  ;;  %v7196_v36 = vld [vmem:[#allocation18_spill] sm:$0xff]  ;;  %v991_v37 = vpop.f32.mrb[23].mxu1  ;;  %v7212_v33 = vld [vmem:[#allocation60_spill] sm:$0xff] }
 0x144   :  { %1283 = vmatpush1.bf16.msra.mxu0 %v4466_v38  ;;  %1324 = vmatpush1.bf16.msra.mxu1 %v4471_v39  ;;  %v7197_v38 = vld [vmem:[#allocation19_spill] sm:$0xff]  ;;  %v7198_v39 = vld [vmem:[#allocation20_spill] sm:$0xff] }
 0x145   :  { %1284 = vmatprep.subr.bf16.mxu0 %v4485_v41  ;;  %1325 = vmatprep.subr.bf16.mxu1 %v4490_v42  ;;  %v7199_v41 = vld [vmem:[#allocation21_spill] sm:$0xff]  ;;  %v7200_v42 = vld [vmem:[#allocation22_spill] sm:$0xff] }
 0x148   :  { %1285 = vmatpush1.bf16.msra.mxu0 %v4497_v43  ;;  %1326 = vmatpush1.bf16.msra.mxu1 %v4502_v44  ;;  %v7201_v43 = vld [vmem:[#allocation23_spill] sm:$0xff]  ;;  %v7202_v44 = vld [vmem:[#allocation24_spill] sm:$0xff] }
 0x149   :  { %1382 = vmatprep.subr.bf16.mxu0 %v4521_v46  ;;  %1423 = vmatprep.subr.bf16.mxu1 %v4526_v47  ;;  %v7203_v46 = vld [vmem:[#allocation25_spill] sm:$0xff]  ;;  %v7204_v47 = vld [vmem:[#allocation26_spill] sm:$0xff] }
 0x14b   :  { %1303 = vmatmul.mubr.bf16.vlgmr.msra.gmra.mrb[28].mxu0 %v686_v5  ;;  %1344 = vmatmul.mubr.bf16.vlgmr.msra.gmra.mrb[28].mxu1 %v686_v5 }
 0x14c   :  { %1383 = vmatpush1.bf16.msra.mxu0 %v4532_v48  ;;  %1424 = vmatpush1.bf16.msra.mxu1 %v4537_v49  ;;  %v7205_v48 = vld [vmem:[#allocation27_spill] sm:$0xff]  ;;  %v7206_v49 = vld [vmem:[#allocation28_spill] sm:$0xff] }
 0x14d   :  { %1384 = vmatprep.subr.bf16.mxu0 %v4545_v50  ;;  %1425 = vmatprep.subr.bf16.mxu1 %v4550_v51  ;;  %v28_v50 = vld [vmem:[%s6821_s6] sm:$0xf] }
 0x14e   :  { %1414 = vmatprep.mubr.bf16.mxu0 %v7120_v20  ;;  %1455 = vmatprep.mubr.bf16.mxu1 %v7120_v20  ;;  %v7207_v51 = vld [vmem:[#allocation59_spill] sm:$0xff] }
 0x14f   :  { %v7209_v25 = vsub.s32 1, %v7207_v51  ;;  %v7210_v56 = vsub.s32 3, %v7207_v51  ;;  %v7211_v57 = vsub.s32 2, %v7207_v51 }
 0x150   :  { %1385 = vmatpush1.bf16.msra.mxu0 %v4555_v52  ;;  %1426 = vmatpush1.bf16.msra.mxu1 %v4561_v53  ;;  %v7208_v52 = vsub.s32 0, %v7207_v51 }
 0x151   :  { %1386 = vmatprep.subr.bf16.mxu0 %v7181_v8  ;;  %1427 = vmatprep.subr.bf16.mxu1 %v7182_v9  ;;  %v5073_v58 = vrot.slane %v28_v50, %v7209_v25  ;;  %v5079_v60 = vrot.slane %v28_v50, %v7210_v56  ;;  %v5084_v55 = vrot.slane %v28_v50, %v7211_v57  ;;  %v7214_v25 = vld [vmem:[#allocation62_spill] sm:$0xff] }
 0x152   :  { %v5069_v53 = vrot.slane %v28_v50, %v7208_v52  ;;  %v7213_v50 = vld [vmem:[#allocation61_spill] sm:$0xff] }
 0x154   :  { %1387 = vmatpush1.bf16.msra.mxu0 %v7183_v11  ;;  %1428 = vmatpush1.bf16.msra.mxu1 %v7184_v12 }
 0x155   :  { %1388 = vmatprep.subr.bf16.mxu0 %v7185_v13  ;;  %1429 = vmatprep.subr.bf16.mxu1 %v7186_v14 }
 0x158   :  { %1389 = vmatpush1.bf16.msra.mxu0 %v7187_v16  ;;  %1430 = vmatpush1.bf16.msra.mxu1 %v7188_v17 }
 0x159   :  { %1390 = vmatprep.subr.bf16.mxu0 %v7189_v18  ;;  %1431 = vmatprep.subr.bf16.mxu1 %v7190_v19 }
 0x15c   :  { %1391 = vmatpush1.bf16.msra.mxu0 %v7191_v21  ;;  %1432 = vmatpush1.bf16.msra.mxu1 %v7192_v22 }
 0x15d   :  { %1392 = vmatprep.subr.bf16.mxu0 %v7193_v24  ;;  %1433 = vmatprep.subr.bf16.mxu1 %v7194_v26 }
 0x160   :  { %1393 = vmatpush1.bf16.msra.mxu0 %v7195_v34  ;;  %1434 = vmatpush1.bf16.msra.mxu1 %v7196_v36 }
 0x161   :  { %1394 = vmatprep.subr.bf16.mxu0 %v7197_v38  ;;  %1435 = vmatprep.subr.bf16.mxu1 %v7198_v39 }
 0x164   :  { %1395 = vmatpush1.bf16.msra.mxu0 %v7199_v41  ;;  %1436 = vmatpush1.bf16.msra.mxu1 %v7200_v42 }
 0x165   :  { %1396 = vmatprep.subr.bf16.mxu0 %v7201_v43  ;;  %1437 = vmatprep.subr.bf16.mxu1 %v7202_v44 }
 0x168   :  { %1397 = vmatpush1.bf16.msra.mxu0 %v7203_v46  ;;  %1438 = vmatpush1.bf16.msra.mxu1 %v7204_v47 }
 0x169   :  { %1464 = vmatprep.subr.bf16.mxu0 %v7205_v48  ;;  %1505 = vmatprep.subr.bf16.mxu1 %v7206_v49 }
 0x1fe   :  { %v1187_v10 = vpop.f32.mrb[24].mxu0  ;;  %v1228_v45 = vpop.f32.mrb[24].mxu1 }
 0x1ff   :  { %v1188_v63 = vadd.f32 %v1187_v10, %v945_v23  ;;  %v1229_v61 = vadd.f32 %v1228_v45, %v986_v28  ;;  %v1189_v59 = vpop.f32.mrb[25].mxu0  ;;  %v1230_v4 = vpop.f32.mrb[25].mxu1 }
 0x200   :  { %v1190_v3 = vadd.f32 %v1189_v59, %v947_v27  ;;  %v1231_v2 = vadd.f32 %v1230_v4, %v988_v31  ;;  %v1191_v15 = vpop.f32.mrb[26].mxu0  ;;  %v1232_v0 = vpop.f32.mrb[26].mxu1 }
 0x201   :  { %v1235_v40 = vadd.f32 %v1188_v63, %v5069_v53  ;;  %v1192_v7 = vpop.f32.mrb[27].mxu0  ;;  %v1233_v35 = vpop.f32.mrb[27].mxu1  ;;  %v1237_v8 = vadd.f32 %v1229_v61, %v5084_v55  ;;  %v7215_v61 = vld [vmem:[#allocation63_spill] sm:$0xff] }
 0x202   :  { %v1236_v30 = vadd.f32 %v1190_v3, %v5073_v58  ;;  %v1238_v62 = vadd.f32 %v1231_v2, %v5079_v60 }
 0x203   :  { %v3571_v1 = vmul.f32 -1.442695, %v1235_v40 }
 0x204   :  { %v3572_v6 = vmul.f32 -1.442695, %v1236_v30  ;;  %v3573_v5 = vmul.f32 -1.442695, %v1238_v62 }
 0x205   :  { %3780 = vpow2.f32 %v3571_v1 }
 0x206   :  { %3782 = vpow2.f32 %v3572_v6 }
 0x207   :  { %3784 = vpow2.f32 %v3573_v5 }
 0x208   :  { %3786 = vtanh.f32 %v1237_v8  ;;  %v7216_v8 = vld [vmem:[#allocation29_spill] sm:$0xff] }
 0x20f   :  { %v3781_v9 = vpop.eup %3780 }
 0x210   :  { %v3783_v11 = vpop.eup %3782  ;;  %v1242_v12 = vadd.f32 1.0, %v3781_v9  ;;  %v7217_v9 = vld [vmem:[#allocation30_spill] sm:$0xff] }
 0x211   :  { %v1248_v13 = vadd.f32 1.0, %v3783_v11  ;;  %v3785_v14 = vpop.eup %3784  ;;  %v7218_v11 = vld [vmem:[#allocation31_spill] sm:$0xff] }
 0x212   :  { %3788 = vrcp.f32 %v1242_v12  ;;  %v3787_v16 = vpop.eup %3786  ;;  %v1255_v28 = vadd.f32 1.0, %v3785_v14  ;;  %v7219_v12 = vld [vmem:[#allocation32_spill] sm:$0xff]  ;;  %v7221_v14 = vld [vmem:[#allocation34_spill] sm:$0xff] }
 0x213   :  { %3790 = vrcp.f32 %v1248_v13  ;;  %v7220_v13 = vld [vmem:[#allocation33_spill] sm:$0xff] }
 0x214   :  { %3792 = vrcp.f32 %v1255_v28 }
 0x21c   :  { %v3789_v17 = vpop.eup %3788 }
 0x21d   :  { %v3791_v23 = vpop.eup %3790  ;;  %v1259_v27 = vmul.f32 %v3789_v17, %v3787_v16  ;;  %v7222_v16 = vld [vmem:[#allocation35_spill] sm:$0xff]  ;;  %v7223_v17 = vld [vmem:[#allocation36_spill] sm:$0xff] }
 0x21e   :  { %v1258_v29 = vmul.f32 0.0, %v3791_v23  ;;  %v1304_v31 = vpop.f32.mrb[28].mxu0  ;;  %v1345_v32 = vpop.f32.mrb[28].mxu1 }
 0x21f   :  { %v1352_v37 = vadd.f32 %v1304_v31, %v7212_v33  ;;  %v1354_v51 = vadd.f32 %v1345_v32, %v7213_v50  ;;  %v1306_v52 = vpop.f32.mrb[29].mxu0  ;;  %v1347_v10 = vpop.f32.mrb[29].mxu1  ;;  %v7225_v31 = vld [vmem:[#allocation38_spill] sm:$0xff]  ;;  %v7226_v50 = vld [vmem:[#allocation39_spill] sm:$0xff] }
 0x220   :  { %v5089_v45 = vadd.f32 %v1259_v27, %v1258_v29  ;;  %v1353_v63 = vadd.f32 %v1306_v52, %v7214_v25  ;;  %v1355_v59 = vadd.f32 %v1347_v10, %v7215_v61  ;;  %v1308_v4 = vpop.f32.mrb[30].mxu0  ;;  %v1349_v3 = vpop.f32.mrb[30].mxu1  ;;  %v7224_v29 = vld [vmem:[#allocation37_spill] sm:$0xff]  ;;  %v7230_v61 = vld [vmem:[#allocation43_spill] sm:$0xff] }
 0x221   :  { %v3574_v2 = vmul.f32 -1.442695, %v1352_v37  ;;  %v1309_v15 = vpop.f32.mrb[31].mxu0  ;;  %v1350_v0 = vpop.f32.mrb[31].mxu1  ;;  %v7228_v25 = vld [vmem:[#allocation41_spill] sm:$0xff]  ;;  %v7233_v3 = vld [vmem:[#allocation46_spill] sm:$0xff] }
 0x222   :  { %3794 = vtanh.f32 %v5089_v45  ;;  %v3575_v40 = vmul.f32 -1.442695, %v1353_v63  ;;  %v3576_v7 = vmul.f32 -1.442695, %v1355_v59  ;;  %v3793_v35 = vpop.eup %3792  ;;  %v7229_v63 = vld [vmem:[#allocation42_spill] sm:$0xff]  ;;  %v7231_v59 = vld [vmem:[#allocation44_spill] sm:$0xff] }
 0x223   :  { %3796 = vpow2.f32 %v3574_v2  ;;  %v7232_v4 = vld [vmem:[#allocation45_spill] sm:$0xff]  ;;  %v7234_v2 = vld [vmem:[#allocation47_spill] sm:$0xff]  ;;  %v7237_v0 = vld [vmem:[#allocation50_spill] sm:$0xff] }
 0x224   :  { %3798 = vpow2.f32 %v3575_v40  ;;  %v7236_v15 = vld [vmem:[#allocation49_spill] sm:$0xff]  ;;  %v7238_v40 = vld [vmem:[#allocation51_spill] sm:$0xff] }
 0x225   :  { %3800 = vpow2.f32 %v3576_v7  ;;  %v7239_v7 = vld [vmem:[#allocation52_spill] sm:$0xff] }
 0x226   :  { %3802 = vtanh.f32 %v1354_v51  ;;  %v7227_v51 = vld [vmem:[#allocation40_spill] sm:$0xff] }
 0x22c   :  { %v3795_v30 = vpop.eup %3794 }
 0x22d   :  { %v3797_v1 = vpop.eup %3796  ;;  %v1262_v6 = vmul.f32 %v3795_v30, %v3793_v35 }
 0x22e   :  { %v3799_v56 = vpop.eup %3798  ;;  %v1359_v62 = vadd.f32 1.0, %v3797_v1  ;;  %v7240_v1 = vld [vmem:[#allocation53_spill] sm:$0xff] }
 0x22f   :  { %v1365_v57 = vadd.f32 1.0, %v3799_v56  ;;  %v1381_v5 = vpack.c.bf16 %v1262_v6, %v1262_v6  ;;  %v3801_v23 = vpop.eup %3800  ;;  %v7241_v6 = vld [vmem:[#allocation54_spill] sm:$0xff]  ;;  %v7242_v56 = vld [vmem:[#allocation55_spill] sm:$0xff] }
 0x230   :  { %3804 = vrcp.f32 %v1359_v62  ;;  %v3803_v27 = vpop.eup %3802  ;;  %v1372_v37 = vadd.f32 1.0, %v3801_v23  ;;  %v7243_v62 = vld [vmem:[#allocation56_spill] sm:$0xff]  ;;  %v5175_v23 = vld [vmem:[%s6817_s3 + $0x20] ss:$16 sps:$4 sm:$0xff]  }
 0x231   :  { %3806 = vrcp.f32 %v1365_v57  ;;  %1415 = vmatmul.mubr.bf16.vlgmr.msra.gmra.mrb[32].mxu0 %v1381_v5  ;;  %1456 = vmatmul.mubr.bf16.vlgmr.msra.gmra.mrb[32].mxu1 %v1381_v5  ;;  %v7244_v5 = vld [vmem:[#allocation57_spill] sm:$0xff] }
 0x232   :  { %1465 = vmatpush1.bf16.msra.mxu0 %v7216_v8  ;;  %1506 = vmatpush1.bf16.msra.mxu1 %v7217_v9  ;;  %3808 = vrcp.f32 %v1372_v37  ;;  %v7245_v8 = vld [vmem:[#allocation58_spill] sm:$0xff] }
 0x233   :  { %1466 = vmatprep.subr.bf16.mxu0 %v7218_v11  ;;  %1507 = vmatprep.subr.bf16.mxu1 %v7219_v12  ;;  %v5135_v11 = vld [vmem:[%s6817_s3 + $0x4] ss:$16 sps:$4 sm:$0xff]   ;;  %v5141_v12 = vld [vmem:[%s6817_s3 + $0xc] ss:$16 sps:$4 sm:$0xff]  }
 0x234   :  { %1496 = vmatprep.mubr.bf16.mxu0 %v7120_v20  ;;  %1537 = vmatprep.mubr.bf16.mxu1 %v7120_v20  ;;  %v5217_v37 = vld [vmem:[%s6817_s3 + $0x6c] ss:$16 sps:$4 sm:$0xff]  }
 0x236   :  { %1467 = vmatpush1.bf16.msra.mxu0 %v7220_v13  ;;  %1508 = vmatpush1.bf16.msra.mxu1 %v7221_v14  ;;  %v5149_v13 = vld [vmem:[%s6817_s3] ss:$16 sps:$4 sm:$0xff]   ;;  %v5155_v14 = vld [vmem:[%s6817_s3 + $0x8] ss:$16 sps:$4 sm:$0xff]  }
 0x237   :  { %1468 = vmatprep.subr.bf16.mxu0 %v7222_v16  ;;  %1509 = vmatprep.subr.bf16.mxu1 %v7223_v17  ;;  %v5161_v16 = vld [vmem:[%s6817_s3 + $0x24] ss:$16 sps:$4 sm:$0xff]   ;;  %v5167_v17 = vld [vmem:[%s6817_s3 + $0x2c] ss:$16 sps:$4 sm:$0xff]  }
 0x23a   :  { %v3805_v28 = vpop.eup %3804  ;;  %1469 = vmatpush1.bf16.msra.mxu0 %v7224_v29  ;;  %1510 = vmatpush1.bf16.msra.mxu1 %v7225_v31  ;;  %v5193_v29 = vld [vmem:[%s6817_s3 + $0x4c] ss:$16 sps:$4 sm:$0xff]   ;;  %v5199_v31 = vld [vmem:[%s6817_s3 + $0x40] ss:$16 sps:$4 sm:$0xff]  }
 0x23b   :  { %v3807_v32 = vpop.eup %3806  ;;  %v1376_v33 = vmul.f32 %v3805_v28, %v3803_v27  ;;  %1470 = vmatprep.subr.bf16.mxu0 %v7226_v50  ;;  %1511 = vmatprep.subr.bf16.mxu1 %v7227_v51  ;;  %v5181_v27 = vld [vmem:[%s6817_s3 + $0x28] ss:$16 sps:$4 sm:$0xff]   ;;  %v5187_v28 = vld [vmem:[%s6817_s3 + $0x44] ss:$16 sps:$4 sm:$0xff]   ;;  %v5223_v50 = vld [vmem:[%s6817_s3 + $0x60] ss:$16 sps:$4 sm:$0xff]  }
 0x23c   :  { %v1375_v52 = vmul.f32 %v3807_v32, %v4993_v54  ;;  %v7235_v54 = vld [vmem:[#allocation48_spill] sm:$0xff]  ;;  %v3809_v35 = vpop.eup %3808 }
 0x23d   :  { %v5205_v32 = vld [vmem:[%s6817_s3 + $0x48] ss:$16 sps:$4 sm:$0xff]  }
 0x23e   :  { %v5109_v10 = vadd.f32 %v1376_v33, %v1375_v52  ;;  %1471 = vmatpush1.bf16.msra.mxu0 %v7228_v25  ;;  %1512 = vmatpush1.bf16.msra.mxu1 %v7229_v63  ;;  %v5211_v33 = vld [vmem:[%s6817_s3 + $0x64] ss:$16 sps:$4 sm:$0xff]   ;;  %v5229_v51 = vld [vmem:[%s6817_s3 + $0x68] ss:$16 sps:$4 sm:$0xff]   ;;  %v5241_v25 = vld [vmem:[%s6817_s3 + $0x8c] ss:$16 sps:$4 sm:$0xff]  }
 0x23f   :  { %1472 = vmatprep.subr.bf16.mxu0 %v7230_v61  ;;  %1513 = vmatprep.subr.bf16.mxu1 %v7231_v59  ;;  %v5235_v52 = vld [vmem:[%s6817_s3 + $0x84] ss:$16 sps:$4 sm:$0xff]   ;;  %7246 = vst [vmem:[#allocation3_spill] sm:$0xff] %v5241_v25  ;;  %v5247_v63 = vld [vmem:[%s6817_s3 + $0x80] ss:$16 sps:$4 sm:$0xff]  }
 0x240   :  { %3810 = vtanh.f32 %v5109_v10  ;;  %7247 = vst [vmem:[#allocation4_spill] sm:$0xff] %v5247_v63  ;;  %v5253_v61 = vld [vmem:[%s6817_s3 + $0x88] ss:$16 sps:$4 sm:$0xff]   ;;  %v5259_v59 = vld [vmem:[%s6817_s3 + $0xa4] ss:$16 sps:$4 sm:$0xff]  }
 0x241   :  { %7248 = vst [vmem:[#allocation5_spill] sm:$0xff] %v5253_v61  ;;  %7249 = vst [vmem:[#allocation6_spill] sm:$0xff] %v5259_v59 }
 0x242   :  { %1473 = vmatpush1.bf16.msra.mxu0 %v7232_v4  ;;  %1514 = vmatpush1.bf16.msra.mxu1 %v7233_v3  ;;  %v5265_v4 = vld [vmem:[%s6817_s3 + $0xac] ss:$16 sps:$4 sm:$0xff]   ;;  %v5271_v3 = vld [vmem:[%s6817_s3 + $0xa0] ss:$16 sps:$4 sm:$0xff]  }
 0x243   :  { %1474 = vmatprep.subr.bf16.mxu0 %v7234_v2  ;;  %1515 = vmatprep.subr.bf16.mxu1 %v7235_v54  ;;  %7250 = vst [vmem:[#allocation7_spill] sm:$0xff] %v5265_v4  ;;  %7251 = vst [vmem:[#allocation8_spill] sm:$0xff] %v5271_v3  ;;  %v5277_v2 = vld [vmem:[%s6817_s3 + $0xa8] ss:$16 sps:$4 sm:$0xff]   ;;  %v5283_v54 = vld [vmem:[%s6817_s3 + $0xc4] ss:$16 sps:$4 sm:$0xff]  }
 0x244   :  { %7252 = vst [vmem:[#allocation9_spill] sm:$0xff] %v5277_v2  ;;  %7253 = vst [vmem:[#allocation10_spill] sm:$0xff] %v5283_v54 }
 0x246   :  { %1475 = vmatpush1.bf16.msra.mxu0 %v7236_v15  ;;  %1516 = vmatpush1.bf16.msra.mxu1 %v7237_v0  ;;  %v5289_v15 = vld [vmem:[%s6817_s3 + $0xcc] ss:$16 sps:$4 sm:$0xff]   ;;  %v5295_v0 = vld [vmem:[%s6817_s3 + $0xc0] ss:$16 sps:$4 sm:$0xff]  }
 0x247   :  { %1476 = vmatprep.subr.bf16.mxu0 %v7238_v40  ;;  %1517 = vmatprep.subr.bf16.mxu1 %v7239_v7  ;;  %7254 = vst [vmem:[#allocation11_spill] sm:$0xff] %v5289_v15  ;;  %7255 = vst [vmem:[#allocation12_spill] sm:$0xff] %v5295_v0  ;;  %v5301_v40 = vld [vmem:[%s6817_s3 + $0xc8] ss:$16 sps:$4 sm:$0xff]   ;;  %v5307_v7 = vld [vmem:[%s6817_s3 + $0xe4] ss:$16 sps:$4 sm:$0xff]  }
 0x248   :  { %7256 = vst [vmem:[#allocation13_spill] sm:$0xff] %v5301_v40  ;;  %7257 = vst [vmem:[#allocation14_spill] sm:$0xff] %v5307_v7 }
 0x24a   :  { %v3811_v30 = vpop.eup %3810  ;;  %1477 = vmatpush1.bf16.msra.mxu0 %v7240_v1  ;;  %1518 = vmatpush1.bf16.msra.mxu1 %v7241_v6  ;;  %v5325_v1 = vld [vmem:[%s6817_s3 + $0xe8] ss:$16 sps:$4 sm:$0xff]   ;;  %v5331_v6 = vld [vmem:[%s6818_s5 + $0x4] ss:$16 sps:$4 sm:$0xff]  }
 0x24b   :  { %1478 = vmatprep.subr.bf16.mxu0 %v7242_v56  ;;  %1519 = vmatprep.subr.bf16.mxu1 %v7243_v62  ;;  %v1379_v57 = vmul.f32 %v3811_v30, %v3809_v35  ;;  %v5313_v35 = vld [vmem:[%s6817_s3 + $0xec] ss:$16 sps:$4 sm:$0xff]   ;;  %v5319_v30 = vld [vmem:[%s6817_s3 + $0xe0] ss:$16 sps:$4 sm:$0xff]   ;;  %7260 = vst [vmem:[#allocation17_spill] sm:$0xff] %v5325_v1  ;;  %7261 = vst [vmem:[#allocation18_spill] sm:$0xff] %v5331_v6 }
 0x24c   :  { %7258 = vst [vmem:[#allocation15_spill] sm:$0xff] %v5313_v35  ;;  %7259 = vst [vmem:[#allocation16_spill] sm:$0xff] %v5319_v30  ;;  %v5337_v56 = vld [vmem:[%s6818_s5 + $0xc] ss:$16 sps:$4 sm:$0xff]   ;;  %v5345_v62 = vld [vmem:[%s6818_s5] ss:$16 sps:$4 sm:$0xff]  }
 0x24d   :  { %v5130_v9 = vpack.c.bf16 %v1379_v57, %v1379_v57  ;;  %7262 = vst [vmem:[#allocation19_spill] sm:$0xff] %v5337_v56  ;;  %7263 = vst [vmem:[#allocation20_spill] sm:$0xff] %v5345_v62  ;;  %v5351_v57 = vld [vmem:[%s6818_s5 + $0x8] ss:$16 sps:$4 sm:$0xff]  }
 0x24e   :  { %1479 = vmatpush1.bf16.msra.mxu0 %v7244_v5  ;;  %1520 = vmatpush1.bf16.msra.mxu1 %v7245_v8  ;;  %7264 = vst [vmem:[#allocation21_spill] sm:$0xff] %v5351_v57  ;;  %v5357_v5 = vld [vmem:[%s6818_s5 + $0x24] ss:$16 sps:$4 sm:$0xff]   ;;  %v5363_v8 = vld [vmem:[%s6818_s5 + $0x2c] ss:$16 sps:$4 sm:$0xff]  }
 0x24f   :  { %1581 = vmatprep.subr.bf16.mxu0 %v5135_v11  ;;  %1622 = vmatprep.subr.bf16.mxu1 %v5141_v12  ;;  %7265 = vst [vmem:[#allocation22_spill] sm:$0xff] %v5357_v5  ;;  %7266 = vst [vmem:[#allocation23_spill] sm:$0xff] %v5363_v8 }
 0x251   :  { %1497 = vmatmul.mubr.bf16.vlgmr.msra.gmra.mrb[36].mxu0 %v5130_v9  ;;  %1538 = vmatmul.mubr.bf16.vlgmr.msra.gmra.mrb[36].mxu1 %v5130_v9 }
 0x252   :  { %1582 = vmatpush1.bf16.msra.mxu0 %v5149_v13  ;;  %1623 = vmatpush1.bf16.msra.mxu1 %v5155_v14 }
 0x253   :  { %1583 = vmatprep.subr.bf16.mxu0 %v5161_v16  ;;  %1624 = vmatprep.subr.bf16.mxu1 %v5167_v17 }
 0x254   :  { %1613 = vmatprep.mubr.bf16.mxu0 %v7120_v20  ;;  %1654 = vmatprep.mubr.bf16.mxu1 %v7120_v20 }
 0x256   :  { %1584 = vmatpush1.bf16.msra.mxu0 %v5175_v23  ;;  %1625 = vmatpush1.bf16.msra.mxu1 %v5181_v27 }
 0x257   :  { %1585 = vmatprep.subr.bf16.mxu0 %v5187_v28  ;;  %1626 = vmatprep.subr.bf16.mxu1 %v5193_v29 }
 0x25a   :  { %1586 = vmatpush1.bf16.msra.mxu0 %v5199_v31  ;;  %1627 = vmatpush1.bf16.msra.mxu1 %v5205_v32 }
 0x25b   :  { %1587 = vmatprep.subr.bf16.mxu0 %v5211_v33  ;;  %1628 = vmatprep.subr.bf16.mxu1 %v5217_v37 }
 0x25e   :  { %1588 = vmatpush1.bf16.msra.mxu0 %v5223_v50  ;;  %1629 = vmatpush1.bf16.msra.mxu1 %v5229_v51 }
 0x25f   :  { %1589 = vmatprep.subr.bf16.mxu0 %v5235_v52  ;;  %1630 = vmatprep.subr.bf16.mxu1 %v5241_v25 }
 0x262   :  { %1590 = vmatpush1.bf16.msra.mxu0 %v5247_v63  ;;  %1631 = vmatpush1.bf16.msra.mxu1 %v5253_v61 }
 0x263   :  { %1591 = vmatprep.subr.bf16.mxu0 %v5259_v59  ;;  %1632 = vmatprep.subr.bf16.mxu1 %v5265_v4 }
 0x266   :  { %1592 = vmatpush1.bf16.msra.mxu0 %v5271_v3  ;;  %1633 = vmatpush1.bf16.msra.mxu1 %v5277_v2 }
 0x267   :  { %1593 = vmatprep.subr.bf16.mxu0 %v5283_v54  ;;  %1634 = vmatprep.subr.bf16.mxu1 %v5289_v15 }
 0x26a   :  { %1594 = vmatpush1.bf16.msra.mxu0 %v5295_v0  ;;  %1635 = vmatpush1.bf16.msra.mxu1 %v5301_v40 }
 0x26b   :  { %1595 = vmatprep.subr.bf16.mxu0 %v5307_v7  ;;  %1636 = vmatprep.subr.bf16.mxu1 %v5313_v35 }
 0x26e   :  { %1596 = vmatpush1.bf16.msra.mxu0 %v5319_v30  ;;  %1637 = vmatpush1.bf16.msra.mxu1 %v5325_v1 }
 0x26f   :  { %1693 = vmatprep.subr.bf16.mxu0 %v5331_v6  ;;  %1734 = vmatprep.subr.bf16.mxu1 %v5337_v56 }
 0x271   :  { %1614 = vmatmul.mubr.bf16.vlgmr.msra.gmra.mrb[40].mxu0 %v5130_v9  ;;  %1655 = vmatmul.mubr.bf16.vlgmr.msra.gmra.mrb[40].mxu1 %v5130_v9  ;;  %v5371_v9 = vld [vmem:[%s6818_s5 + $0x20] ss:$16 sps:$4 sm:$0xff]  }
 0x272   :  { %1694 = vmatpush1.bf16.msra.mxu0 %v5345_v62  ;;  %1735 = vmatpush1.bf16.msra.mxu1 %v5351_v57  ;;  %7267 = vst [vmem:[#allocation24_spill] sm:$0xff] %v5371_v9  ;;  %v5389_v57 = vld [vmem:[%s6818_s5 + $0x4c] ss:$16 sps:$4 sm:$0xff]  }
 0x273   :  { %1695 = vmatprep.subr.bf16.mxu0 %v5357_v5  ;;  %1736 = vmatprep.subr.bf16.mxu1 %v5363_v8  ;;  %v5377_v5 = vld [vmem:[%s6818_s5 + $0x28] ss:$16 sps:$4 sm:$0xff]   ;;  %v5383_v8 = vld [vmem:[%s6818_s5 + $0x44] ss:$16 sps:$4 sm:$0xff]   ;;  %7270 = vst [vmem:[#allocation27_spill] sm:$0xff] %v5389_v57 }
 0x274   :  { %1725 = vmatprep.mubr.bf16.mxu0 %v7120_v20  ;;  %1766 = vmatprep.mubr.bf16.mxu1 %v7120_v20  ;;  %7268 = vst [vmem:[#allocation25_spill] sm:$0xff] %v5377_v5  ;;  %7269 = vst [vmem:[#allocation26_spill] sm:$0xff] %v5383_v8 }
 0x276   :  { %1696 = vmatpush1.bf16.msra.mxu0 %v5371_v9  ;;  %1737 = vmatpush1.bf16.msra.mxu1 %v5377_v5  ;;  %v5395_v9 = vld [vmem:[%s6818_s5 + $0x40] ss:$16 sps:$4 sm:$0xff]   ;;  %v5401_v5 = vld [vmem:[%s6818_s5 + $0x48] ss:$16 sps:$4 sm:$0xff]  }
 0x277   :  { %1697 = vmatprep.subr.bf16.mxu0 %v5383_v8  ;;  %1738 = vmatprep.subr.bf16.mxu1 %v5389_v57  ;;  %7271 = vst [vmem:[#allocation28_spill] sm:$0xff] %v5395_v9  ;;  %7272 = vst [vmem:[#allocation59_spill] sm:$0xff] %v5401_v5  ;;  %v5407_v8 = vld [vmem:[%s6818_s5 + $0x64] ss:$16 sps:$4 sm:$0xff]   ;;  %v5413_v57 = vld [vmem:[%s6818_s5 + $0x6c] ss:$16 sps:$4 sm:$0xff]  }
 0x278   :  { %7273 = vst [vmem:[#allocation60_spill] sm:$0xff] %v5407_v8  ;;  %7274 = vst [vmem:[#allocation61_spill] sm:$0xff] %v5413_v57 }
 0x27a   :  { %1698 = vmatpush1.bf16.msra.mxu0 %v5395_v9  ;;  %1739 = vmatpush1.bf16.msra.mxu1 %v5401_v5  ;;  %v5419_v9 = vld [vmem:[%s6818_s5 + $0x60] ss:$16 sps:$4 sm:$0xff]   ;;  %v5425_v5 = vld [vmem:[%s6818_s5 + $0x68] ss:$16 sps:$4 sm:$0xff]  }
 0x27b   :  { %1699 = vmatprep.subr.bf16.mxu0 %v5407_v8  ;;  %1740 = vmatprep.subr.bf16.mxu1 %v5413_v57  ;;  %7275 = vst [vmem:[#allocation62_spill] sm:$0xff] %v5419_v9  ;;  %7276 = vst [vmem:[#allocation63_spill] sm:$0xff] %v5425_v5 }
 0x27e   :  { %1700 = vmatpush1.bf16.msra.mxu0 %v5419_v9  ;;  %1741 = vmatpush1.bf16.msra.mxu1 %v5425_v5 }
 0x27f   :  { %1701 = vmatprep.subr.bf16.mxu0 %v7189_v18  ;;  %1742 = vmatprep.subr.bf16.mxu1 %v7190_v19 }
 0x282   :  { %1702 = vmatpush1.bf16.msra.mxu0 %v7191_v21  ;;  %1743 = vmatpush1.bf16.msra.mxu1 %v7192_v22 }
 0x283   :  { %1703 = vmatprep.subr.bf16.mxu0 %v7193_v24  ;;  %1744 = vmatprep.subr.bf16.mxu1 %v7194_v26 }
 0x286   :  { %1704 = vmatpush1.bf16.msra.mxu0 %v7195_v34  ;;  %1745 = vmatpush1.bf16.msra.mxu1 %v7196_v36 }
 0x287   :  { %1705 = vmatprep.subr.bf16.mxu0 %v7197_v38  ;;  %1746 = vmatprep.subr.bf16.mxu1 %v7198_v39 }
 0x28a   :  { %1706 = vmatpush1.bf16.msra.mxu0 %v7199_v41  ;;  %1747 = vmatpush1.bf16.msra.mxu1 %v7200_v42 }
 0x28b   :  { %1707 = vmatprep.subr.bf16.mxu0 %v7201_v43  ;;  %1748 = vmatprep.subr.bf16.mxu1 %v7202_v44 }
 0x28e   :  { %1708 = vmatpush1.bf16.msra.mxu0 %v7203_v46  ;;  %1749 = vmatpush1.bf16.msra.mxu1 %v7204_v47 }
 0x28f   :  { %1775 = vmatprep.subr.bf16.mxu0 %v7205_v48  ;;  %1816 = vmatprep.subr.bf16.mxu1 %v7206_v49 }
 0x304   :  { %v1416_v18 = vpop.f32.mrb[32].mxu0  ;;  %v1457_v19 = vpop.f32.mrb[32].mxu1 }
 0x305   :  { %v1418_v21 = vpop.f32.mrb[33].mxu0  ;;  %v1459_v22 = vpop.f32.mrb[33].mxu1 }
 0x306   :  { %v1420_v24 = vpop.f32.mrb[34].mxu0  ;;  %v1461_v26 = vpop.f32.mrb[34].mxu1 }
 0x307   :  { %v1421_v34 = vpop.f32.mrb[35].mxu0  ;;  %v1462_v36 = vpop.f32.mrb[35].mxu1 }
 0x324   :  { %v1498_v38 = vpop.f32.mrb[36].mxu0  ;;  %v1539_v39 = vpop.f32.mrb[36].mxu1 }
 0x325   :  { %v1499_v41 = vadd.f32 %v1498_v38, %v1416_v18  ;;  %v1540_v42 = vadd.f32 %v1539_v39, %v1457_v19  ;;  %v1500_v43 = vpop.f32.mrb[37].mxu0  ;;  %v1541_v44 = vpop.f32.mrb[37].mxu1 }
 0x326   :  { %v1501_v46 = vadd.f32 %v1500_v43, %v1418_v21  ;;  %v1542_v47 = vadd.f32 %v1541_v44, %v1459_v22  ;;  %v1502_v5 = vpop.f32.mrb[38].mxu0  ;;  %v1543_v48 = vpop.f32.mrb[38].mxu1 }
 0x327   :  { %v1546_v49 = vadd.f32 %v1499_v41, %v5069_v53  ;;  %v1503_v9 = vpop.f32.mrb[39].mxu0  ;;  %v1544_v57 = vpop.f32.mrb[39].mxu1  ;;  %v1548_v19 = vadd.f32 %v1540_v42, %v5084_v55  ;;  %v7278_v48 = vld [vmem:[#allocation65_spill] sm:$0xff] }
 0x328   :  { %v1547_v8 = vadd.f32 %v1501_v46, %v5073_v58  ;;  %v1549_v34 = vadd.f32 %v1542_v47, %v5079_v60  ;;  %v7277_v47 = vld [vmem:[#allocation64_spill] sm:$0xff] }
 0x329   :  { %v3577_v24 = vmul.f32 -1.442695, %v1546_v49 }
 0x32a   :  { %v3578_v26 = vmul.f32 -1.442695, %v1547_v8  ;;  %v3579_v18 = vmul.f32 -1.442695, %v1549_v34 }
 0x32b   :  { %3812 = vpow2.f32 %v3577_v24 }
 0x32c   :  { %3814 = vpow2.f32 %v3578_v26 }
 0x32d   :  { %3816 = vpow2.f32 %v3579_v18  ;;  %v7279_v18 = vld [vmem:[#allocation66_spill] sm:$0xff] }
 0x32e   :  { %3818 = vtanh.f32 %v1548_v19 }
 0x335   :  { %v3813_v36 = vpop.eup %3812 }
 0x336   :  { %v3815_v21 = vpop.eup %3814  ;;  %v1553_v22 = vadd.f32 1.0, %v3813_v36  ;;  %v7280_v36 = vld [vmem:[#allocation67_spill] sm:$0xff] }
 0x337   :  { %v1559_v5 = vadd.f32 1.0, %v3815_v21  ;;  %v3817_v57 = vpop.eup %3816 }
 0x338   :  { %3820 = vrcp.f32 %v1553_v22  ;;  %v3819_v9 = vpop.eup %3818  ;;  %v1566_v41 = vadd.f32 1.0, %v3817_v57 }
 0x339   :  { %3822 = vrcp.f32 %v1559_v5 }
 0x33a   :  { %3824 = vrcp.f32 %v1566_v41  ;;  %v5461_v41 = vld [vmem:[%s6819_s4] ss:$16 sps:$4 sm:$0xff]  }
 0x342   :  { %v3821_v38 = vpop.eup %3820 }
 0x343   :  { %v3823_v39 = vpop.eup %3822  ;;  %v1570_v8 = vmul.f32 %v3821_v38, %v3819_v9 }
 0x344   :  { %v1569_v43 = vmul.f32 %v3823_v39, %v5089_v45  ;;  %v1615_v44 = vpop.f32.mrb[40].mxu0  ;;  %v1656_v46 = vpop.f32.mrb[40].mxu1 }
 0x345   :  { %v1663_v42 = vadd.f32 %v1615_v44, %v7277_v47  ;;  %v1665_v49 = vadd.f32 %v1656_v46, %v7278_v48  ;;  %v1617_v24 = vpop.f32.mrb[41].mxu0  ;;  %v1658_v26 = vpop.f32.mrb[41].mxu1 }
 0x346   :  { %v5453_v34 = vadd.f32 %v1570_v8, %v1569_v43  ;;  %v1664_v19 = vadd.f32 %v1617_v24, %v7279_v18  ;;  %v1666_v21 = vadd.f32 %v1658_v26, %v7280_v36  ;;  %v1619_v22 = vpop.f32.mrb[42].mxu0  ;;  %v1660_v5 = vpop.f32.mrb[42].mxu1  ;;  %v5479_v18 = vld [vmem:[%s6819_s4 + $0x2c] ss:$16 sps:$4 sm:$0xff]   ;;  %v5493_v36 = vld [vmem:[%s6819_s4 + $0x28] ss:$16 sps:$4 sm:$0xff]  }
 0x347   :  { %v3580_v57 = vmul.f32 -1.442695, %v1663_v42  ;;  %v1620_v9 = vpop.f32.mrb[43].mxu0  ;;  %v1661_v45 = vpop.f32.mrb[43].mxu1  ;;  %v5467_v42 = vld [vmem:[%s6819_s4 + $0x8] ss:$16 sps:$4 sm:$0xff]  }
 0x348   :  { %v3581_v38 = vmul.f32 -1.442695, %v1664_v19  ;;  %3826 = vtanh.f32 %v5453_v34  ;;  %v3582_v39 = vmul.f32 -1.442695, %v1666_v21  ;;  %v3825_v44 = vpop.eup %3824  ;;  %v5487_v19 = vld [vmem:[%s6819_s4 + $0x20] ss:$16 sps:$4 sm:$0xff]  }
 0x349   :  { %3828 = vpow2.f32 %v3580_v57  ;;  %v5499_v21 = vld [vmem:[%s6819_s4 + $0x44] ss:$16 sps:$4 sm:$0xff]   ;;  %v5505_v22 = vld [vmem:[%s6819_s4 + $0x4c] ss:$16 sps:$4 sm:$0xff]   ;;  %v5511_v45 = vld [vmem:[%s6819_s4 + $0x40] ss:$16 sps:$4 sm:$0xff]  }
 0x34a   :  { %3830 = vpow2.f32 %v3581_v38  ;;  %v5517_v38 = vld [vmem:[%s6819_s4 + $0x48] ss:$16 sps:$4 sm:$0xff]  }
 0x34b   :  { %3832 = vpow2.f32 %v3582_v39 }
 0x34c   :  { %3834 = vtanh.f32 %v1665_v49  ;;  %v5473_v49 = vld [vmem:[%s6819_s4 + $0x24] ss:$16 sps:$4 sm:$0xff]  }
 0x352   :  { %v3827_v46 = vpop.eup %3826 }
 0x353   :  { %v3829_v8 = vpop.eup %3828  ;;  %v1573_v43 = vmul.f32 %v3827_v46, %v3825_v44 }
 0x354   :  { %v3831_v47 = vpop.eup %3830  ;;  %v1670_v48 = vadd.f32 1.0, %v3829_v8  ;;  %v5523_v8 = vld [vmem:[%s6819_s4 + $0x64] ss:$16 sps:$4 sm:$0xff]  }
 0x355   :  { %v1676_v24 = vadd.f32 1.0, %v3831_v47  ;;  %v1692_v26 = vpack.c.bf16 %v1573_v43, %v1573_v43  ;;  %v3833_v5 = vpop.eup %3832  ;;  %v5529_v43 = vld [vmem:[%s6819_s4 + $0x6c] ss:$16 sps:$4 sm:$0xff]  }
 0x356   :  { %3836 = vrcp.f32 %v1670_v48  ;;  %v3835_v57 = vpop.eup %3834  ;;  %v1683_v46 = vadd.f32 1.0, %v3833_v5  ;;  %v5556_v5 = vld [vmem:[%s6819_s4 + $0x8c] ss:$16 sps:$4 sm:$0xff]  }
 0x357   :  { %3838 = vrcp.f32 %v1676_v24  ;;  %1726 = vmatmul.mubr.bf16.vlgmr.msra.gmra.mrb[44].mxu0 %v1692_v26  ;;  %1767 = vmatmul.mubr.bf16.vlgmr.msra.gmra.mrb[44].mxu1 %v1692_v26  ;;  %v5538_v24 = vld [vmem:[%s6819_s4 + $0x60] ss:$16 sps:$4 sm:$0xff]   ;;  %v5544_v26 = vld [vmem:[%s6819_s4 + $0x68] ss:$16 sps:$4 sm:$0xff]   ;;  %7281 = vst [vmem:[#allocation29_spill] sm:$0xff] %v5556_v5 }
 0x358   :  { %1776 = vmatpush1.bf16.msra.mxu0 %v5461_v41  ;;  %1817 = vmatpush1.bf16.msra.mxu1 %v5467_v42  ;;  %3840 = vrcp.f32 %v1683_v46  ;;  %v5587_v46 = vld [vmem:[%s6819_s4 + $0xa0] ss:$16 sps:$4 sm:$0xff]  }
 0x359   :  { %1777 = vmatprep.subr.bf16.mxu0 %v5473_v49  ;;  %1818 = vmatprep.subr.bf16.mxu1 %v5479_v18  ;;  %7286 = vst [vmem:[#allocation34_spill] sm:$0xff] %v5587_v46 }
 0x35a   :  { %1807 = vmatprep.mubr.bf16.mxu0 %v7120_v20  ;;  %1848 = vmatprep.mubr.bf16.mxu1 %v7120_v20 }
 0x35c   :  { %1778 = vmatpush1.bf16.msra.mxu0 %v5487_v19  ;;  %1819 = vmatpush1.bf16.msra.mxu1 %v5493_v36 }
 0x35d   :  { %1779 = vmatprep.subr.bf16.mxu0 %v5499_v21  ;;  %1820 = vmatprep.subr.bf16.mxu1 %v5505_v22 }
 0x360   :  { %v3837_v9 = vpop.eup %3836  ;;  %1780 = vmatpush1.bf16.msra.mxu0 %v5511_v45  ;;  %1821 = vmatpush1.bf16.msra.mxu1 %v5517_v38 }
 0x361   :  { %v3839_v39 = vpop.eup %3838  ;;  %v1687_v44 = vmul.f32 %v3837_v9, %v3835_v57  ;;  %1781 = vmatprep.subr.bf16.mxu0 %v5523_v8  ;;  %1822 = vmatprep.subr.bf16.mxu1 %v5529_v43  ;;  %v5563_v57 = vld [vmem:[%s6819_s4 + $0x80] ss:$16 sps:$4 sm:$0xff]   ;;  %v5569_v9 = vld [vmem:[%s6819_s4 + $0x88] ss:$16 sps:$4 sm:$0xff]  }
 0x362   :  { %v1686_v47 = vmul.f32 %v3839_v39, %v5109_v10  ;;  %v5550_v10 = vld [vmem:[%s6819_s4 + $0x84] ss:$16 sps:$4 sm:$0xff]   ;;  %7282 = vst [vmem:[#allocation30_spill] sm:$0xff] %v5563_v57  ;;  %7283 = vst [vmem:[#allocation31_spill] sm:$0xff] %v5569_v9 }
 0x363   :  { %v5575_v39 = vld [vmem:[%s6819_s4 + $0xa4] ss:$16 sps:$4 sm:$0xff]  }
 0x364   :  { %v5533_v48 = vadd.f32 %v1687_v44, %v1686_v47  ;;  %1782 = vmatpush1.bf16.msra.mxu0 %v5538_v24  ;;  %1823 = vmatpush1.bf16.msra.mxu1 %v5544_v26  ;;  %7284 = vst [vmem:[#allocation32_spill] sm:$0xff] %v5575_v39  ;;  %v5581_v44 = vld [vmem:[%s6819_s4 + $0xac] ss:$16 sps:$4 sm:$0xff]   ;;  %v5593_v47 = vld [vmem:[%s6819_s4 + $0xa8] ss:$16 sps:$4 sm:$0xff]  }
 0x365   :  { %1783 = vmatprep.subr.bf16.mxu0 %v5550_v10  ;;  %1824 = vmatprep.subr.bf16.mxu1 %v5556_v5  ;;  %7285 = vst [vmem:[#allocation33_spill] sm:$0xff] %v5581_v44  ;;  %7287 = vst [vmem:[#allocation35_spill] sm:$0xff] %v5593_v47 }
 0x366   :  { %3842 = vtanh.f32 %v5533_v48 }
 0x368   :  { %1784 = vmatpush1.bf16.msra.mxu0 %v5563_v57  ;;  %1825 = vmatpush1.bf16.msra.mxu1 %v5569_v9  ;;  %v5629_v57 = vld [vmem:[%s6819_s4 + $0xec] ss:$16 sps:$4 sm:$0xff]  }
 0x369   :  { %1785 = vmatprep.subr.bf16.mxu0 %v5575_v39  ;;  %1826 = vmatprep.subr.bf16.mxu1 %v5581_v44  ;;  %v5599_v39 = vld [vmem:[%s6819_s4 + $0xc4] ss:$16 sps:$4 sm:$0xff]   ;;  %v5605_v44 = vld [vmem:[%s6819_s4 + $0xcc] ss:$16 sps:$4 sm:$0xff]  }
 0x36a   :  { %7288 = vst [vmem:[#allocation36_spill] sm:$0xff] %v5599_v39  ;;  %7289 = vst [vmem:[#allocation37_spill] sm:$0xff] %v5605_v44 }
 0x36c   :  { %1786 = vmatpush1.bf16.msra.mxu0 %v5587_v46  ;;  %1827 = vmatpush1.bf16.msra.mxu1 %v5593_v47  ;;  %v3841_v46 = vpop.eup %3840  ;;  %v5611_v47 = vld [vmem:[%s6819_s4 + $0xc0] ss:$16 sps:$4 sm:$0xff]  }
 0x36d   :  { %1787 = vmatprep.subr.bf16.mxu0 %v5599_v39  ;;  %1828 = vmatprep.subr.bf16.mxu1 %v5605_v44  ;;  %7290 = vst [vmem:[#allocation38_spill] sm:$0xff] %v5611_v47  ;;  %v5617_v39 = vld [vmem:[%s6819_s4 + $0xc8] ss:$16 sps:$4 sm:$0xff]   ;;  %v5623_v44 = vld [vmem:[%s6819_s4 + $0xe4] ss:$16 sps:$4 sm:$0xff]  }
 0x36e   :  { %7291 = vst [vmem:[#allocation39_spill] sm:$0xff] %v5617_v39  ;;  %7292 = vst [vmem:[#allocation40_spill] sm:$0xff] %v5623_v44 }
 0x370   :  { %v3843_v9 = vpop.eup %3842  ;;  %1788 = vmatpush1.bf16.msra.mxu0 %v5611_v47  ;;  %1829 = vmatpush1.bf16.msra.mxu1 %v5617_v39  ;;  %v5635_v39 = vld [vmem:[%s6819_s4 + $0xe0] ss:$16 sps:$4 sm:$0xff]  }
 0x371   :  { %1789 = vmatprep.subr.bf16.mxu0 %v5623_v44  ;;  %1830 = vmatprep.subr.bf16.mxu1 %v5629_v57  ;;  %v1690_v47 = vmul.f32 %v3843_v9, %v3841_v46  ;;  %v5641_v44 = vld [vmem:[%s6819_s4 + $0xe8] ss:$16 sps:$4 sm:$0xff]   ;;  %v7293_v9 = vld [vmem:[#allocation21_spill] sm:$0xff] }
 0x372   :  { %v7294_v46 = vld [vmem:[#allocation22_spill] sm:$0xff] }
 0x373   :  { %v1691_v5 = vpack.c.bf16 %v1690_v47, %v1690_v47  ;;  %v7295_v47 = vld [vmem:[#allocation23_spill] sm:$0xff] }
 0x374   :  { %1790 = vmatpush1.bf16.msra.mxu0 %v5635_v39  ;;  %1831 = vmatpush1.bf16.msra.mxu1 %v5641_v44 }
 0x375   :  { %1892 = vmatprep.subr.bf16.mxu0 %v5135_v11  ;;  %1933 = vmatprep.subr.bf16.mxu1 %v5141_v12 }
 0x377   :  { %1808 = vmatmul.mubr.bf16.vlgmr.msra.gmra.mrb[48].mxu0 %v1691_v5  ;;  %1849 = vmatmul.mubr.bf16.vlgmr.msra.gmra.mrb[48].mxu1 %v1691_v5 }
 0x378   :  { %1893 = vmatpush1.bf16.msra.mxu0 %v5149_v13  ;;  %1934 = vmatpush1.bf16.msra.mxu1 %v5155_v14 }
 0x379   :  { %1894 = vmatprep.subr.bf16.mxu0 %v5161_v16  ;;  %1935 = vmatprep.subr.bf16.mxu1 %v5167_v17 }
 0x37a   :  { %1924 = vmatprep.mubr.bf16.mxu0 %v7120_v20  ;;  %1965 = vmatprep.mubr.bf16.mxu1 %v7120_v20 }
 0x37c   :  { %1895 = vmatpush1.bf16.msra.mxu0 %v5175_v23  ;;  %1936 = vmatpush1.bf16.msra.mxu1 %v5181_v27 }
 0x37d   :  { %1896 = vmatprep.subr.bf16.mxu0 %v5187_v28  ;;  %1937 = vmatprep.subr.bf16.mxu1 %v5193_v29 }
 0x380   :  { %1897 = vmatpush1.bf16.msra.mxu0 %v5199_v31  ;;  %1938 = vmatpush1.bf16.msra.mxu1 %v5205_v32 }
 0x381   :  { %1898 = vmatprep.subr.bf16.mxu0 %v5211_v33  ;;  %1939 = vmatprep.subr.bf16.mxu1 %v5217_v37 }
 0x384   :  { %1899 = vmatpush1.bf16.msra.mxu0 %v5223_v50  ;;  %1940 = vmatpush1.bf16.msra.mxu1 %v5229_v51 }
 0x385   :  { %1900 = vmatprep.subr.bf16.mxu0 %v5235_v52  ;;  %1941 = vmatprep.subr.bf16.mxu1 %v5241_v25 }
 0x388   :  { %1901 = vmatpush1.bf16.msra.mxu0 %v5247_v63  ;;  %1942 = vmatpush1.bf16.msra.mxu1 %v5253_v61 }
 0x389   :  { %1902 = vmatprep.subr.bf16.mxu0 %v5259_v59  ;;  %1943 = vmatprep.subr.bf16.mxu1 %v5265_v4 }
 0x38c   :  { %1903 = vmatpush1.bf16.msra.mxu0 %v5271_v3  ;;  %1944 = vmatpush1.bf16.msra.mxu1 %v5277_v2 }
 0x38d   :  { %1904 = vmatprep.subr.bf16.mxu0 %v5283_v54  ;;  %1945 = vmatprep.subr.bf16.mxu1 %v5289_v15 }
 0x390   :  { %1905 = vmatpush1.bf16.msra.mxu0 %v5295_v0  ;;  %1946 = vmatpush1.bf16.msra.mxu1 %v5301_v40 }
 0x391   :  { %1906 = vmatprep.subr.bf16.mxu0 %v5307_v7  ;;  %1947 = vmatprep.subr.bf16.mxu1 %v5313_v35  ;;  %v7305_v35 = vld [vmem:[#allocation63_spill] sm:$0xff] }
 0x394   :  { %1907 = vmatpush1.bf16.msra.mxu0 %v5319_v30  ;;  %1948 = vmatpush1.bf16.msra.mxu1 %v5325_v1  ;;  %v7296_v30 = vld [vmem:[#allocation24_spill] sm:$0xff]  ;;  %v7297_v1 = vld [vmem:[#allocation25_spill] sm:$0xff] }
 0x395   :  { %2004 = vmatprep.subr.bf16.mxu0 %v5331_v6  ;;  %2045 = vmatprep.subr.bf16.mxu1 %v5337_v56  ;;  %v7298_v6 = vld [vmem:[#allocation26_spill] sm:$0xff]  ;;  %v7299_v56 = vld [vmem:[#allocation27_spill] sm:$0xff] }
 0x397   :  { %1925 = vmatmul.mubr.bf16.vlgmr.msra.gmra.mrb[52].mxu0 %v1691_v5  ;;  %1966 = vmatmul.mubr.bf16.vlgmr.msra.gmra.mrb[52].mxu1 %v1691_v5  ;;  %v7300_v5 = vld [vmem:[#allocation28_spill] sm:$0xff] }
 0x398   :  { %2005 = vmatpush1.bf16.msra.mxu0 %v5345_v62  ;;  %2046 = vmatpush1.bf16.msra.mxu1 %v7293_v9  ;;  %v7301_v62 = vld [vmem:[#allocation59_spill] sm:$0xff]  ;;  %v7302_v9 = vld [vmem:[#allocation60_spill] sm:$0xff] }
 0x399   :  { %2006 = vmatprep.subr.bf16.mxu0 %v7294_v46  ;;  %2047 = vmatprep.subr.bf16.mxu1 %v7295_v47  ;;  %v7303_v46 = vld [vmem:[#allocation61_spill] sm:$0xff]  ;;  %v7304_v47 = vld [vmem:[#allocation62_spill] sm:$0xff] }
 0x39a   :  { %2036 = vmatprep.mubr.bf16.mxu0 %v7120_v20  ;;  %2077 = vmatprep.mubr.bf16.mxu1 %v7120_v20 }
 0x39c   :  { %2007 = vmatpush1.bf16.msra.mxu0 %v7296_v30  ;;  %2048 = vmatpush1.bf16.msra.mxu1 %v7297_v1  ;;  %v5699_v1 = vld [vmem:[%s6818_s5 + $0x84] ss:$16 sps:$4 sm:$0xff]  }
 0x39d   :  { %2008 = vmatprep.subr.bf16.mxu0 %v7298_v6  ;;  %2049 = vmatprep.subr.bf16.mxu1 %v7299_v56  ;;  %7306 = vst [vmem:[#allocation41_spill] sm:$0xff] %v5699_v1 }
 0x3a0   :  { %2009 = vmatpush1.bf16.msra.mxu0 %v7300_v5  ;;  %2050 = vmatpush1.bf16.msra.mxu1 %v7301_v62  ;;  %v5705_v5 = vld [vmem:[%s6818_s5 + $0x8c] ss:$16 sps:$4 sm:$0xff]  }
 0x3a1   :  { %2010 = vmatprep.subr.bf16.mxu0 %v7302_v9  ;;  %2051 = vmatprep.subr.bf16.mxu1 %v7303_v46  ;;  %7307 = vst [vmem:[#allocation42_spill] sm:$0xff] %v5705_v5 }
 0x3a4   :  { %2011 = vmatpush1.bf16.msra.mxu0 %v7304_v47  ;;  %2052 = vmatpush1.bf16.msra.mxu1 %v7305_v35  ;;  %v5711_v47 = vld [vmem:[%s6818_s5 + $0x80] ss:$16 sps:$4 sm:$0xff]   ;;  %v5717_v35 = vld [vmem:[%s6818_s5 + $0x88] ss:$16 sps:$4 sm:$0xff]  }
 0x3a5   :  { %2012 = vmatprep.subr.bf16.mxu0 %v5699_v1  ;;  %2053 = vmatprep.subr.bf16.mxu1 %v5705_v5  ;;  %7308 = vst [vmem:[#allocation43_spill] sm:$0xff] %v5711_v47  ;;  %7309 = vst [vmem:[#allocation44_spill] sm:$0xff] %v5717_v35  ;;  %v5723_v1 = vld [vmem:[%s6818_s5 + $0xa4] ss:$16 sps:$4 sm:$0xff]   ;;  %v5729_v5 = vld [vmem:[%s6818_s5 + $0xac] ss:$16 sps:$4 sm:$0xff]  }
 0x3a6   :  { %7310 = vst [vmem:[#allocation45_spill] sm:$0xff] %v5723_v1  ;;  %7311 = vst [vmem:[#allocation46_spill] sm:$0xff] %v5729_v5 }
 0x3a8   :  { %2013 = vmatpush1.bf16.msra.mxu0 %v5711_v47  ;;  %2054 = vmatpush1.bf16.msra.mxu1 %v5717_v35  ;;  %v5735_v47 = vld [vmem:[%s6818_s5 + $0xa0] ss:$16 sps:$4 sm:$0xff]   ;;  %v5741_v35 = vld [vmem:[%s6818_s5 + $0xa8] ss:$16 sps:$4 sm:$0xff]  }
 0x3a9   :  { %2014 = vmatprep.subr.bf16.mxu0 %v5723_v1  ;;  %2055 = vmatprep.subr.bf16.mxu1 %v5729_v5  ;;  %7312 = vst [vmem:[#allocation47_spill] sm:$0xff] %v5735_v47  ;;  %7313 = vst [vmem:[#allocation48_spill] sm:$0xff] %v5741_v35  ;;  %v5747_v1 = vld [vmem:[%s6818_s5 + $0xc4] ss:$16 sps:$4 sm:$0xff]   ;;  %v5753_v5 = vld [vmem:[%s6818_s5 + $0xcc] ss:$16 sps:$4 sm:$0xff]  }
 0x3aa   :  { %7314 = vst [vmem:[#allocation49_spill] sm:$0xff] %v5747_v1  ;;  %7315 = vst [vmem:[#allocation50_spill] sm:$0xff] %v5753_v5 }
 0x3ac   :  { %2015 = vmatpush1.bf16.msra.mxu0 %v5735_v47  ;;  %2056 = vmatpush1.bf16.msra.mxu1 %v5741_v35  ;;  %v5759_v47 = vld [vmem:[%s6818_s5 + $0xc0] ss:$16 sps:$4 sm:$0xff]   ;;  %v5765_v35 = vld [vmem:[%s6818_s5 + $0xc8] ss:$16 sps:$4 sm:$0xff]  }
 0x3ad   :  { %2016 = vmatprep.subr.bf16.mxu0 %v5747_v1  ;;  %2057 = vmatprep.subr.bf16.mxu1 %v5753_v5  ;;  %7316 = vst [vmem:[#allocation51_spill] sm:$0xff] %v5759_v47  ;;  %7317 = vst [vmem:[#allocation52_spill] sm:$0xff] %v5765_v35  ;;  %v5771_v1 = vld [vmem:[%s6818_s5 + $0xe4] ss:$16 sps:$4 sm:$0xff]   ;;  %v5777_v5 = vld [vmem:[%s6818_s5 + $0xec] ss:$16 sps:$4 sm:$0xff]  }
 0x3ae   :  { %7318 = vst [vmem:[#allocation53_spill] sm:$0xff] %v5771_v1  ;;  %7319 = vst [vmem:[#allocation54_spill] sm:$0xff] %v5777_v5 }
 0x3b0   :  { %2017 = vmatpush1.bf16.msra.mxu0 %v5759_v47  ;;  %2058 = vmatpush1.bf16.msra.mxu1 %v5765_v35  ;;  %v5783_v47 = vld [vmem:[%s6818_s5 + $0xe0] ss:$16 sps:$4 sm:$0xff]   ;;  %v5789_v35 = vld [vmem:[%s6818_s5 + $0xe8] ss:$16 sps:$4 sm:$0xff]  }
 0x3b1   :  { %2018 = vmatprep.subr.bf16.mxu0 %v5771_v1  ;;  %2059 = vmatprep.subr.bf16.mxu1 %v5777_v5  ;;  %7320 = vst [vmem:[#allocation55_spill] sm:$0xff] %v5783_v47  ;;  %7321 = vst [vmem:[#allocation56_spill] sm:$0xff] %v5789_v35  ;;  %v5795_v1 = vld [vmem:[%s6819_s4 + $0x4] ss:$16 sps:$4 sm:$0xff]   ;;  %v5801_v5 = vld [vmem:[%s6819_s4 + $0xc] ss:$16 sps:$4 sm:$0xff]  }
 0x3b2   :  { %7322 = vst [vmem:[#allocation57_spill] sm:$0xff] %v5795_v1  ;;  %7323 = vst [vmem:[#allocation58_spill] sm:$0xff] %v5801_v5 }
 0x3b4   :  { %2019 = vmatpush1.bf16.msra.mxu0 %v5783_v47  ;;  %2060 = vmatpush1.bf16.msra.mxu1 %v5789_v35 }
 0x3b5   :  { %2086 = vmatprep.subr.bf16.mxu0 %v5795_v1  ;;  %2127 = vmatprep.subr.bf16.mxu1 %v5801_v5 }
 0x42a   :  { %v1727_v47 = vpop.f32.mrb[44].mxu0  ;;  %v1768_v46 = vpop.f32.mrb[44].mxu1 }
 0x42b   :  { %v1729_v9 = vpop.f32.mrb[45].mxu0  ;;  %v1770_v62 = vpop.f32.mrb[45].mxu1 }
 0x42c   :  { %v1731_v56 = vpop.f32.mrb[46].mxu0  ;;  %v1772_v35 = vpop.f32.mrb[46].mxu1 }
 0x42d   :  { %v1732_v6 = vpop.f32.mrb[47].mxu0  ;;  %v1773_v30 = vpop.f32.mrb[47].mxu1 }
 0x44a   :  { %v1809_v7 = vpop.f32.mrb[48].mxu0  ;;  %v1850_v40 = vpop.f32.mrb[48].mxu1 }
 0x44b   :  { %v1810_v0 = vadd.f32 %v1809_v7, %v1727_v47  ;;  %v1851_v15 = vadd.f32 %v1850_v40, %v1768_v46  ;;  %v1811_v1 = vpop.f32.mrb[49].mxu0  ;;  %v1852_v54 = vpop.f32.mrb[49].mxu1  ;;  %v7324_v46 = vld [vmem:[#allocation68_spill] sm:$0xff]  ;;  %v7325_v47 = vld [vmem:[#allocation69_spill] sm:$0xff] }
 0x44c   :  { %v1812_v2 = vadd.f32 %v1811_v1, %v1729_v9  ;;  %v1853_v3 = vadd.f32 %v1852_v54, %v1770_v62  ;;  %v1813_v4 = vpop.f32.mrb[50].mxu0  ;;  %v1854_v59 = vpop.f32.mrb[50].mxu1 }
 0x44d   :  { %v1857_v5 = vadd.f32 %v1810_v0, %v5069_v53  ;;  %v1814_v61 = vpop.f32.mrb[51].mxu0  ;;  %v1855_v63 = vpop.f32.mrb[51].mxu1  ;;  %v1859_v40 = vadd.f32 %v1851_v15, %v5084_v55 }
 0x44e   :  { %v1858_v25 = vadd.f32 %v1812_v2, %v5073_v58  ;;  %v1860_v30 = vadd.f32 %v1853_v3, %v5079_v60 }
 0x44f   :  { %v3583_v56 = vmul.f32 -1.442695, %v1857_v5 }
 0x450   :  { %v3584_v35 = vmul.f32 -1.442695, %v1858_v25  ;;  %v3585_v7 = vmul.f32 -1.442695, %v1860_v30 }
 0x451   :  { %3844 = vpow2.f32 %v3583_v56 }
 0x452   :  { %3846 = vpow2.f32 %v3584_v35 }
 0x453   :  { %3848 = vpow2.f32 %v3585_v7  ;;  %v7326_v7 = vld [vmem:[#allocation70_spill] sm:$0xff] }
 0x454   :  { %3850 = vtanh.f32 %v1859_v40 }
 0x45b   :  { %v3845_v6 = vpop.eup %3844 }
 0x45c   :  { %v3847_v1 = vpop.eup %3846  ;;  %v1864_v54 = vadd.f32 1.0, %v3845_v6  ;;  %v7327_v6 = vld [vmem:[#allocation71_spill] sm:$0xff] }
 0x45d   :  { %v1870_v59 = vadd.f32 1.0, %v3847_v1  ;;  %v3849_v63 = vpop.eup %3848 }
 0x45e   :  { %3852 = vrcp.f32 %v1864_v54  ;;  %v3851_v61 = vpop.eup %3850  ;;  %v1877_v0 = vadd.f32 1.0, %v3849_v63 }
 0x45f   :  { %3854 = vrcp.f32 %v1870_v59 }
 0x460   :  { %3856 = vrcp.f32 %v1877_v0 }
 0x468   :  { %v3853_v4 = vpop.eup %3852 }
 0x469   :  { %v3855_v2 = vpop.eup %3854  ;;  %v1881_v25 = vmul.f32 %v3853_v4, %v3851_v61 }
 0x46a   :  { %v1880_v62 = vmul.f32 %v3855_v2, %v5453_v34  ;;  %v1926_v3 = vpop.f32.mrb[52].mxu0  ;;  %v1967_v9 = vpop.f32.mrb[52].mxu1 }
 0x46b   :  { %v1974_v15 = vadd.f32 %v1926_v3, %v7324_v46  ;;  %v1976_v5 = vadd.f32 %v1967_v9, %v7325_v47  ;;  %v1928_v56 = vpop.f32.mrb[53].mxu0  ;;  %v1969_v35 = vpop.f32.mrb[53].mxu1 }
 0x46c   :  { %v5811_v30 = vadd.f32 %v1881_v25, %v1880_v62  ;;  %v1975_v40 = vadd.f32 %v1928_v56, %v7326_v7  ;;  %v1977_v1 = vadd.f32 %v1969_v35, %v7327_v6  ;;  %v1930_v54 = vpop.f32.mrb[54].mxu0  ;;  %v1971_v59 = vpop.f32.mrb[54].mxu1 }
 0x46d   :  { %v3586_v63 = vmul.f32 -1.442695, %v1974_v15  ;;  %v1931_v61 = vpop.f32.mrb[55].mxu0  ;;  %v1972_v34 = vpop.f32.mrb[55].mxu1  ;;  %v7328_v59 = vld [vmem:[#allocation29_spill] sm:$0xff] }
 0x46e   :  { %v3587_v4 = vmul.f32 -1.442695, %v1975_v40  ;;  %3858 = vtanh.f32 %v5811_v30  ;;  %v3588_v2 = vmul.f32 -1.442695, %v1977_v1  ;;  %v3857_v3 = vpop.eup %3856  ;;  %v7330_v61 = vld [vmem:[#allocation31_spill] sm:$0xff]  ;;  %v7331_v34 = vld [vmem:[#allocation32_spill] sm:$0xff] }
 0x46f   :  { %3860 = vpow2.f32 %v3586_v63  ;;  %v7329_v63 = vld [vmem:[#allocation30_spill] sm:$0xff] }
 0x470   :  { %3862 = vpow2.f32 %v3587_v4  ;;  %v7333_v4 = vld [vmem:[#allocation34_spill] sm:$0xff] }
 0x471   :  { %3864 = vpow2.f32 %v3588_v2  ;;  %v7334_v2 = vld [vmem:[#allocation35_spill] sm:$0xff] }
 0x472   :  { %3866 = vtanh.f32 %v1976_v5 }
 0x478   :  { %v3859_v9 = vpop.eup %3858 }
 0x479   :  { %v3861_v25 = vpop.eup %3860  ;;  %v1884_v62 = vmul.f32 %v3859_v9, %v3857_v3  ;;  %v7335_v3 = vld [vmem:[#allocation36_spill] sm:$0xff]  ;;  %v7336_v9 = vld [vmem:[#allocation37_spill] sm:$0xff] }
 0x47a   :  { %v3863_v46 = vpop.eup %3862  ;;  %v1981_v47 = vadd.f32 1.0, %v3861_v25 }
 0x47b   :  { %v1987_v56 = vadd.f32 1.0, %v3863_v46  ;;  %v2003_v35 = vpack.c.bf16 %v1884_v62, %v1884_v62  ;;  %v3865_v0 = vpop.eup %3864  ;;  %v7337_v46 = vld [vmem:[#allocation38_spill] sm:$0xff] }
 0x47c   :  { %3868 = vrcp.f32 %v1981_v47  ;;  %v3867_v15 = vpop.eup %3866  ;;  %v1994_v6 = vadd.f32 1.0, %v3865_v0  ;;  %v7338_v47 = vld [vmem:[#allocation39_spill] sm:$0xff] }
 0x47d   :  { %3870 = vrcp.f32 %v1987_v56  ;;  %2037 = vmatmul.mubr.bf16.vlgmr.msra.gmra.mrb[56].mxu0 %v2003_v35  ;;  %2078 = vmatmul.mubr.bf16.vlgmr.msra.gmra.mrb[56].mxu1 %v2003_v35  ;;  %v7339_v56 = vld [vmem:[#allocation40_spill] sm:$0xff] }
 0x47e   :  { %2087 = vmatpush1.bf16.msra.mxu0 %v5461_v41  ;;  %2128 = vmatpush1.bf16.msra.mxu1 %v5467_v42  ;;  %3872 = vrcp.f32 %v1994_v6  ;;  %v7361_v6 = vld [vmem:[#allocation24_spill] sm:$0xff] }
 0x47f   :  { %2088 = vmatprep.subr.bf16.mxu0 %v5473_v49  ;;  %2129 = vmatprep.subr.bf16.mxu1 %v5479_v18 }
 0x480   :  { %2118 = vmatprep.mubr.bf16.mxu0 %v7120_v20  ;;  %2159 = vmatprep.mubr.bf16.mxu1 %v7120_v20 }
 0x482   :  { %2089 = vmatpush1.bf16.msra.mxu0 %v5487_v19  ;;  %2130 = vmatpush1.bf16.msra.mxu1 %v5493_v36 }
 0x483   :  { %2090 = vmatprep.subr.bf16.mxu0 %v5499_v21  ;;  %2131 = vmatprep.subr.bf16.mxu1 %v5505_v22 }
 0x486   :  { %v3869_v5 = vpop.eup %3868  ;;  %2091 = vmatpush1.bf16.msra.mxu0 %v5511_v45  ;;  %2132 = vmatpush1.bf16.msra.mxu1 %v5517_v38 }
 0x487   :  { %v3871_v7 = vpop.eup %3870  ;;  %v1998_v40 = vmul.f32 %v3869_v5, %v3867_v15  ;;  %2092 = vmatprep.subr.bf16.mxu0 %v5523_v8  ;;  %2133 = vmatprep.subr.bf16.mxu1 %v5529_v43  ;;  %v7357_v15 = vld [vmem:[#allocation20_spill] sm:$0xff]  ;;  %v7358_v5 = vld [vmem:[#allocation21_spill] sm:$0xff] }
 0x488   :  { %v1997_v1 = vmul.f32 %v3871_v7, %v5533_v48  ;;  %v7332_v48 = vld [vmem:[#allocation33_spill] sm:$0xff]  ;;  %v3873_v25 = vpop.eup %3872  ;;  %v7359_v7 = vld [vmem:[#allocation22_spill] sm:$0xff] }
 0x48a   :  { %v5831_v54 = vadd.f32 %v1998_v40, %v1997_v1  ;;  %2093 = vmatpush1.bf16.msra.mxu0 %v5538_v24  ;;  %2134 = vmatpush1.bf16.msra.mxu1 %v5544_v26  ;;  %v7360_v40 = vld [vmem:[#allocation23_spill] sm:$0xff]  ;;  %v7362_v1 = vld [vmem:[#allocation25_spill] sm:$0xff] }
 0x48b   :  { %2094 = vmatprep.subr.bf16.mxu0 %v5550_v10  ;;  %2135 = vmatprep.subr.bf16.mxu1 %v7328_v59 }
 0x48c   :  { %3874 = vtanh.f32 %v5831_v54 }
 0x48e   :  { %2095 = vmatpush1.bf16.msra.mxu0 %v7329_v63  ;;  %2136 = vmatpush1.bf16.msra.mxu1 %v7330_v61 }
 0x48f   :  { %2096 = vmatprep.subr.bf16.mxu0 %v7331_v34  ;;  %2137 = vmatprep.subr.bf16.mxu1 %v7332_v48 }
 0x492   :  { %2097 = vmatpush1.bf16.msra.mxu0 %v7333_v4  ;;  %2138 = vmatpush1.bf16.msra.mxu1 %v7334_v2 }
 0x493   :  { %2098 = vmatprep.subr.bf16.mxu0 %v7335_v3  ;;  %2139 = vmatprep.subr.bf16.mxu1 %v7336_v9 }
 0x496   :  { %v3875_v62 = vpop.eup %3874  ;;  %2099 = vmatpush1.bf16.msra.mxu0 %v7337_v46  ;;  %2140 = vmatpush1.bf16.msra.mxu1 %v7338_v47 }
 0x497   :  { %2100 = vmatprep.subr.bf16.mxu0 %v7339_v56  ;;  %2141 = vmatprep.subr.bf16.mxu1 %v5629_v57  ;;  %v2001_v35 = vmul.f32 %v3875_v62, %v3873_v25  ;;  %v7363_v25 = vld [vmem:[#allocation26_spill] sm:$0xff]  ;;  %v7364_v62 = vld [vmem:[#allocation27_spill] sm:$0xff] }
 0x499   :  { %v2002_v0 = vpack.c.bf16 %v2001_v35, %v2001_v35  ;;  %v7365_v35 = vld [vmem:[#allocation28_spill] sm:$0xff] }
 0x49a   :  { %2101 = vmatpush1.bf16.msra.mxu0 %v5635_v39  ;;  %2142 = vmatpush1.bf16.msra.mxu1 %v5641_v44 }
 0x49b   :  { %2203 = vmatprep.subr.bf16.mxu0 %v5135_v11  ;;  %2244 = vmatprep.subr.bf16.mxu1 %v5141_v12  ;;  %v7340_v11 = vld [vmem:[#allocation3_spill] sm:$0xff]  ;;  %v7341_v12 = vld [vmem:[#allocation4_spill] sm:$0xff] }
 0x49d   :  { %2119 = vmatmul.mubr.bf16.vlgmr.msra.gmra.mrb[60].mxu0 %v2002_v0  ;;  %2160 = vmatmul.mubr.bf16.vlgmr.msra.gmra.mrb[60].mxu1 %v2002_v0 }
 0x49e   :  { %2204 = vmatpush1.bf16.msra.mxu0 %v5149_v13  ;;  %2245 = vmatpush1.bf16.msra.mxu1 %v5155_v14  ;;  %v7342_v13 = vld [vmem:[#allocation5_spill] sm:$0xff]  ;;  %v7343_v14 = vld [vmem:[#allocation6_spill] sm:$0xff] }
 0x49f   :  { %2205 = vmatprep.subr.bf16.mxu0 %v5161_v16  ;;  %2246 = vmatprep.subr.bf16.mxu1 %v5167_v17  ;;  %v7344_v16 = vld [vmem:[#allocation7_spill] sm:$0xff]  ;;  %v7345_v17 = vld [vmem:[#allocation8_spill] sm:$0xff] }
 0x4a0   :  { %2235 = vmatprep.mubr.bf16.mxu0 %v7120_v20  ;;  %2276 = vmatprep.mubr.bf16.mxu1 %v7120_v20 }
 0x4a2   :  { %2206 = vmatpush1.bf16.msra.mxu0 %v5175_v23  ;;  %2247 = vmatpush1.bf16.msra.mxu1 %v5181_v27  ;;  %v7346_v23 = vld [vmem:[#allocation9_spill] sm:$0xff]  ;;  %v7347_v27 = vld [vmem:[#allocation10_spill] sm:$0xff] }
 0x4a3   :  { %2207 = vmatprep.subr.bf16.mxu0 %v5187_v28  ;;  %2248 = vmatprep.subr.bf16.mxu1 %v5193_v29  ;;  %v7348_v28 = vld [vmem:[#allocation11_spill] sm:$0xff]  ;;  %v7349_v29 = vld [vmem:[#allocation12_spill] sm:$0xff] }
 0x4a6   :  { %2208 = vmatpush1.bf16.msra.mxu0 %v5199_v31  ;;  %2249 = vmatpush1.bf16.msra.mxu1 %v5205_v32  ;;  %v7350_v31 = vld [vmem:[#allocation13_spill] sm:$0xff]  ;;  %v7351_v32 = vld [vmem:[#allocation14_spill] sm:$0xff] }
 0x4a7   :  { %2209 = vmatprep.subr.bf16.mxu0 %v5211_v33  ;;  %2250 = vmatprep.subr.bf16.mxu1 %v5217_v37  ;;  %v7352_v33 = vld [vmem:[#allocation15_spill] sm:$0xff]  ;;  %v7353_v37 = vld [vmem:[#allocation16_spill] sm:$0xff] }
 0x4aa   :  { %2210 = vmatpush1.bf16.msra.mxu0 %v5223_v50  ;;  %2251 = vmatpush1.bf16.msra.mxu1 %v5229_v51  ;;  %v7354_v50 = vld [vmem:[#allocation17_spill] sm:$0xff]  ;;  %v7355_v51 = vld [vmem:[#allocation18_spill] sm:$0xff] }
 0x4ab   :  { %2211 = vmatprep.subr.bf16.mxu0 %v5235_v52  ;;  %2252 = vmatprep.subr.bf16.mxu1 %v7340_v11  ;;  %v7356_v52 = vld [vmem:[#allocation19_spill] sm:$0xff]  ;;  %v7367_v11 = vld [vmem:[#allocation60_spill] sm:$0xff] }
 0x4ae   :  { %2212 = vmatpush1.bf16.msra.mxu0 %v7341_v12  ;;  %2253 = vmatpush1.bf16.msra.mxu1 %v7342_v13  ;;  %v7368_v12 = vld [vmem:[#allocation61_spill] sm:$0xff]  ;;  %v7369_v13 = vld [vmem:[#allocation62_spill] sm:$0xff] }
 0x4af   :  { %2213 = vmatprep.subr.bf16.mxu0 %v7343_v14  ;;  %2254 = vmatprep.subr.bf16.mxu1 %v7344_v16  ;;  %v7370_v14 = vld [vmem:[#allocation63_spill] sm:$0xff]  ;;  %v7371_v16 = vld [vmem:[#allocation41_spill] sm:$0xff] }
 0x4b2   :  { %2214 = vmatpush1.bf16.msra.mxu0 %v7345_v17  ;;  %2255 = vmatpush1.bf16.msra.mxu1 %v7346_v23  ;;  %v7372_v17 = vld [vmem:[#allocation42_spill] sm:$0xff]  ;;  %v7373_v23 = vld [vmem:[#allocation43_spill] sm:$0xff] }
 0x4b3   :  { %2215 = vmatprep.subr.bf16.mxu0 %v7347_v27  ;;  %2256 = vmatprep.subr.bf16.mxu1 %v7348_v28  ;;  %v7374_v27 = vld [vmem:[#allocation44_spill] sm:$0xff]  ;;  %v7375_v28 = vld [vmem:[#allocation45_spill] sm:$0xff] }
 0x4b6   :  { %2216 = vmatpush1.bf16.msra.mxu0 %v7349_v29  ;;  %2257 = vmatpush1.bf16.msra.mxu1 %v7350_v31  ;;  %v7376_v29 = vld [vmem:[#allocation46_spill] sm:$0xff]  ;;  %v7377_v31 = vld [vmem:[#allocation47_spill] sm:$0xff] }
 0x4b7   :  { %2217 = vmatprep.subr.bf16.mxu0 %v7351_v32  ;;  %2258 = vmatprep.subr.bf16.mxu1 %v7352_v33  ;;  %v7378_v32 = vld [vmem:[#allocation48_spill] sm:$0xff]  ;;  %v7379_v33 = vld [vmem:[#allocation49_spill] sm:$0xff] }
 0x4ba   :  { %2218 = vmatpush1.bf16.msra.mxu0 %v7353_v37  ;;  %2259 = vmatpush1.bf16.msra.mxu1 %v7354_v50  ;;  %v7380_v37 = vld [vmem:[#allocation50_spill] sm:$0xff]  ;;  %v7381_v50 = vld [vmem:[#allocation51_spill] sm:$0xff] }
 0x4bb   :  { %2315 = vmatprep.subr.bf16.mxu0 %v7355_v51  ;;  %2356 = vmatprep.subr.bf16.mxu1 %v7356_v52  ;;  %v7382_v51 = vld [vmem:[#allocation52_spill] sm:$0xff]  ;;  %v7383_v52 = vld [vmem:[#allocation53_spill] sm:$0xff] }
 0x4bd   :  { %2236 = vmatmul.mubr.bf16.vlgmr.msra.gmra.mrb[64].mxu0 %v2002_v0  ;;  %2277 = vmatmul.mubr.bf16.vlgmr.msra.gmra.mrb[64].mxu1 %v2002_v0  ;;  %v7366_v0 = vld [vmem:[#allocation59_spill] sm:$0xff] }
 0x4be   :  { %2316 = vmatpush1.bf16.msra.mxu0 %v7357_v15  ;;  %2357 = vmatpush1.bf16.msra.mxu1 %v7358_v5  ;;  %v7384_v15 = vld [vmem:[#allocation54_spill] sm:$0xff]  ;;  %v7385_v5 = vld [vmem:[#allocation55_spill] sm:$0xff] }
 0x4bf   :  { %2317 = vmatprep.subr.bf16.mxu0 %v7359_v7  ;;  %2358 = vmatprep.subr.bf16.mxu1 %v7360_v40  ;;  %v7386_v7 = vld [vmem:[#allocation56_spill] sm:$0xff]  ;;  %v7387_v40 = vld [vmem:[#allocation57_spill] sm:$0xff] }
 0x4c0   :  { %2347 = vmatprep.mubr.bf16.mxu0 %v7120_v20  ;;  %2388 = vmatprep.mubr.bf16.mxu1 %v7120_v20 }
 0x4c2   :  { %2318 = vmatpush1.bf16.msra.mxu0 %v7361_v6  ;;  %2359 = vmatpush1.bf16.msra.mxu1 %v7362_v1  ;;  %v7388_v6 = vld [vmem:[#allocation58_spill] sm:$0xff] }
 0x4c3   :  { %2319 = vmatprep.subr.bf16.mxu0 %v7363_v25  ;;  %2360 = vmatprep.subr.bf16.mxu1 %v7364_v62 }
 0x4c6   :  { %2320 = vmatpush1.bf16.msra.mxu0 %v7365_v35  ;;  %2361 = vmatpush1.bf16.msra.mxu1 %v7366_v0 }
 0x4c7   :  { %2321 = vmatprep.subr.bf16.mxu0 %v7367_v11  ;;  %2362 = vmatprep.subr.bf16.mxu1 %v7368_v12 }
 0x4ca   :  { %2322 = vmatpush1.bf16.msra.mxu0 %v7369_v13  ;;  %2363 = vmatpush1.bf16.msra.mxu1 %v7370_v14 }
 0x4cb   :  { %2323 = vmatprep.subr.bf16.mxu0 %v7371_v16  ;;  %2364 = vmatprep.subr.bf16.mxu1 %v7372_v17 }
 0x4ce   :  { %2324 = vmatpush1.bf16.msra.mxu0 %v7373_v23  ;;  %2365 = vmatpush1.bf16.msra.mxu1 %v7374_v27 }
 0x4cf   :  { %2325 = vmatprep.subr.bf16.mxu0 %v7375_v28  ;;  %2366 = vmatprep.subr.bf16.mxu1 %v7376_v29 }
 0x4d2   :  { %2326 = vmatpush1.bf16.msra.mxu0 %v7377_v31  ;;  %2367 = vmatpush1.bf16.msra.mxu1 %v7378_v32 }
 0x4d3   :  { %2327 = vmatprep.subr.bf16.mxu0 %v7379_v33  ;;  %2368 = vmatprep.subr.bf16.mxu1 %v7380_v37 }
 0x4d6   :  { %2328 = vmatpush1.bf16.msra.mxu0 %v7381_v50  ;;  %2369 = vmatpush1.bf16.msra.mxu1 %v7382_v51 }
 0x4d7   :  { %2329 = vmatprep.subr.bf16.mxu0 %v7383_v52  ;;  %2370 = vmatprep.subr.bf16.mxu1 %v7384_v15 }
 0x4da   :  { %2330 = vmatpush1.bf16.msra.mxu0 %v7385_v5  ;;  %2371 = vmatpush1.bf16.msra.mxu1 %v7386_v7 }
 0x4db   :  { %2397 = vmatprep.subr.bf16.mxu0 %v7387_v40  ;;  %2438 = vmatprep.subr.bf16.mxu1 %v7388_v6 }
 0x550   :  { %v2038_v1 = vpop.f32.mrb[56].mxu0  ;;  %v2079_v25 = vpop.f32.mrb[56].mxu1 }
 0x551   :  { %v2040_v62 = vpop.f32.mrb[57].mxu0  ;;  %v2081_v35 = vpop.f32.mrb[57].mxu1 }
 0x552   :  { %v2042_v0 = vpop.f32.mrb[58].mxu0  ;;  %v2083_v11 = vpop.f32.mrb[58].mxu1 }
 0x553   :  { %v2043_v12 = vpop.f32.mrb[59].mxu0  ;;  %v2084_v13 = vpop.f32.mrb[59].mxu1 }
 0x554   :  { %v7390_v13 = vld [vmem:[#allocation73_spill] sm:$0xff] }
 0x570   :  { %v2120_v14 = vpop.f32.mrb[60].mxu0  ;;  %v2161_v52 = vpop.f32.mrb[60].mxu1 }
 0x571   :  { %v2121_v51 = vadd.f32 %v2120_v14, %v2038_v1  ;;  %v2162_v15 = vadd.f32 %v2161_v52, %v2079_v25  ;;  %v2122_v50 = vpop.f32.mrb[61].mxu0  ;;  %v2163_v5 = vpop.f32.mrb[61].mxu1 }
 0x572   :  { %v2123_v37 = vadd.f32 %v2122_v50, %v2040_v62  ;;  %v2164_v7 = vadd.f32 %v2163_v5, %v2081_v35  ;;  %v2124_v33 = vpop.f32.mrb[62].mxu0  ;;  %v2165_v40 = vpop.f32.mrb[62].mxu1  ;;  %v7389_v35 = vld [vmem:[#allocation72_spill] sm:$0xff] }
 0x573   :  { %v2168_v6 = vadd.f32 %v2121_v51, %v5069_v53  ;;  %v2125_v32 = vpop.f32.mrb[63].mxu0  ;;  %v2166_v31 = vpop.f32.mrb[63].mxu1  ;;  %v2170_v52 = vadd.f32 %v2162_v15, %v5084_v55 }
 0x574   :  { %v2169_v29 = vadd.f32 %v2123_v37, %v5073_v58  ;;  %v2171_v12 = vadd.f32 %v2164_v7, %v5079_v60 }
 0x575   :  { %v3589_v0 = vmul.f32 -1.442695, %v2168_v6 }
 0x576   :  { %v3590_v11 = vmul.f32 -1.442695, %v2169_v29  ;;  %v3591_v1 = vmul.f32 -1.442695, %v2171_v12 }
 0x577   :  { %3876 = vpow2.f32 %v3589_v0 }
 0x578   :  { %3878 = vpow2.f32 %v3590_v11 }
 0x579   :  { %3880 = vpow2.f32 %v3591_v1  ;;  %v7391_v1 = vld [vmem:[#allocation74_spill] sm:$0xff] }
 0x57a   :  { %3882 = vtanh.f32 %v2170_v52 }
 0x581   :  { %v3877_v25 = vpop.eup %3876 }
 0x582   :  { %v3879_v50 = vpop.eup %3878  ;;  %v2175_v5 = vadd.f32 1.0, %v3877_v25  ;;  %v7392_v25 = vld [vmem:[#allocation75_spill] sm:$0xff] }
 0x583   :  { %v2181_v33 = vadd.f32 1.0, %v3879_v50  ;;  %v3881_v31 = vpop.eup %3880 }
 0x584   :  { %3884 = vrcp.f32 %v2175_v5  ;;  %v3883_v32 = vpop.eup %3882  ;;  %v2188_v40 = vadd.f32 1.0, %v3881_v31 }
 0x585   :  { %3886 = vrcp.f32 %v2181_v33 }
 0x586   :  { %3888 = vrcp.f32 %v2188_v40 }
 0x58e   :  { %v3885_v37 = vpop.eup %3884 }
 0x58f   :  { %v3887_v51 = vpop.eup %3886  ;;  %v2192_v29 = vmul.f32 %v3885_v37, %v3883_v32 }
 0x590   :  { %v2191_v6 = vmul.f32 %v3887_v51, %v5811_v30  ;;  %v2237_v7 = vpop.f32.mrb[64].mxu0  ;;  %v2278_v62 = vpop.f32.mrb[64].mxu1 }
 0x591   :  { %v2285_v15 = vadd.f32 %v2237_v7, %v7389_v35  ;;  %v2287_v14 = vadd.f32 %v2278_v62, %v7390_v13  ;;  %v2239_v0 = vpop.f32.mrb[65].mxu0  ;;  %v2280_v11 = vpop.f32.mrb[65].mxu1 }
 0x592   :  { %v5929_v12 = vadd.f32 %v2192_v29, %v2191_v6  ;;  %v2286_v52 = vadd.f32 %v2239_v0, %v7391_v1  ;;  %v2288_v50 = vadd.f32 %v2280_v11, %v7392_v25  ;;  %v2241_v5 = vpop.f32.mrb[66].mxu0  ;;  %v2282_v33 = vpop.f32.mrb[66].mxu1  ;;  %v6111_v1 = vld [vmem:[%s6817_s3 + $0xa0] ss:$16 sps:$4 sm:$0xff]   ;;  %v6123_v25 = vld [vmem:[%s6817_s3 + $0xc4] ss:$16 sps:$4 sm:$0xff]  }
 0x593   :  { %v3592_v31 = vmul.f32 -1.442695, %v2285_v15  ;;  %v2242_v32 = vpop.f32.mrb[67].mxu0  ;;  %v2283_v30 = vpop.f32.mrb[67].mxu1  ;;  %7398 = vst [vmem:[#allocation69_spill] sm:$0xff] %v6111_v1  ;;  %7400 = vst [vmem:[#allocation71_spill] sm:$0xff] %v6123_v25 }
 0x594   :  { %v3593_v37 = vmul.f32 -1.442695, %v2286_v52  ;;  %3890 = vtanh.f32 %v5929_v12  ;;  %v3594_v51 = vmul.f32 -1.442695, %v2288_v50  ;;  %v3889_v7 = vpop.eup %3888  ;;  %v6117_v52 = vld [vmem:[%s6817_s3 + $0xa8] ss:$16 sps:$4 sm:$0xff]  }
 0x595   :  { %3892 = vpow2.f32 %v3592_v31  ;;  %7399 = vst [vmem:[#allocation70_spill] sm:$0xff] %v6117_v52  ;;  %v6129_v50 = vld [vmem:[%s6817_s3 + $0xcc] ss:$16 sps:$4 sm:$0xff]   ;;  %v6135_v5 = vld [vmem:[%s6817_s3 + $0xc0] ss:$16 sps:$4 sm:$0xff]  }
 0x596   :  { %3894 = vpow2.f32 %v3593_v37  ;;  %7401 = vst [vmem:[#allocation29_spill] sm:$0xff] %v6129_v50  ;;  %7402 = vst [vmem:[#allocation30_spill] sm:$0xff] %v6135_v5  ;;  %v6141_v33 = vld [vmem:[%s6817_s3 + $0xc8] ss:$16 sps:$4 sm:$0xff]   ;;  %v6147_v31 = vld [vmem:[%s6817_s3 + $0xe4] ss:$16 sps:$4 sm:$0xff]  }
 0x597   :  { %3896 = vpow2.f32 %v3594_v51  ;;  %7403 = vst [vmem:[#allocation31_spill] sm:$0xff] %v6141_v33  ;;  %7404 = vst [vmem:[#allocation32_spill] sm:$0xff] %v6147_v31  ;;  %v6153_v32 = vld [vmem:[%s6817_s3 + $0xec] ss:$16 sps:$4 sm:$0xff]   ;;  %v6159_v30 = vld [vmem:[%s6817_s3 + $0xe0] ss:$16 sps:$4 sm:$0xff]  }
 0x598   :  { %3898 = vtanh.f32 %v2287_v14  ;;  %v6105_v14 = vld [vmem:[%s6817_s3 + $0xac] ss:$16 sps:$4 sm:$0xff]   ;;  %7405 = vst [vmem:[#allocation33_spill] sm:$0xff] %v6153_v32  ;;  %7406 = vst [vmem:[#allocation34_spill] sm:$0xff] %v6159_v30  ;;  %v6165_v37 = vld [vmem:[%s6817_s3 + $0xe8] ss:$16 sps:$4 sm:$0xff]  }
 0x599   :  { %7397 = vst [vmem:[#allocation68_spill] sm:$0xff] %v6105_v14  ;;  %7407 = vst [vmem:[#allocation35_spill] sm:$0xff] %v6165_v37  ;;  %v6171_v51 = vld [vmem:[%s6818_s5 + $0x4] ss:$16 sps:$4 sm:$0xff]  }
 0x59a   :  { %7408 = vst [vmem:[#allocation36_spill] sm:$0xff] %v6171_v51 }
 0x59e   :  { %v3891_v62 = vpop.eup %3890 }
 0x59f   :  { %v3893_v29 = vpop.eup %3892  ;;  %v2195_v6 = vmul.f32 %v3891_v62, %v3889_v7  ;;  %v6177_v7 = vld [vmem:[%s6818_s5 + $0xc] ss:$16 sps:$4 sm:$0xff]   ;;  %v6185_v62 = vld [vmem:[%s6818_s5] ss:$16 sps:$4 sm:$0xff]  }
 0x5a0   :  { %v3895_v35 = vpop.eup %3894  ;;  %v2292_v13 = vadd.f32 1.0, %v3893_v29  ;;  %7409 = vst [vmem:[#allocation37_spill] sm:$0xff] %v6177_v7  ;;  %7410 = vst [vmem:[#allocation38_spill] sm:$0xff] %v6185_v62  ;;  %v6191_v29 = vld [vmem:[%s6818_s5 + $0x8] ss:$16 sps:$4 sm:$0xff]  }
 0x5a1   :  { %v2298_v0 = vadd.f32 1.0, %v3895_v35  ;;  %v2314_v11 = vpack.c.bf16 %v2195_v6, %v2195_v6  ;;  %v3897_v40 = vpop.eup %3896  ;;  %7411 = vst [vmem:[#allocation39_spill] sm:$0xff] %v6191_v29  ;;  %v6197_v6 = vld [vmem:[%s6818_s5 + $0x24] ss:$16 sps:$4 sm:$0xff]   ;;  %v6203_v35 = vld [vmem:[%s6818_s5 + $0x2c] ss:$16 sps:$4 sm:$0xff]  }
 0x5a2   :  { %3900 = vrcp.f32 %v2292_v13  ;;  %7412 = vst [vmem:[#allocation40_spill] sm:$0xff] %v6197_v6  ;;  %7413 = vst [vmem:[#allocation3_spill] sm:$0xff] %v6203_v35  ;;  %v6211_v13 = vld [vmem:[%s6818_s5 + $0x20] ss:$16 sps:$4 sm:$0xff]  }
 0x5a3   :  { %3902 = vrcp.f32 %v2298_v0  ;;  %2348 = vmatmul.mubr.bf16.vlgmr.msra.gmra.mrb[68].mxu0 %v2314_v11  ;;  %2389 = vmatmul.mubr.bf16.vlgmr.msra.gmra.mrb[68].mxu1 %v2314_v11  ;;  %7414 = vst [vmem:[#allocation4_spill] sm:$0xff] %v6211_v13  ;;  %v6217_v0 = vld [vmem:[%s6818_s5 + $0x28] ss:$16 sps:$4 sm:$0xff]   ;;  %v6223_v11 = vld [vmem:[%s6818_s5 + $0x44] ss:$16 sps:$4 sm:$0xff]  }
 0x5a4   :  { %2398 = vmatpush1.bf16.msra.mxu0 %v5461_v41  ;;  %2439 = vmatpush1.bf16.msra.mxu1 %v5467_v42  ;;  %v3899_v41 = vpop.eup %3898  ;;  %7415 = vst [vmem:[#allocation5_spill] sm:$0xff] %v6217_v0  ;;  %7416 = vst [vmem:[#allocation6_spill] sm:$0xff] %v6223_v11 }
 0x5a5   :  { %2399 = vmatprep.subr.bf16.mxu0 %v5473_v49  ;;  %2440 = vmatprep.subr.bf16.mxu1 %v5479_v18  ;;  %v2305_v18 = vadd.f32 1.0, %v3897_v40  ;;  %v6229_v40 = vld [vmem:[%s6818_s5 + $0x4c] ss:$16 sps:$4 sm:$0xff]  }
 0x5a6   :  { %2429 = vmatprep.mubr.bf16.mxu0 %v7120_v20  ;;  %2470 = vmatprep.mubr.bf16.mxu1 %v7120_v20  ;;  %7417 = vst [vmem:[#allocation7_spill] sm:$0xff] %v6229_v40 }
 0x5a7   :  { %3904 = vrcp.f32 %v2305_v18  ;;  %v6259_v18 = vld [vmem:[%s6818_s5 + $0x60] ss:$16 sps:$4 sm:$0xff]  }
 0x5a8   :  { %2400 = vmatpush1.bf16.msra.mxu0 %v5487_v19  ;;  %2441 = vmatpush1.bf16.msra.mxu1 %v5493_v36  ;;  %7422 = vst [vmem:[#allocation12_spill] sm:$0xff] %v6259_v18 }
 0x5a9   :  { %2401 = vmatprep.subr.bf16.mxu0 %v5499_v21  ;;  %2442 = vmatprep.subr.bf16.mxu1 %v5505_v22 }
 0x5ac   :  { %v3901_v15 = vpop.eup %3900  ;;  %2402 = vmatpush1.bf16.msra.mxu0 %v5511_v45  ;;  %2443 = vmatpush1.bf16.msra.mxu1 %v5517_v38 }
 0x5ad   :  { %v3903_v42 = vpop.eup %3902  ;;  %v2309_v49 = vmul.f32 %v3901_v15, %v3899_v41  ;;  %2403 = vmatprep.subr.bf16.mxu0 %v5523_v8  ;;  %2444 = vmatprep.subr.bf16.mxu1 %v5529_v43  ;;  %v5975_v8 = vld [vmem:[%s6817_s3 + $0x4] ss:$16 sps:$4 sm:$0xff]   ;;  %v5981_v43 = vld [vmem:[%s6817_s3 + $0xc] ss:$16 sps:$4 sm:$0xff]   ;;  %v6235_v41 = vld [vmem:[%s6818_s5 + $0x40] ss:$16 sps:$4 sm:$0xff]  }
 0x5ae   :  { %v2308_v19 = vmul.f32 %v3903_v42, %v5831_v54  ;;  %v6027_v54 = vld [vmem:[%s6817_s3 + $0x44] ss:$16 sps:$4 sm:$0xff]   ;;  %7418 = vst [vmem:[#allocation8_spill] sm:$0xff] %v6235_v41  ;;  %v6241_v15 = vld [vmem:[%s6818_s5 + $0x48] ss:$16 sps:$4 sm:$0xff]  }
 0x5af   :  { %7419 = vst [vmem:[#allocation9_spill] sm:$0xff] %v6241_v15  ;;  %v6247_v42 = vld [vmem:[%s6818_s5 + $0x64] ss:$16 sps:$4 sm:$0xff]  }
 0x5b0   :  { %v5949_v36 = vadd.f32 %v2309_v49, %v2308_v19  ;;  %2404 = vmatpush1.bf16.msra.mxu0 %v5538_v24  ;;  %2445 = vmatpush1.bf16.msra.mxu1 %v5544_v26  ;;  %v5989_v24 = vld [vmem:[%s6817_s3] ss:$16 sps:$4 sm:$0xff]   ;;  %v5995_v26 = vld [vmem:[%s6817_s3 + $0x8] ss:$16 sps:$4 sm:$0xff]   ;;  %7420 = vst [vmem:[#allocation10_spill] sm:$0xff] %v6247_v42 }
 0x5b1   :  { %2405 = vmatprep.subr.bf16.mxu0 %v5550_v10  ;;  %2446 = vmatprep.subr.bf16.mxu1 %v7328_v59  ;;  %v3905_v21 = vpop.eup %3904  ;;  %v6001_v10 = vld [vmem:[%s6817_s3 + $0x24] ss:$16 sps:$4 sm:$0xff]   ;;  %v6033_v59 = vld [vmem:[%s6817_s3 + $0x4c] ss:$16 sps:$4 sm:$0xff]   ;;  %v6265_v19 = vld [vmem:[%s6818_s5 + $0x68] ss:$16 sps:$4 sm:$0xff]  }
 0x5b2   :  { %3906 = vtanh.f32 %v5949_v36  ;;  %v6253_v49 = vld [vmem:[%s6818_s5 + $0x6c] ss:$16 sps:$4 sm:$0xff]   ;;  %7423 = vst [vmem:[#allocation13_spill] sm:$0xff] %v6265_v19 }
 0x5b3   :  { %7421 = vst [vmem:[#allocation11_spill] sm:$0xff] %v6253_v49 }
 0x5b4   :  { %2406 = vmatpush1.bf16.msra.mxu0 %v7329_v63  ;;  %2447 = vmatpush1.bf16.msra.mxu1 %v7330_v61  ;;  %v6039_v63 = vld [vmem:[%s6817_s3 + $0x40] ss:$16 sps:$4 sm:$0xff]   ;;  %v6045_v61 = vld [vmem:[%s6817_s3 + $0x48] ss:$16 sps:$4 sm:$0xff]  }
 0x5b5   :  { %2407 = vmatprep.subr.bf16.mxu0 %v7331_v34  ;;  %2448 = vmatprep.subr.bf16.mxu1 %v7332_v48  ;;  %v6051_v34 = vld [vmem:[%s6817_s3 + $0x64] ss:$16 sps:$4 sm:$0xff]   ;;  %v6057_v48 = vld [vmem:[%s6817_s3 + $0x6c] ss:$16 sps:$4 sm:$0xff]  }
 0x5b8   :  { %2408 = vmatpush1.bf16.msra.mxu0 %v7333_v4  ;;  %2449 = vmatpush1.bf16.msra.mxu1 %v7334_v2  ;;  %v6063_v4 = vld [vmem:[%s6817_s3 + $0x60] ss:$16 sps:$4 sm:$0xff]   ;;  %v6069_v2 = vld [vmem:[%s6817_s3 + $0x68] ss:$16 sps:$4 sm:$0xff]  }
 0x5b9   :  { %2409 = vmatprep.subr.bf16.mxu0 %v7335_v3  ;;  %2450 = vmatprep.subr.bf16.mxu1 %v7336_v9  ;;  %v6075_v3 = vld [vmem:[%s6817_s3 + $0x84] ss:$16 sps:$4 sm:$0xff]   ;;  %v6081_v9 = vld [vmem:[%s6817_s3 + $0x8c] ss:$16 sps:$4 sm:$0xff]  }
 0x5ba   :  { %7393 = vst [vmem:[#allocation64_spill] sm:$0xff] %v6081_v9 }
 0x5bc   :  { %v3907_v22 = vpop.eup %3906  ;;  %2410 = vmatpush1.bf16.msra.mxu0 %v7337_v46  ;;  %2451 = vmatpush1.bf16.msra.mxu1 %v7338_v47  ;;  %v6087_v46 = vld [vmem:[%s6817_s3 + $0x80] ss:$16 sps:$4 sm:$0xff]   ;;  %v6093_v47 = vld [vmem:[%s6817_s3 + $0x88] ss:$16 sps:$4 sm:$0xff]  }
 0x5bd   :  { %2411 = vmatprep.subr.bf16.mxu0 %v7339_v56  ;;  %2452 = vmatprep.subr.bf16.mxu1 %v5629_v57  ;;  %v2312_v45 = vmul.f32 %v3907_v22, %v3905_v21  ;;  %v6007_v57 = vld [vmem:[%s6817_s3 + $0x2c] ss:$16 sps:$4 sm:$0xff]   ;;  %7394 = vst [vmem:[#allocation65_spill] sm:$0xff] %v6087_v46  ;;  %7395 = vst [vmem:[#allocation66_spill] sm:$0xff] %v6093_v47  ;;  %v6099_v56 = vld [vmem:[%s6817_s3 + $0xa4] ss:$16 sps:$4 sm:$0xff]  }
 0x5be   :  { %7396 = vst [vmem:[#allocation67_spill] sm:$0xff] %v6099_v56  ;;  %v7424_v21 = vld [vmem:[#allocation46_spill] sm:$0xff]  ;;  %v7425_v22 = vld [vmem:[#allocation47_spill] sm:$0xff] }
 0x5bf   :  { %v5968_v38 = vpack.c.bf16 %v2312_v45, %v2312_v45  ;;  %v7426_v45 = vld [vmem:[#allocation48_spill] sm:$0xff] }
 0x5c0   :  { %2412 = vmatpush1.bf16.msra.mxu0 %v5635_v39  ;;  %2453 = vmatpush1.bf16.msra.mxu1 %v5641_v44  ;;  %v6015_v39 = vld [vmem:[%s6817_s3 + $0x20] ss:$16 sps:$4 sm:$0xff]   ;;  %v6021_v44 = vld [vmem:[%s6817_s3 + $0x28] ss:$16 sps:$4 sm:$0xff]  }
 0x5c1   :  { %2514 = vmatprep.subr.bf16.mxu0 %v5975_v8  ;;  %2555 = vmatprep.subr.bf16.mxu1 %v5981_v43 }
 0x5c3   :  { %2430 = vmatmul.mubr.bf16.vlgmr.msra.gmra.mrb[72].mxu0 %v5968_v38  ;;  %2471 = vmatmul.mubr.bf16.vlgmr.msra.gmra.mrb[72].mxu1 %v5968_v38 }
 0x5c4   :  { %2515 = vmatpush1.bf16.msra.mxu0 %v5989_v24  ;;  %2556 = vmatpush1.bf16.msra.mxu1 %v5995_v26 }
 0x5c5   :  { %2516 = vmatprep.subr.bf16.mxu0 %v6001_v10  ;;  %2557 = vmatprep.subr.bf16.mxu1 %v6007_v57 }
 0x5c6   :  { %2546 = vmatprep.mubr.bf16.mxu0 %v7120_v20  ;;  %2587 = vmatprep.mubr.bf16.mxu1 %v7120_v20 }
 0x5c8   :  { %2517 = vmatpush1.bf16.msra.mxu0 %v6015_v39  ;;  %2558 = vmatpush1.bf16.msra.mxu1 %v6021_v44 }
 0x5c9   :  { %2518 = vmatprep.subr.bf16.mxu0 %v6027_v54  ;;  %2559 = vmatprep.subr.bf16.mxu1 %v6033_v59 }
 0x5cc   :  { %2519 = vmatpush1.bf16.msra.mxu0 %v6039_v63  ;;  %2560 = vmatpush1.bf16.msra.mxu1 %v6045_v61 }
 0x5cd   :  { %2520 = vmatprep.subr.bf16.mxu0 %v6051_v34  ;;  %2561 = vmatprep.subr.bf16.mxu1 %v6057_v48 }
 0x5d0   :  { %2521 = vmatpush1.bf16.msra.mxu0 %v6063_v4  ;;  %2562 = vmatpush1.bf16.msra.mxu1 %v6069_v2 }
 0x5d1   :  { %2522 = vmatprep.subr.bf16.mxu0 %v6075_v3  ;;  %2563 = vmatprep.subr.bf16.mxu1 %v6081_v9 }
 0x5d4   :  { %2523 = vmatpush1.bf16.msra.mxu0 %v6087_v46  ;;  %2564 = vmatpush1.bf16.msra.mxu1 %v6093_v47 }
 0x5d5   :  { %2524 = vmatprep.subr.bf16.mxu0 %v6099_v56  ;;  %2565 = vmatprep.subr.bf16.mxu1 %v6105_v14 }
 0x5d8   :  { %2525 = vmatpush1.bf16.msra.mxu0 %v6111_v1  ;;  %2566 = vmatpush1.bf16.msra.mxu1 %v6117_v52 }
 0x5d9   :  { %2526 = vmatprep.subr.bf16.mxu0 %v6123_v25  ;;  %2567 = vmatprep.subr.bf16.mxu1 %v6129_v50 }
 0x5dc   :  { %2527 = vmatpush1.bf16.msra.mxu0 %v6135_v5  ;;  %2568 = vmatpush1.bf16.msra.mxu1 %v6141_v33 }
 0x5dd   :  { %2528 = vmatprep.subr.bf16.mxu0 %v6147_v31  ;;  %2569 = vmatprep.subr.bf16.mxu1 %v6153_v32 }
 0x5e0   :  { %2529 = vmatpush1.bf16.msra.mxu0 %v6159_v30  ;;  %2570 = vmatpush1.bf16.msra.mxu1 %v6165_v37 }
 0x5e1   :  { %2626 = vmatprep.subr.bf16.mxu0 %v6171_v51  ;;  %2667 = vmatprep.subr.bf16.mxu1 %v6177_v7 }
 0x5e3   :  { %2547 = vmatmul.mubr.bf16.vlgmr.msra.gmra.mrb[76].mxu0 %v5968_v38  ;;  %2588 = vmatmul.mubr.bf16.vlgmr.msra.gmra.mrb[76].mxu1 %v5968_v38  ;;  %v7427_v38 = vld [vmem:[#allocation49_spill] sm:$0xff] }
 0x5e4   :  { %2627 = vmatpush1.bf16.msra.mxu0 %v6185_v62  ;;  %2668 = vmatpush1.bf16.msra.mxu1 %v6191_v29 }
 0x5e5   :  { %2628 = vmatprep.subr.bf16.mxu0 %v6197_v6  ;;  %2669 = vmatprep.subr.bf16.mxu1 %v6203_v35 }
 0x5e6   :  { %2658 = vmatprep.mubr.bf16.mxu0 %v7120_v20  ;;  %2699 = vmatprep.mubr.bf16.mxu1 %v7120_v20 }
 0x5e8   :  { %2629 = vmatpush1.bf16.msra.mxu0 %v6211_v13  ;;  %2670 = vmatpush1.bf16.msra.mxu1 %v6217_v0 }
 0x5e9   :  { %2630 = vmatprep.subr.bf16.mxu0 %v6223_v11  ;;  %2671 = vmatprep.subr.bf16.mxu1 %v6229_v40 }
 0x5ec   :  { %2631 = vmatpush1.bf16.msra.mxu0 %v6235_v41  ;;  %2672 = vmatpush1.bf16.msra.mxu1 %v6241_v15 }
 0x5ed   :  { %2632 = vmatprep.subr.bf16.mxu0 %v6247_v42  ;;  %2673 = vmatprep.subr.bf16.mxu1 %v6253_v49 }
 0x5f0   :  { %2633 = vmatpush1.bf16.msra.mxu0 %v6259_v18  ;;  %2674 = vmatpush1.bf16.msra.mxu1 %v6265_v19  ;;  %v7428_v18 = vld [vmem:[#allocation50_spill] sm:$0xff]  ;;  %v7429_v19 = vld [vmem:[#allocation51_spill] sm:$0xff] }
 0x5f1   :  { %2634 = vmatprep.subr.bf16.mxu0 %v7371_v16  ;;  %2675 = vmatprep.subr.bf16.mxu1 %v7372_v17  ;;  %v7430_v16 = vld [vmem:[#allocation52_spill] sm:$0xff]  ;;  %v7431_v17 = vld [vmem:[#allocation53_spill] sm:$0xff] }
 0x5f4   :  { %2635 = vmatpush1.bf16.msra.mxu0 %v7373_v23  ;;  %2676 = vmatpush1.bf16.msra.mxu1 %v7374_v27  ;;  %v7432_v23 = vld [vmem:[#allocation54_spill] sm:$0xff]  ;;  %v7433_v27 = vld [vmem:[#allocation55_spill] sm:$0xff] }
 0x5f5   :  { %2636 = vmatprep.subr.bf16.mxu0 %v7375_v28  ;;  %2677 = vmatprep.subr.bf16.mxu1 %v7424_v21  ;;  %v7434_v28 = vld [vmem:[#allocation56_spill] sm:$0xff]  ;;  %v7435_v21 = vld [vmem:[#allocation57_spill] sm:$0xff] }
 0x5f8   :  { %2637 = vmatpush1.bf16.msra.mxu0 %v7425_v22  ;;  %2678 = vmatpush1.bf16.msra.mxu1 %v7426_v45  ;;  %v7436_v22 = vld [vmem:[#allocation58_spill] sm:$0xff] }
 0x5f9   :  { %2638 = vmatprep.subr.bf16.mxu0 %v7427_v38  ;;  %2679 = vmatprep.subr.bf16.mxu1 %v7428_v18 }
 0x5fc   :  { %2639 = vmatpush1.bf16.msra.mxu0 %v7429_v19  ;;  %2680 = vmatpush1.bf16.msra.mxu1 %v7430_v16 }
 0x5fd   :  { %2640 = vmatprep.subr.bf16.mxu0 %v7431_v17  ;;  %2681 = vmatprep.subr.bf16.mxu1 %v7432_v23 }
 0x600   :  { %2641 = vmatpush1.bf16.msra.mxu0 %v7433_v27  ;;  %2682 = vmatpush1.bf16.msra.mxu1 %v7434_v28 }
 0x601   :  { %2708 = vmatprep.subr.bf16.mxu0 %v7435_v21  ;;  %2749 = vmatprep.subr.bf16.mxu1 %v7436_v22 }
 0x676   :  { %v2349_v45 = vpop.f32.mrb[68].mxu0  ;;  %v2390_v38 = vpop.f32.mrb[68].mxu1 }
 0x677   :  { %v2351_v49 = vpop.f32.mrb[69].mxu0  ;;  %v2392_v18 = vpop.f32.mrb[69].mxu1 }
 0x678   :  { %v2353_v42 = vpop.f32.mrb[70].mxu0  ;;  %v2394_v19 = vpop.f32.mrb[70].mxu1 }
 0x679   :  { %v2354_v15 = vpop.f32.mrb[71].mxu0  ;;  %v2395_v16 = vpop.f32.mrb[71].mxu1 }
 0x696   :  { %v2431_v41 = vpop.f32.mrb[72].mxu0  ;;  %v2472_v17 = vpop.f32.mrb[72].mxu1 }
 0x697   :  { %v2432_v40 = vadd.f32 %v2431_v41, %v2349_v45  ;;  %v2473_v23 = vadd.f32 %v2472_v17, %v2390_v38  ;;  %v2433_v11 = vpop.f32.mrb[73].mxu0  ;;  %v2474_v27 = vpop.f32.mrb[73].mxu1 }
 0x698   :  { %v2434_v0 = vadd.f32 %v2433_v11, %v2351_v49  ;;  %v2475_v28 = vadd.f32 %v2474_v27, %v2392_v18  ;;  %v2435_v13 = vpop.f32.mrb[74].mxu0  ;;  %v2476_v21 = vpop.f32.mrb[74].mxu1 }
 0x699   :  { %v2479_v22 = vadd.f32 %v2432_v40, %v5069_v53  ;;  %v2436_v35 = vpop.f32.mrb[75].mxu0  ;;  %v2477_v6 = vpop.f32.mrb[75].mxu1  ;;  %v2481_v45 = vadd.f32 %v2473_v23, %v5084_v55  ;;  %v7438_v21 = vld [vmem:[#allocation77_spill] sm:$0xff] }
 0x69a   :  { %v2480_v29 = vadd.f32 %v2434_v0, %v5073_v58  ;;  %v2482_v15 = vadd.f32 %v2475_v28, %v5079_v60  ;;  %v7437_v28 = vld [vmem:[#allocation76_spill] sm:$0xff] }
 0x69b   :  { %v3595_v42 = vmul.f32 -1.442695, %v2479_v22 }
 0x69c   :  { %v3596_v19 = vmul.f32 -1.442695, %v2480_v29  ;;  %v3597_v41 = vmul.f32 -1.442695, %v2482_v15 }
 0x69d   :  { %3908 = vpow2.f32 %v3595_v42 }
 0x69e   :  { %3910 = vpow2.f32 %v3596_v19 }
 0x69f   :  { %3912 = vpow2.f32 %v3597_v41  ;;  %v7439_v41 = vld [vmem:[#allocation78_spill] sm:$0xff] }
 0x6a0   :  { %3914 = vtanh.f32 %v2481_v45 }
 0x6a7   :  { %v3909_v38 = vpop.eup %3908 }
 0x6a8   :  { %v3911_v11 = vpop.eup %3910  ;;  %v2486_v49 = vadd.f32 1.0, %v3909_v38  ;;  %v7440_v38 = vld [vmem:[#allocation79_spill] sm:$0xff] }
 0x6a9   :  { %v2492_v13 = vadd.f32 1.0, %v3911_v11  ;;  %v3913_v6 = vpop.eup %3912 }
 0x6aa   :  { %3916 = vrcp.f32 %v2486_v49  ;;  %v3915_v35 = vpop.eup %3914  ;;  %v2499_v18 = vadd.f32 1.0, %v3913_v6 }
 0x6ab   :  { %3918 = vrcp.f32 %v2492_v13 }
 0x6ac   :  { %3920 = vrcp.f32 %v2499_v18  ;;  %v6301_v18 = vld [vmem:[%s6819_s4] ss:$16 sps:$4 sm:$0xff]  }
 0x6b4   :  { %v3917_v0 = vpop.eup %3916 }
 0x6b5   :  { %v3919_v40 = vpop.eup %3918  ;;  %v2503_v29 = vmul.f32 %v3917_v0, %v3915_v35 }
 0x6b6   :  { %v2502_v16 = vmul.f32 %v3919_v40, %v5929_v12  ;;  %v2548_v17 = vpop.f32.mrb[76].mxu0  ;;  %v2589_v27 = vpop.f32.mrb[76].mxu1 }
 0x6b7   :  { %v2596_v23 = vadd.f32 %v2548_v17, %v7437_v28  ;;  %v2598_v22 = vadd.f32 %v2589_v27, %v7438_v21  ;;  %v2550_v42 = vpop.f32.mrb[77].mxu0  ;;  %v2591_v19 = vpop.f32.mrb[77].mxu1 }
 0x6b8   :  { %v6293_v15 = vadd.f32 %v2503_v29, %v2502_v16  ;;  %v2597_v45 = vadd.f32 %v2550_v42, %v7439_v41  ;;  %v2599_v11 = vadd.f32 %v2591_v19, %v7440_v38  ;;  %v2552_v49 = vpop.f32.mrb[78].mxu0  ;;  %v2593_v13 = vpop.f32.mrb[78].mxu1  ;;  %v6319_v41 = vld [vmem:[%s6819_s4 + $0x2c] ss:$16 sps:$4 sm:$0xff]   ;;  %v6333_v38 = vld [vmem:[%s6819_s4 + $0x28] ss:$16 sps:$4 sm:$0xff]  }
 0x6b9   :  { %v3598_v6 = vmul.f32 -1.442695, %v2596_v23  ;;  %v2553_v35 = vpop.f32.mrb[79].mxu0  ;;  %v2594_v12 = vpop.f32.mrb[79].mxu1  ;;  %v6307_v23 = vld [vmem:[%s6819_s4 + $0x8] ss:$16 sps:$4 sm:$0xff]  }
 0x6ba   :  { %v3599_v0 = vmul.f32 -1.442695, %v2597_v45  ;;  %3922 = vtanh.f32 %v6293_v15  ;;  %v3600_v40 = vmul.f32 -1.442695, %v2599_v11  ;;  %v3921_v17 = vpop.eup %3920  ;;  %v6327_v45 = vld [vmem:[%s6819_s4 + $0x20] ss:$16 sps:$4 sm:$0xff]  }
 0x6bb   :  { %3924 = vpow2.f32 %v3598_v6  ;;  %v6339_v11 = vld [vmem:[%s6819_s4 + $0x44] ss:$16 sps:$4 sm:$0xff]   ;;  %v6345_v49 = vld [vmem:[%s6819_s4 + $0x4c] ss:$16 sps:$4 sm:$0xff]   ;;  %v6351_v12 = vld [vmem:[%s6819_s4 + $0x40] ss:$16 sps:$4 sm:$0xff]  }
 0x6bc   :  { %3926 = vpow2.f32 %v3599_v0  ;;  %v6357_v0 = vld [vmem:[%s6819_s4 + $0x48] ss:$16 sps:$4 sm:$0xff]  }
 0x6bd   :  { %3928 = vpow2.f32 %v3600_v40 }
 0x6be   :  { %3930 = vtanh.f32 %v2598_v22  ;;  %v6313_v22 = vld [vmem:[%s6819_s4 + $0x24] ss:$16 sps:$4 sm:$0xff]  }
 0x6c4   :  { %v3923_v27 = vpop.eup %3922 }
 0x6c5   :  { %v3925_v29 = vpop.eup %3924  ;;  %v2506_v16 = vmul.f32 %v3923_v27, %v3921_v17 }
 0x6c6   :  { %v3927_v28 = vpop.eup %3926  ;;  %v2603_v21 = vadd.f32 1.0, %v3925_v29  ;;  %v6363_v29 = vld [vmem:[%s6819_s4 + $0x64] ss:$16 sps:$4 sm:$0xff]  }
 0x6c7   :  { %v2609_v42 = vadd.f32 1.0, %v3927_v28  ;;  %v2625_v19 = vpack.c.bf16 %v2506_v16, %v2506_v16  ;;  %v3929_v13 = vpop.eup %3928  ;;  %v6369_v16 = vld [vmem:[%s6819_s4 + $0x6c] ss:$16 sps:$4 sm:$0xff]  }
 0x6c8   :  { %3932 = vrcp.f32 %v2603_v21  ;;  %v3931_v6 = vpop.eup %3930  ;;  %v2616_v27 = vadd.f32 1.0, %v3929_v13  ;;  %v6396_v13 = vld [vmem:[%s6819_s4 + $0x8c] ss:$16 sps:$4 sm:$0xff]  }
 0x6c9   :  { %3934 = vrcp.f32 %v2609_v42  ;;  %2659 = vmatmul.mubr.bf16.vlgmr.msra.gmra.mrb[80].mxu0 %v2625_v19  ;;  %2700 = vmatmul.mubr.bf16.vlgmr.msra.gmra.mrb[80].mxu1 %v2625_v19  ;;  %v6378_v42 = vld [vmem:[%s6819_s4 + $0x60] ss:$16 sps:$4 sm:$0xff]   ;;  %v6384_v19 = vld [vmem:[%s6819_s4 + $0x68] ss:$16 sps:$4 sm:$0xff]   ;;  %7441 = vst [vmem:[#allocation14_spill] sm:$0xff] %v6396_v13 }
 0x6ca   :  { %2709 = vmatpush1.bf16.msra.mxu0 %v6301_v18  ;;  %2750 = vmatpush1.bf16.msra.mxu1 %v6307_v23  ;;  %3936 = vrcp.f32 %v2616_v27  ;;  %v6427_v27 = vld [vmem:[%s6819_s4 + $0xa0] ss:$16 sps:$4 sm:$0xff]  }
 0x6cb   :  { %2710 = vmatprep.subr.bf16.mxu0 %v6313_v22  ;;  %2751 = vmatprep.subr.bf16.mxu1 %v6319_v41  ;;  %7446 = vst [vmem:[#allocation19_spill] sm:$0xff] %v6427_v27 }
 0x6cc   :  { %2740 = vmatprep.mubr.bf16.mxu0 %v7120_v20  ;;  %2781 = vmatprep.mubr.bf16.mxu1 %v7120_v20 }
 0x6ce   :  { %2711 = vmatpush1.bf16.msra.mxu0 %v6327_v45  ;;  %2752 = vmatpush1.bf16.msra.mxu1 %v6333_v38 }
 0x6cf   :  { %2712 = vmatprep.subr.bf16.mxu0 %v6339_v11  ;;  %2753 = vmatprep.subr.bf16.mxu1 %v6345_v49 }
 0x6d2   :  { %v3933_v35 = vpop.eup %3932  ;;  %2713 = vmatpush1.bf16.msra.mxu0 %v6351_v12  ;;  %2754 = vmatpush1.bf16.msra.mxu1 %v6357_v0 }
 0x6d3   :  { %v3935_v40 = vpop.eup %3934  ;;  %v2620_v17 = vmul.f32 %v3933_v35, %v3931_v6  ;;  %2714 = vmatprep.subr.bf16.mxu0 %v6363_v29  ;;  %2755 = vmatprep.subr.bf16.mxu1 %v6369_v16  ;;  %v6403_v6 = vld [vmem:[%s6819_s4 + $0x80] ss:$16 sps:$4 sm:$0xff]   ;;  %v6409_v35 = vld [vmem:[%s6819_s4 + $0x88] ss:$16 sps:$4 sm:$0xff]  }
 0x6d4   :  { %v2619_v28 = vmul.f32 %v3935_v40, %v5949_v36  ;;  %v6390_v36 = vld [vmem:[%s6819_s4 + $0x84] ss:$16 sps:$4 sm:$0xff]   ;;  %7442 = vst [vmem:[#allocation15_spill] sm:$0xff] %v6403_v6  ;;  %7443 = vst [vmem:[#allocation16_spill] sm:$0xff] %v6409_v35 }
 0x6d5   :  { %v6415_v40 = vld [vmem:[%s6819_s4 + $0xa4] ss:$16 sps:$4 sm:$0xff]  }
 0x6d6   :  { %v6373_v21 = vadd.f32 %v2620_v17, %v2619_v28  ;;  %2715 = vmatpush1.bf16.msra.mxu0 %v6378_v42  ;;  %2756 = vmatpush1.bf16.msra.mxu1 %v6384_v19  ;;  %7444 = vst [vmem:[#allocation17_spill] sm:$0xff] %v6415_v40  ;;  %v6421_v17 = vld [vmem:[%s6819_s4 + $0xac] ss:$16 sps:$4 sm:$0xff]   ;;  %v6433_v28 = vld [vmem:[%s6819_s4 + $0xa8] ss:$16 sps:$4 sm:$0xff]  }
 0x6d7   :  { %2716 = vmatprep.subr.bf16.mxu0 %v6390_v36  ;;  %2757 = vmatprep.subr.bf16.mxu1 %v6396_v13  ;;  %7445 = vst [vmem:[#allocation18_spill] sm:$0xff] %v6421_v17  ;;  %7447 = vst [vmem:[#allocation20_spill] sm:$0xff] %v6433_v28 }
 0x6d8   :  { %3938 = vtanh.f32 %v6373_v21 }
 0x6da   :  { %2717 = vmatpush1.bf16.msra.mxu0 %v6403_v6  ;;  %2758 = vmatpush1.bf16.msra.mxu1 %v6409_v35  ;;  %v6469_v6 = vld [vmem:[%s6819_s4 + $0xec] ss:$16 sps:$4 sm:$0xff]  }
 0x6db   :  { %2718 = vmatprep.subr.bf16.mxu0 %v6415_v40  ;;  %2759 = vmatprep.subr.bf16.mxu1 %v6421_v17  ;;  %v6439_v40 = vld [vmem:[%s6819_s4 + $0xc4] ss:$16 sps:$4 sm:$0xff]   ;;  %v6445_v17 = vld [vmem:[%s6819_s4 + $0xcc] ss:$16 sps:$4 sm:$0xff]  }
 0x6dc   :  { %7448 = vst [vmem:[#allocation21_spill] sm:$0xff] %v6439_v40  ;;  %7449 = vst [vmem:[#allocation22_spill] sm:$0xff] %v6445_v17 }
 0x6de   :  { %2719 = vmatpush1.bf16.msra.mxu0 %v6427_v27  ;;  %2760 = vmatpush1.bf16.msra.mxu1 %v6433_v28  ;;  %v3937_v27 = vpop.eup %3936  ;;  %v6451_v28 = vld [vmem:[%s6819_s4 + $0xc0] ss:$16 sps:$4 sm:$0xff]  }
 0x6df   :  { %2720 = vmatprep.subr.bf16.mxu0 %v6439_v40  ;;  %2761 = vmatprep.subr.bf16.mxu1 %v6445_v17  ;;  %7450 = vst [vmem:[#allocation23_spill] sm:$0xff] %v6451_v28  ;;  %v6457_v40 = vld [vmem:[%s6819_s4 + $0xc8] ss:$16 sps:$4 sm:$0xff]   ;;  %v6463_v17 = vld [vmem:[%s6819_s4 + $0xe4] ss:$16 sps:$4 sm:$0xff]  }
 0x6e0   :  { %7451 = vst [vmem:[#allocation24_spill] sm:$0xff] %v6457_v40  ;;  %7452 = vst [vmem:[#allocation25_spill] sm:$0xff] %v6463_v17 }
 0x6e2   :  { %v3939_v35 = vpop.eup %3938  ;;  %2721 = vmatpush1.bf16.msra.mxu0 %v6451_v28  ;;  %2762 = vmatpush1.bf16.msra.mxu1 %v6457_v40  ;;  %v6475_v40 = vld [vmem:[%s6819_s4 + $0xe0] ss:$16 sps:$4 sm:$0xff]  }
 0x6e3   :  { %2722 = vmatprep.subr.bf16.mxu0 %v6463_v17  ;;  %2763 = vmatprep.subr.bf16.mxu1 %v6469_v6  ;;  %v2623_v28 = vmul.f32 %v3939_v35, %v3937_v27  ;;  %v6481_v17 = vld [vmem:[%s6819_s4 + $0xe8] ss:$16 sps:$4 sm:$0xff]   ;;  %v7453_v35 = vld [vmem:[#allocation39_spill] sm:$0xff] }
 0x6e4   :  { %v7454_v27 = vld [vmem:[#allocation40_spill] sm:$0xff] }
 0x6e5   :  { %v2624_v13 = vpack.c.bf16 %v2623_v28, %v2623_v28  ;;  %v7455_v28 = vld [vmem:[#allocation3_spill] sm:$0xff] }
 0x6e6   :  { %2723 = vmatpush1.bf16.msra.mxu0 %v6475_v40  ;;  %2764 = vmatpush1.bf16.msra.mxu1 %v6481_v17 }
 0x6e7   :  { %2825 = vmatprep.subr.bf16.mxu0 %v5975_v8  ;;  %2866 = vmatprep.subr.bf16.mxu1 %v5981_v43 }
 0x6e9   :  { %2741 = vmatmul.mubr.bf16.vlgmr.msra.gmra.mrb[84].mxu0 %v2624_v13  ;;  %2782 = vmatmul.mubr.bf16.vlgmr.msra.gmra.mrb[84].mxu1 %v2624_v13 }
 0x6ea   :  { %2826 = vmatpush1.bf16.msra.mxu0 %v5989_v24  ;;  %2867 = vmatpush1.bf16.msra.mxu1 %v5995_v26 }
 0x6eb   :  { %2827 = vmatprep.subr.bf16.mxu0 %v6001_v10  ;;  %2868 = vmatprep.subr.bf16.mxu1 %v6007_v57 }
 0x6ec   :  { %2857 = vmatprep.mubr.bf16.mxu0 %v7120_v20  ;;  %2898 = vmatprep.mubr.bf16.mxu1 %v7120_v20 }
 0x6ee   :  { %2828 = vmatpush1.bf16.msra.mxu0 %v6015_v39  ;;  %2869 = vmatpush1.bf16.msra.mxu1 %v6021_v44 }
 0x6ef   :  { %2829 = vmatprep.subr.bf16.mxu0 %v6027_v54  ;;  %2870 = vmatprep.subr.bf16.mxu1 %v6033_v59 }
 0x6f2   :  { %2830 = vmatpush1.bf16.msra.mxu0 %v6039_v63  ;;  %2871 = vmatpush1.bf16.msra.mxu1 %v6045_v61 }
 0x6f3   :  { %2831 = vmatprep.subr.bf16.mxu0 %v6051_v34  ;;  %2872 = vmatprep.subr.bf16.mxu1 %v6057_v48 }
 0x6f6   :  { %2832 = vmatpush1.bf16.msra.mxu0 %v6063_v4  ;;  %2873 = vmatpush1.bf16.msra.mxu1 %v6069_v2 }
 0x6f7   :  { %2833 = vmatprep.subr.bf16.mxu0 %v6075_v3  ;;  %2874 = vmatprep.subr.bf16.mxu1 %v6081_v9 }
 0x6fa   :  { %2834 = vmatpush1.bf16.msra.mxu0 %v6087_v46  ;;  %2875 = vmatpush1.bf16.msra.mxu1 %v6093_v47 }
 0x6fb   :  { %2835 = vmatprep.subr.bf16.mxu0 %v6099_v56  ;;  %2876 = vmatprep.subr.bf16.mxu1 %v6105_v14 }
 0x6fe   :  { %2836 = vmatpush1.bf16.msra.mxu0 %v6111_v1  ;;  %2877 = vmatpush1.bf16.msra.mxu1 %v6117_v52 }
 0x6ff   :  { %2837 = vmatprep.subr.bf16.mxu0 %v6123_v25  ;;  %2878 = vmatprep.subr.bf16.mxu1 %v6129_v50 }
 0x702   :  { %2838 = vmatpush1.bf16.msra.mxu0 %v6135_v5  ;;  %2879 = vmatpush1.bf16.msra.mxu1 %v6141_v33 }
 0x703   :  { %2839 = vmatprep.subr.bf16.mxu0 %v6147_v31  ;;  %2880 = vmatprep.subr.bf16.mxu1 %v6153_v32  ;;  %v7465_v32 = vld [vmem:[#allocation13_spill] sm:$0xff] }
 0x706   :  { %2840 = vmatpush1.bf16.msra.mxu0 %v6159_v30  ;;  %2881 = vmatpush1.bf16.msra.mxu1 %v6165_v37  ;;  %v7456_v30 = vld [vmem:[#allocation4_spill] sm:$0xff]  ;;  %v7457_v37 = vld [vmem:[#allocation5_spill] sm:$0xff] }
 0x707   :  { %2937 = vmatprep.subr.bf16.mxu0 %v6171_v51  ;;  %2978 = vmatprep.subr.bf16.mxu1 %v6177_v7  ;;  %v7458_v51 = vld [vmem:[#allocation6_spill] sm:$0xff]  ;;  %v7459_v7 = vld [vmem:[#allocation7_spill] sm:$0xff] }
 0x709   :  { %2858 = vmatmul.mubr.bf16.vlgmr.msra.gmra.mrb[88].mxu0 %v2624_v13  ;;  %2899 = vmatmul.mubr.bf16.vlgmr.msra.gmra.mrb[88].mxu1 %v2624_v13  ;;  %v7460_v13 = vld [vmem:[#allocation8_spill] sm:$0xff] }
 0x70a   :  { %2938 = vmatpush1.bf16.msra.mxu0 %v6185_v62  ;;  %2979 = vmatpush1.bf16.msra.mxu1 %v7453_v35  ;;  %v7461_v62 = vld [vmem:[#allocation9_spill] sm:$0xff]  ;;  %v7462_v35 = vld [vmem:[#allocation10_spill] sm:$0xff] }
 0x70b   :  { %2939 = vmatprep.subr.bf16.mxu0 %v7454_v27  ;;  %2980 = vmatprep.subr.bf16.mxu1 %v7455_v28  ;;  %v7463_v27 = vld [vmem:[#allocation11_spill] sm:$0xff]  ;;  %v7464_v28 = vld [vmem:[#allocation12_spill] sm:$0xff] }
 0x70c   :  { %2969 = vmatprep.mubr.bf16.mxu0 %v7120_v20  ;;  %3010 = vmatprep.mubr.bf16.mxu1 %v7120_v20 }
 0x70e   :  { %2940 = vmatpush1.bf16.msra.mxu0 %v7456_v30  ;;  %2981 = vmatpush1.bf16.msra.mxu1 %v7457_v37  ;;  %v6539_v37 = vld [vmem:[%s6818_s5 + $0x84] ss:$16 sps:$4 sm:$0xff]  }
 0x70f   :  { %2941 = vmatprep.subr.bf16.mxu0 %v7458_v51  ;;  %2982 = vmatprep.subr.bf16.mxu1 %v7459_v7  ;;  %7466 = vst [vmem:[#allocation26_spill] sm:$0xff] %v6539_v37 }
 0x712   :  { %2942 = vmatpush1.bf16.msra.mxu0 %v7460_v13  ;;  %2983 = vmatpush1.bf16.msra.mxu1 %v7461_v62  ;;  %v6545_v13 = vld [vmem:[%s6818_s5 + $0x8c] ss:$16 sps:$4 sm:$0xff]  }
 0x713   :  { %2943 = vmatprep.subr.bf16.mxu0 %v7462_v35  ;;  %2984 = vmatprep.subr.bf16.mxu1 %v7463_v27  ;;  %7467 = vst [vmem:[#allocation27_spill] sm:$0xff] %v6545_v13 }
 0x716   :  { %2944 = vmatpush1.bf16.msra.mxu0 %v7464_v28  ;;  %2985 = vmatpush1.bf16.msra.mxu1 %v7465_v32  ;;  %v6551_v28 = vld [vmem:[%s6818_s5 + $0x80] ss:$16 sps:$4 sm:$0xff]   ;;  %v6557_v32 = vld [vmem:[%s6818_s5 + $0x88] ss:$16 sps:$4 sm:$0xff]  }
 0x717   :  { %2945 = vmatprep.subr.bf16.mxu0 %v6539_v37  ;;  %2986 = vmatprep.subr.bf16.mxu1 %v6545_v13  ;;  %7468 = vst [vmem:[#allocation28_spill] sm:$0xff] %v6551_v28  ;;  %7469 = vst [vmem:[#allocation59_spill] sm:$0xff] %v6557_v32  ;;  %v6563_v37 = vld [vmem:[%s6818_s5 + $0xa4] ss:$16 sps:$4 sm:$0xff]   ;;  %v6569_v13 = vld [vmem:[%s6818_s5 + $0xac] ss:$16 sps:$4 sm:$0xff]  }
 0x718   :  { %7470 = vst [vmem:[#allocation60_spill] sm:$0xff] %v6563_v37  ;;  %7471 = vst [vmem:[#allocation61_spill] sm:$0xff] %v6569_v13 }
 0x71a   :  { %2946 = vmatpush1.bf16.msra.mxu0 %v6551_v28  ;;  %2987 = vmatpush1.bf16.msra.mxu1 %v6557_v32  ;;  %v6575_v28 = vld [vmem:[%s6818_s5 + $0xa0] ss:$16 sps:$4 sm:$0xff]   ;;  %v6581_v32 = vld [vmem:[%s6818_s5 + $0xa8] ss:$16 sps:$4 sm:$0xff]  }
 0x71b   :  { %2947 = vmatprep.subr.bf16.mxu0 %v6563_v37  ;;  %2988 = vmatprep.subr.bf16.mxu1 %v6569_v13  ;;  %7472 = vst [vmem:[#allocation62_spill] sm:$0xff] %v6575_v28  ;;  %7473 = vst [vmem:[#allocation63_spill] sm:$0xff] %v6581_v32  ;;  %v6587_v37 = vld [vmem:[%s6818_s5 + $0xc4] ss:$16 sps:$4 sm:$0xff]   ;;  %v6593_v13 = vld [vmem:[%s6818_s5 + $0xcc] ss:$16 sps:$4 sm:$0xff]  }
 0x71c   :  { %7474 = vst [vmem:[#allocation41_spill] sm:$0xff] %v6587_v37  ;;  %7475 = vst [vmem:[#allocation42_spill] sm:$0xff] %v6593_v13 }
 0x71e   :  { %2948 = vmatpush1.bf16.msra.mxu0 %v6575_v28  ;;  %2989 = vmatpush1.bf16.msra.mxu1 %v6581_v32  ;;  %v6599_v28 = vld [vmem:[%s6818_s5 + $0xc0] ss:$16 sps:$4 sm:$0xff]   ;;  %v6605_v32 = vld [vmem:[%s6818_s5 + $0xc8] ss:$16 sps:$4 sm:$0xff]  }
 0x71f   :  { %2949 = vmatprep.subr.bf16.mxu0 %v6587_v37  ;;  %2990 = vmatprep.subr.bf16.mxu1 %v6593_v13  ;;  %7476 = vst [vmem:[#allocation43_spill] sm:$0xff] %v6599_v28  ;;  %7477 = vst [vmem:[#allocation44_spill] sm:$0xff] %v6605_v32  ;;  %v6611_v37 = vld [vmem:[%s6818_s5 + $0xe4] ss:$16 sps:$4 sm:$0xff]   ;;  %v6617_v13 = vld [vmem:[%s6818_s5 + $0xec] ss:$16 sps:$4 sm:$0xff]  }
 0x720   :  { %7478 = vst [vmem:[#allocation45_spill] sm:$0xff] %v6611_v37  ;;  %7479 = vst [vmem:[#allocation72_spill] sm:$0xff] %v6617_v13 }
 0x722   :  { %2950 = vmatpush1.bf16.msra.mxu0 %v6599_v28  ;;  %2991 = vmatpush1.bf16.msra.mxu1 %v6605_v32  ;;  %v6623_v28 = vld [vmem:[%s6818_s5 + $0xe0] ss:$16 sps:$4 sm:$0xff]   ;;  %v6629_v32 = vld [vmem:[%s6818_s5 + $0xe8] ss:$16 sps:$4 sm:$0xff]  }
 0x723   :  { %2951 = vmatprep.subr.bf16.mxu0 %v6611_v37  ;;  %2992 = vmatprep.subr.bf16.mxu1 %v6617_v13  ;;  %7480 = vst [vmem:[#allocation73_spill] sm:$0xff] %v6623_v28  ;;  %7481 = vst [vmem:[#allocation74_spill] sm:$0xff] %v6629_v32  ;;  %v6635_v37 = vld [vmem:[%s6819_s4 + $0x4] ss:$16 sps:$4 sm:$0xff]   ;;  %v6641_v13 = vld [vmem:[%s6819_s4 + $0xc] ss:$16 sps:$4 sm:$0xff]  }
 0x724   :  { %7482 = vst [vmem:[#allocation75_spill] sm:$0xff] %v6635_v37  ;;  %7483 = vst [vmem:[#allocation46_spill] sm:$0xff] %v6641_v13 }
 0x726   :  { %2952 = vmatpush1.bf16.msra.mxu0 %v6623_v28  ;;  %2993 = vmatpush1.bf16.msra.mxu1 %v6629_v32 }
 0x727   :  { %3019 = vmatprep.subr.bf16.mxu0 %v6635_v37  ;;  %3060 = vmatprep.subr.bf16.mxu1 %v6641_v13 }
 0x79c   :  { %v2660_v28 = vpop.f32.mrb[80].mxu0  ;;  %v2701_v27 = vpop.f32.mrb[80].mxu1 }
 0x79d   :  { %v2662_v35 = vpop.f32.mrb[81].mxu0  ;;  %v2703_v62 = vpop.f32.mrb[81].mxu1 }
 0x79e   :  { %v2664_v7 = vpop.f32.mrb[82].mxu0  ;;  %v2705_v32 = vpop.f32.mrb[82].mxu1 }
 0x79f   :  { %v2665_v51 = vpop.f32.mrb[83].mxu0  ;;  %v2706_v30 = vpop.f32.mrb[83].mxu1 }
 0x7bc   :  { %v2742_v31 = vpop.f32.mrb[84].mxu0  ;;  %v2783_v33 = vpop.f32.mrb[84].mxu1 }
 0x7bd   :  { %v2743_v5 = vadd.f32 %v2742_v31, %v2660_v28  ;;  %v2784_v50 = vadd.f32 %v2783_v33, %v2701_v27  ;;  %v2744_v37 = vpop.f32.mrb[85].mxu0  ;;  %v2785_v25 = vpop.f32.mrb[85].mxu1  ;;  %v7484_v27 = vld [vmem:[#allocation80_spill] sm:$0xff]  ;;  %v7485_v28 = vld [vmem:[#allocation81_spill] sm:$0xff] }
 0x7be   :  { %v2745_v52 = vadd.f32 %v2744_v37, %v2662_v35  ;;  %v2786_v1 = vadd.f32 %v2785_v25, %v2703_v62  ;;  %v2746_v14 = vpop.f32.mrb[86].mxu0  ;;  %v2787_v56 = vpop.f32.mrb[86].mxu1 }
 0x7bf   :  { %v2790_v13 = vadd.f32 %v2743_v5, %v5069_v53  ;;  %v2747_v47 = vpop.f32.mrb[87].mxu0  ;;  %v2788_v46 = vpop.f32.mrb[87].mxu1  ;;  %v2792_v33 = vadd.f32 %v2784_v50, %v5084_v55 }
 0x7c0   :  { %v2791_v9 = vadd.f32 %v2745_v52, %v5073_v58  ;;  %v2793_v30 = vadd.f32 %v2786_v1, %v5079_v60 }
 0x7c1   :  { %v3601_v7 = vmul.f32 -1.442695, %v2790_v13 }
 0x7c2   :  { %v3602_v32 = vmul.f32 -1.442695, %v2791_v9  ;;  %v3603_v31 = vmul.f32 -1.442695, %v2793_v30 }
 0x7c3   :  { %3940 = vpow2.f32 %v3601_v7 }
 0x7c4   :  { %3942 = vpow2.f32 %v3602_v32 }
 0x7c5   :  { %3944 = vpow2.f32 %v3603_v31  ;;  %v7486_v31 = vld [vmem:[#allocation82_spill] sm:$0xff] }
 0x7c6   :  { %3946 = vtanh.f32 %v2792_v33 }
 0x7cd   :  { %v3941_v51 = vpop.eup %3940 }
 0x7ce   :  { %v3943_v37 = vpop.eup %3942  ;;  %v2797_v25 = vadd.f32 1.0, %v3941_v51  ;;  %v7487_v51 = vld [vmem:[#allocation83_spill] sm:$0xff] }
 0x7cf   :  { %v2803_v56 = vadd.f32 1.0, %v3943_v37  ;;  %v3945_v46 = vpop.eup %3944 }
 0x7d0   :  { %3948 = vrcp.f32 %v2797_v25  ;;  %v3947_v47 = vpop.eup %3946  ;;  %v2810_v5 = vadd.f32 1.0, %v3945_v46 }
 0x7d1   :  { %3950 = vrcp.f32 %v2803_v56 }
 0x7d2   :  { %3952 = vrcp.f32 %v2810_v5 }
 0x7da   :  { %v3949_v14 = vpop.eup %3948 }
 0x7db   :  { %v3951_v52 = vpop.eup %3950  ;;  %v2814_v9 = vmul.f32 %v3949_v14, %v3947_v47 }
 0x7dc   :  { %v2813_v62 = vmul.f32 %v3951_v52, %v6293_v15  ;;  %v2859_v1 = vpop.f32.mrb[88].mxu0  ;;  %v2900_v35 = vpop.f32.mrb[88].mxu1 }
 0x7dd   :  { %v2907_v50 = vadd.f32 %v2859_v1, %v7484_v27  ;;  %v2909_v13 = vadd.f32 %v2900_v35, %v7485_v28  ;;  %v2861_v7 = vpop.f32.mrb[89].mxu0  ;;  %v2902_v32 = vpop.f32.mrb[89].mxu1 }
 0x7de   :  { %v6651_v30 = vadd.f32 %v2814_v9, %v2813_v62  ;;  %v2908_v33 = vadd.f32 %v2861_v7, %v7486_v31  ;;  %v2910_v37 = vadd.f32 %v2902_v32, %v7487_v51  ;;  %v2863_v25 = vpop.f32.mrb[90].mxu0  ;;  %v2904_v56 = vpop.f32.mrb[90].mxu1 }
 0x7df   :  { %v3604_v46 = vmul.f32 -1.442695, %v2907_v50  ;;  %v2864_v47 = vpop.f32.mrb[91].mxu0  ;;  %v2905_v15 = vpop.f32.mrb[91].mxu1  ;;  %v7488_v56 = vld [vmem:[#allocation14_spill] sm:$0xff] }
 0x7e0   :  { %v3605_v14 = vmul.f32 -1.442695, %v2908_v33  ;;  %3954 = vtanh.f32 %v6651_v30  ;;  %v3606_v52 = vmul.f32 -1.442695, %v2910_v37  ;;  %v3953_v1 = vpop.eup %3952  ;;  %v7490_v47 = vld [vmem:[#allocation16_spill] sm:$0xff]  ;;  %v7491_v15 = vld [vmem:[#allocation17_spill] sm:$0xff] }
 0x7e1   :  { %3956 = vpow2.f32 %v3604_v46  ;;  %v7489_v46 = vld [vmem:[#allocation15_spill] sm:$0xff] }
 0x7e2   :  { %3958 = vpow2.f32 %v3605_v14  ;;  %v7493_v14 = vld [vmem:[#allocation19_spill] sm:$0xff] }
 0x7e3   :  { %3960 = vpow2.f32 %v3606_v52  ;;  %v7494_v52 = vld [vmem:[#allocation20_spill] sm:$0xff] }
 0x7e4   :  { %3962 = vtanh.f32 %v2909_v13 }
 0x7ea   :  { %v3955_v35 = vpop.eup %3954 }
 0x7eb   :  { %v3957_v9 = vpop.eup %3956  ;;  %v2817_v62 = vmul.f32 %v3955_v35, %v3953_v1  ;;  %v7495_v1 = vld [vmem:[#allocation21_spill] sm:$0xff]  ;;  %v7496_v35 = vld [vmem:[#allocation22_spill] sm:$0xff] }
 0x7ec   :  { %v3959_v27 = vpop.eup %3958  ;;  %v2914_v28 = vadd.f32 1.0, %v3957_v9 }
 0x7ed   :  { %v2920_v7 = vadd.f32 1.0, %v3959_v27  ;;  %v2936_v32 = vpack.c.bf16 %v2817_v62, %v2817_v62  ;;  %v3961_v5 = vpop.eup %3960  ;;  %v7497_v27 = vld [vmem:[#allocation23_spill] sm:$0xff] }
 0x7ee   :  { %3964 = vrcp.f32 %v2914_v28  ;;  %v3963_v50 = vpop.eup %3962  ;;  %v2927_v51 = vadd.f32 1.0, %v3961_v5  ;;  %v7498_v28 = vld [vmem:[#allocation24_spill] sm:$0xff] }
 0x7ef   :  { %3966 = vrcp.f32 %v2920_v7  ;;  %2970 = vmatmul.mubr.bf16.vlgmr.msra.gmra.mrb[92].mxu0 %v2936_v32  ;;  %3011 = vmatmul.mubr.bf16.vlgmr.msra.gmra.mrb[92].mxu1 %v2936_v32  ;;  %v7499_v7 = vld [vmem:[#allocation25_spill] sm:$0xff] }
 0x7f0   :  { %3020 = vmatpush1.bf16.msra.mxu0 %v6301_v18  ;;  %3061 = vmatpush1.bf16.msra.mxu1 %v6307_v23  ;;  %3968 = vrcp.f32 %v2927_v51  ;;  %v7521_v51 = vld [vmem:[#allocation4_spill] sm:$0xff] }
 0x7f1   :  { %3021 = vmatprep.subr.bf16.mxu0 %v6313_v22  ;;  %3062 = vmatprep.subr.bf16.mxu1 %v6319_v41 }
 0x7f2   :  { %3051 = vmatprep.mubr.bf16.mxu0 %v7120_v20  ;;  %3092 = vmatprep.mubr.bf16.mxu1 %v7120_v20 }
 0x7f4   :  { %3022 = vmatpush1.bf16.msra.mxu0 %v6327_v45  ;;  %3063 = vmatpush1.bf16.msra.mxu1 %v6333_v38 }
 0x7f5   :  { %3023 = vmatprep.subr.bf16.mxu0 %v6339_v11  ;;  %3064 = vmatprep.subr.bf16.mxu1 %v6345_v49 }
 0x7f8   :  { %v3965_v13 = vpop.eup %3964  ;;  %3024 = vmatpush1.bf16.msra.mxu0 %v6351_v12  ;;  %3065 = vmatpush1.bf16.msra.mxu1 %v6357_v0 }
 0x7f9   :  { %v3967_v31 = vpop.eup %3966  ;;  %v2931_v33 = vmul.f32 %v3965_v13, %v3963_v50  ;;  %3025 = vmatprep.subr.bf16.mxu0 %v6363_v29  ;;  %3066 = vmatprep.subr.bf16.mxu1 %v6369_v16  ;;  %v7517_v50 = vld [vmem:[#allocation38_spill] sm:$0xff]  ;;  %v7518_v13 = vld [vmem:[#allocation39_spill] sm:$0xff] }
 0x7fa   :  { %v2930_v37 = vmul.f32 %v3967_v31, %v6373_v21  ;;  %v7492_v21 = vld [vmem:[#allocation18_spill] sm:$0xff]  ;;  %v3969_v9 = vpop.eup %3968  ;;  %v7519_v31 = vld [vmem:[#allocation40_spill] sm:$0xff] }
 0x7fc   :  { %v6671_v25 = vadd.f32 %v2931_v33, %v2930_v37  ;;  %3026 = vmatpush1.bf16.msra.mxu0 %v6378_v42  ;;  %3067 = vmatpush1.bf16.msra.mxu1 %v6384_v19  ;;  %v7520_v33 = vld [vmem:[#allocation3_spill] sm:$0xff]  ;;  %v7522_v37 = vld [vmem:[#allocation5_spill] sm:$0xff] }
 0x7fd   :  { %3027 = vmatprep.subr.bf16.mxu0 %v6390_v36  ;;  %3068 = vmatprep.subr.bf16.mxu1 %v7488_v56 }
 0x7fe   :  { %3970 = vtanh.f32 %v6671_v25 }
 0x800   :  { %3028 = vmatpush1.bf16.msra.mxu0 %v7489_v46  ;;  %3069 = vmatpush1.bf16.msra.mxu1 %v7490_v47 }
 0x801   :  { %3029 = vmatprep.subr.bf16.mxu0 %v7491_v15  ;;  %3070 = vmatprep.subr.bf16.mxu1 %v7492_v21 }
 0x804   :  { %3030 = vmatpush1.bf16.msra.mxu0 %v7493_v14  ;;  %3071 = vmatpush1.bf16.msra.mxu1 %v7494_v52 }
 0x805   :  { %3031 = vmatprep.subr.bf16.mxu0 %v7495_v1  ;;  %3072 = vmatprep.subr.bf16.mxu1 %v7496_v35 }
 0x808   :  { %v3971_v62 = vpop.eup %3970  ;;  %3032 = vmatpush1.bf16.msra.mxu0 %v7497_v27  ;;  %3073 = vmatpush1.bf16.msra.mxu1 %v7498_v28 }
 0x809   :  { %3033 = vmatprep.subr.bf16.mxu0 %v7499_v7  ;;  %3074 = vmatprep.subr.bf16.mxu1 %v6469_v6  ;;  %v2934_v32 = vmul.f32 %v3971_v62, %v3969_v9  ;;  %v7523_v9 = vld [vmem:[#allocation6_spill] sm:$0xff]  ;;  %v7524_v62 = vld [vmem:[#allocation7_spill] sm:$0xff] }
 0x80b   :  { %v2935_v5 = vpack.c.bf16 %v2934_v32, %v2934_v32  ;;  %v7525_v32 = vld [vmem:[#allocation8_spill] sm:$0xff] }
 0x80c   :  { %3034 = vmatpush1.bf16.msra.mxu0 %v6475_v40  ;;  %3075 = vmatpush1.bf16.msra.mxu1 %v6481_v17 }
 0x80d   :  { %3136 = vmatprep.subr.bf16.mxu0 %v5975_v8  ;;  %3177 = vmatprep.subr.bf16.mxu1 %v5981_v43  ;;  %v7500_v8 = vld [vmem:[#allocation64_spill] sm:$0xff]  ;;  %v7501_v43 = vld [vmem:[#allocation65_spill] sm:$0xff] }
 0x80f   :  { %3052 = vmatmul.mubr.bf16.vlgmr.msra.gmra.mrb[96].mxu0 %v2935_v5  ;;  %3093 = vmatmul.mubr.bf16.vlgmr.msra.gmra.mrb[96].mxu1 %v2935_v5 }
 0x810   :  { %3137 = vmatpush1.bf16.msra.mxu0 %v5989_v24  ;;  %3178 = vmatpush1.bf16.msra.mxu1 %v5995_v26  ;;  %v7502_v24 = vld [vmem:[#allocation66_spill] sm:$0xff]  ;;  %v7503_v26 = vld [vmem:[#allocation67_spill] sm:$0xff] }
 0x811   :  { %3138 = vmatprep.subr.bf16.mxu0 %v6001_v10  ;;  %3179 = vmatprep.subr.bf16.mxu1 %v6007_v57  ;;  %v7504_v10 = vld [vmem:[#allocation68_spill] sm:$0xff]  ;;  %v7505_v57 = vld [vmem:[#allocation69_spill] sm:$0xff] }
 0x812   :  { %3168 = vmatprep.mubr.bf16.mxu0 %v7120_v20  ;;  %3209 = vmatprep.mubr.bf16.mxu1 %v7120_v20 }
 0x814   :  { %3139 = vmatpush1.bf16.msra.mxu0 %v6015_v39  ;;  %3180 = vmatpush1.bf16.msra.mxu1 %v6021_v44  ;;  %v7506_v39 = vld [vmem:[#allocation70_spill] sm:$0xff]  ;;  %v7507_v44 = vld [vmem:[#allocation71_spill] sm:$0xff] }
 0x815   :  { %3140 = vmatprep.subr.bf16.mxu0 %v6027_v54  ;;  %3181 = vmatprep.subr.bf16.mxu1 %v6033_v59  ;;  %v7508_v54 = vld [vmem:[#allocation29_spill] sm:$0xff]  ;;  %v7509_v59 = vld [vmem:[#allocation30_spill] sm:$0xff] }
 0x818   :  { %3141 = vmatpush1.bf16.msra.mxu0 %v6039_v63  ;;  %3182 = vmatpush1.bf16.msra.mxu1 %v6045_v61  ;;  %v7510_v63 = vld [vmem:[#allocation31_spill] sm:$0xff]  ;;  %v7511_v61 = vld [vmem:[#allocation32_spill] sm:$0xff] }
 0x819   :  { %3142 = vmatprep.subr.bf16.mxu0 %v6051_v34  ;;  %3183 = vmatprep.subr.bf16.mxu1 %v6057_v48  ;;  %v7512_v34 = vld [vmem:[#allocation33_spill] sm:$0xff]  ;;  %v7513_v48 = vld [vmem:[#allocation34_spill] sm:$0xff] }
 0x81c   :  { %3143 = vmatpush1.bf16.msra.mxu0 %v6063_v4  ;;  %3184 = vmatpush1.bf16.msra.mxu1 %v6069_v2  ;;  %v7514_v4 = vld [vmem:[#allocation35_spill] sm:$0xff]  ;;  %v7515_v2 = vld [vmem:[#allocation36_spill] sm:$0xff] }
 0x81d   :  { %3144 = vmatprep.subr.bf16.mxu0 %v6075_v3  ;;  %3185 = vmatprep.subr.bf16.mxu1 %v7500_v8  ;;  %v7516_v3 = vld [vmem:[#allocation37_spill] sm:$0xff]  ;;  %v7527_v8 = vld [vmem:[#allocation10_spill] sm:$0xff] }
 0x820   :  { %3145 = vmatpush1.bf16.msra.mxu0 %v7501_v43  ;;  %3186 = vmatpush1.bf16.msra.mxu1 %v7502_v24  ;;  %v7528_v43 = vld [vmem:[#allocation11_spill] sm:$0xff]  ;;  %v7529_v24 = vld [vmem:[#allocation12_spill] sm:$0xff] }
 0x821   :  { %3146 = vmatprep.subr.bf16.mxu0 %v7503_v26  ;;  %3187 = vmatprep.subr.bf16.mxu1 %v7504_v10  ;;  %v7530_v26 = vld [vmem:[#allocation13_spill] sm:$0xff]  ;;  %v7531_v10 = vld [vmem:[#allocation26_spill] sm:$0xff] }
 0x824   :  { %3147 = vmatpush1.bf16.msra.mxu0 %v7505_v57  ;;  %3188 = vmatpush1.bf16.msra.mxu1 %v7506_v39  ;;  %v7532_v57 = vld [vmem:[#allocation27_spill] sm:$0xff]  ;;  %v7533_v39 = vld [vmem:[#allocation28_spill] sm:$0xff] }
 0x825   :  { %3148 = vmatprep.subr.bf16.mxu0 %v7507_v44  ;;  %3189 = vmatprep.subr.bf16.mxu1 %v7508_v54  ;;  %v7534_v44 = vld [vmem:[#allocation59_spill] sm:$0xff]  ;;  %v7535_v54 = vld [vmem:[#allocation60_spill] sm:$0xff] }
 0x828   :  { %3149 = vmatpush1.bf16.msra.mxu0 %v7509_v59  ;;  %3190 = vmatpush1.bf16.msra.mxu1 %v7510_v63  ;;  %v7536_v59 = vld [vmem:[#allocation61_spill] sm:$0xff]  ;;  %v7537_v63 = vld [vmem:[#allocation62_spill] sm:$0xff] }
 0x829   :  { %3150 = vmatprep.subr.bf16.mxu0 %v7511_v61  ;;  %3191 = vmatprep.subr.bf16.mxu1 %v7512_v34  ;;  %v7538_v61 = vld [vmem:[#allocation63_spill] sm:$0xff]  ;;  %v7539_v34 = vld [vmem:[#allocation41_spill] sm:$0xff] }
 0x82c   :  { %3151 = vmatpush1.bf16.msra.mxu0 %v7513_v48  ;;  %3192 = vmatpush1.bf16.msra.mxu1 %v7514_v4  ;;  %v7540_v48 = vld [vmem:[#allocation42_spill] sm:$0xff]  ;;  %v7541_v4 = vld [vmem:[#allocation43_spill] sm:$0xff] }
 0x82d   :  { %3248 = vmatprep.subr.bf16.mxu0 %v7515_v2  ;;  %3289 = vmatprep.subr.bf16.mxu1 %v7516_v3  ;;  %v7542_v2 = vld [vmem:[#allocation44_spill] sm:$0xff]  ;;  %v7543_v3 = vld [vmem:[#allocation45_spill] sm:$0xff] }
 0x82f   :  { %3169 = vmatmul.mubr.bf16.vlgmr.msra.gmra.mrb[100].mxu0 %v2935_v5  ;;  %3210 = vmatmul.mubr.bf16.vlgmr.msra.gmra.mrb[100].mxu1 %v2935_v5  ;;  %v7526_v5 = vld [vmem:[#allocation9_spill] sm:$0xff] }
 0x830   :  { %3249 = vmatpush1.bf16.msra.mxu0 %v7517_v50  ;;  %3290 = vmatpush1.bf16.msra.mxu1 %v7518_v13  ;;  %v7544_v50 = vld [vmem:[#allocation72_spill] sm:$0xff]  ;;  %v7545_v13 = vld [vmem:[#allocation73_spill] sm:$0xff] }
 0x831   :  { %3250 = vmatprep.subr.bf16.mxu0 %v7519_v31  ;;  %3291 = vmatprep.subr.bf16.mxu1 %v7520_v33  ;;  %v7546_v31 = vld [vmem:[#allocation74_spill] sm:$0xff]  ;;  %v7547_v33 = vld [vmem:[#allocation75_spill] sm:$0xff] }
 0x832   :  { %3280 = vmatprep.mubr.bf16.mxu0 %v7120_v20  ;;  %3321 = vmatprep.mubr.bf16.mxu1 %v7120_v20 }
 0x834   :  { %3251 = vmatpush1.bf16.msra.mxu0 %v7521_v51  ;;  %3292 = vmatpush1.bf16.msra.mxu1 %v7522_v37  ;;  %v7548_v51 = vld [vmem:[#allocation46_spill] sm:$0xff] }
 0x835   :  { %3252 = vmatprep.subr.bf16.mxu0 %v7523_v9  ;;  %3293 = vmatprep.subr.bf16.mxu1 %v7524_v62 }
 0x838   :  { %3253 = vmatpush1.bf16.msra.mxu0 %v7525_v32  ;;  %3294 = vmatpush1.bf16.msra.mxu1 %v7526_v5 }
 0x839   :  { %3254 = vmatprep.subr.bf16.mxu0 %v7527_v8  ;;  %3295 = vmatprep.subr.bf16.mxu1 %v7528_v43 }
 0x83c   :  { %3255 = vmatpush1.bf16.msra.mxu0 %v7529_v24  ;;  %3296 = vmatpush1.bf16.msra.mxu1 %v7530_v26 }
 0x83d   :  { %3256 = vmatprep.subr.bf16.mxu0 %v7531_v10  ;;  %3297 = vmatprep.subr.bf16.mxu1 %v7532_v57 }
 0x840   :  { %3257 = vmatpush1.bf16.msra.mxu0 %v7533_v39  ;;  %3298 = vmatpush1.bf16.msra.mxu1 %v7534_v44 }
 0x841   :  { %3258 = vmatprep.subr.bf16.mxu0 %v7535_v54  ;;  %3299 = vmatprep.subr.bf16.mxu1 %v7536_v59 }
 0x844   :  { %3259 = vmatpush1.bf16.msra.mxu0 %v7537_v63  ;;  %3300 = vmatpush1.bf16.msra.mxu1 %v7538_v61 }
 0x845   :  { %3260 = vmatprep.subr.bf16.mxu0 %v7539_v34  ;;  %3301 = vmatprep.subr.bf16.mxu1 %v7540_v48 }
 0x848   :  { %3261 = vmatpush1.bf16.msra.mxu0 %v7541_v4  ;;  %3302 = vmatpush1.bf16.msra.mxu1 %v7542_v2 }
 0x849   :  { %3262 = vmatprep.subr.bf16.mxu0 %v7543_v3  ;;  %3303 = vmatprep.subr.bf16.mxu1 %v7544_v50 }
 0x84c   :  { %3263 = vmatpush1.bf16.msra.mxu0 %v7545_v13  ;;  %3304 = vmatpush1.bf16.msra.mxu1 %v7546_v31 }
 0x84d   :  { %3330 = vmatprep.subr.bf16.mxu0 %v7547_v33  ;;  %3371 = vmatprep.subr.bf16.mxu1 %v7548_v51 }
 0x8c2   :  { %v2971_v37 = vpop.f32.mrb[92].mxu0  ;;  %v3012_v9 = vpop.f32.mrb[92].mxu1 }
 0x8c3   :  { %v2973_v62 = vpop.f32.mrb[93].mxu0  ;;  %v3014_v32 = vpop.f32.mrb[93].mxu1 }
 0x8c4   :  { %v2975_v5 = vpop.f32.mrb[94].mxu0  ;;  %v3016_v8 = vpop.f32.mrb[94].mxu1 }
 0x8c5   :  { %v2976_v43 = vpop.f32.mrb[95].mxu0  ;;  %v3017_v24 = vpop.f32.mrb[95].mxu1 }
 0x8e2   :  { %v3053_v26 = vpop.f32.mrb[96].mxu0  ;;  %v3094_v10 = vpop.f32.mrb[96].mxu1 }
 0x8e3   :  { %v3054_v57 = vadd.f32 %v3053_v26, %v2971_v37  ;;  %v3095_v39 = vadd.f32 %v3094_v10, %v3012_v9  ;;  %v3055_v44 = vpop.f32.mrb[97].mxu0  ;;  %v3096_v54 = vpop.f32.mrb[97].mxu1 }
 0x8e4   :  { %v3056_v59 = vadd.f32 %v3055_v44, %v2973_v62  ;;  %v3097_v63 = vadd.f32 %v3096_v54, %v3014_v32  ;;  %v3057_v61 = vpop.f32.mrb[98].mxu0  ;;  %v3098_v34 = vpop.f32.mrb[98].mxu1 }
 0x8e5   :  { %v3101_v48 = vadd.f32 %v3054_v57, %v5069_v53  ;;  %v3058_v4 = vpop.f32.mrb[99].mxu0  ;;  %v3099_v2 = vpop.f32.mrb[99].mxu1  ;;  %v3103_v51 = vadd.f32 %v3095_v39, %v5084_v55 }
 0x8e6   :  { %v3102_v3 = vadd.f32 %v3056_v59, %v5073_v58  ;;  %v3104_v31 = vadd.f32 %v3097_v63, %v5079_v60  ;;  %v7549_v59 = vld [vmem:[#allocation84_spill] sm:$0xff]  ;;  %v7550_v63 = vld [vmem:[#allocation85_spill] sm:$0xff]  ;;  %v7551_v2 = vld [vmem:[#allocation86_spill] sm:$0xff] }
 0x8e7   :  { %v3607_v50 = vmul.f32 -1.442695, %v3101_v48 }
 0x8e8   :  { %v3608_v13 = vmul.f32 -1.442695, %v3102_v3  ;;  %v3609_v33 = vmul.f32 -1.442695, %v3104_v31 }
 0x8e9   :  { %3972 = vpow2.f32 %v3607_v50  ;;  %v7552_v50 = vld [vmem:[#allocation87_spill] sm:$0xff] }
 0x8ea   :  { %3974 = vpow2.f32 %v3608_v13 }
 0x8eb   :  { %3976 = vpow2.f32 %v3609_v33 }
 0x8ec   :  { %3978 = vtanh.f32 %v3103_v51 }
 0x8f3   :  { %v3973_v37 = vpop.eup %3972 }
 0x8f4   :  { %v3975_v9 = vpop.eup %3974  ;;  %v3108_v62 = vadd.f32 1.0, %v3973_v37 }
 0x8f5   :  { %v3114_v32 = vadd.f32 1.0, %v3975_v9  ;;  %v3977_v5 = vpop.eup %3976 }
 0x8f6   :  { %3980 = vrcp.f32 %v3108_v62  ;;  %v3979_v8 = vpop.eup %3978  ;;  %v3121_v10 = vadd.f32 1.0, %v3977_v5 }
 0x8f7   :  { %3982 = vrcp.f32 %v3114_v32 }
 0x8f8   :  { %3984 = vrcp.f32 %v3121_v10 }
 0x900   :  { %v3981_v43 = vpop.eup %3980 }
 0x901   :  { %v3983_v24 = vpop.eup %3982  ;;  %v3125_v26 = vmul.f32 %v3981_v43, %v3979_v8 }
 0x902   :  { %v3124_v57 = vmul.f32 %v3983_v24, %v6651_v30  ;;  %v3170_v44 = vpop.f32.mrb[100].mxu0  ;;  %v3211_v54 = vpop.f32.mrb[100].mxu1 }
 0x903   :  { %v3218_v39 = vadd.f32 %v3170_v44, %v7549_v59  ;;  %v3220_v61 = vadd.f32 %v3211_v54, %v7550_v63  ;;  %v3172_v34 = vpop.f32.mrb[101].mxu0  ;;  %v3213_v48 = vpop.f32.mrb[101].mxu1 }
 0x904   :  { %v6769_v4 = vadd.f32 %v3125_v26, %v3124_v57  ;;  %v3219_v3 = vadd.f32 %v3172_v34, %v7551_v2  ;;  %v3221_v13 = vadd.f32 %v3213_v48, %v7552_v50  ;;  %v3174_v31 = vpop.f32.mrb[102].mxu0  ;;  %v3215_v33 = vpop.f32.mrb[102].mxu1 }
 0x905   :  { %v3610_v51 = vmul.f32 -1.442695, %v3218_v39  ;;  %v3175_v37 = vpop.f32.mrb[103].mxu0  ;;  %v3216_v30 = vpop.f32.mrb[103].mxu1 }
 0x906   :  { %v3611_v9 = vmul.f32 -1.442695, %v3219_v3  ;;  %3986 = vtanh.f32 %v6769_v4  ;;  %v3612_v62 = vmul.f32 -1.442695, %v3221_v13  ;;  %v3985_v32 = vpop.eup %3984 }
 0x907   :  { %3988 = vpow2.f32 %v3610_v51 }
 0x908   :  { %3990 = vpow2.f32 %v3611_v9 }
 0x909   :  { %3992 = vpow2.f32 %v3612_v62 }
 0x90a   :  { %3994 = vtanh.f32 %v3220_v61 }
 0x910   :  { %v3987_v5 = vpop.eup %3986 }
 0x911   :  { %v3989_v8 = vpop.eup %3988  ;;  %v3128_v43 = vmul.f32 %v3987_v5, %v3985_v32 }
 0x912   :  { %v3991_v24 = vpop.eup %3990  ;;  %v3225_v26 = vadd.f32 1.0, %v3989_v8 }
 0x913   :  { %v3231_v57 = vadd.f32 1.0, %v3991_v24  ;;  %v3247_v44 = vpack.c.bf16 %v3128_v43, %v3128_v43  ;;  %v3993_v10 = vpop.eup %3992 }
 0x914   :  { %3996 = vrcp.f32 %v3225_v26 }
 0x915   :  { %3998 = vrcp.f32 %v3231_v57  ;;  %3281 = vmatmul.mubr.bf16.vlgmr.msra.gmra.mrb[104].mxu0 %v3247_v44  ;;  %3322 = vmatmul.mubr.bf16.vlgmr.msra.gmra.mrb[104].mxu1 %v3247_v44 }
 0x916   :  { %3331 = vmatpush1.bf16.msra.mxu0 %v6301_v18  ;;  %3372 = vmatpush1.bf16.msra.mxu1 %v6307_v23  ;;  %v3995_v18 = vpop.eup %3994 }
 0x917   :  { %3332 = vmatprep.subr.bf16.mxu0 %v6313_v22  ;;  %3373 = vmatprep.subr.bf16.mxu1 %v6319_v41  ;;  %v3238_v41 = vadd.f32 1.0, %v3993_v10 }
 0x918   :  { %3362 = vmatprep.mubr.bf16.mxu0 %v7120_v20  ;;  %3403 = vmatprep.mubr.bf16.mxu1 %v7120_v20 }
 0x919   :  { %4000 = vrcp.f32 %v3238_v41 }
 0x91a   :  { %3333 = vmatpush1.bf16.msra.mxu0 %v6327_v45  ;;  %3374 = vmatpush1.bf16.msra.mxu1 %v6333_v38 }
 0x91b   :  { %3334 = vmatprep.subr.bf16.mxu0 %v6339_v11  ;;  %3375 = vmatprep.subr.bf16.mxu1 %v6345_v49 }
 0x91e   :  { %v3997_v54 = vpop.eup %3996  ;;  %3335 = vmatpush1.bf16.msra.mxu0 %v6351_v12  ;;  %3376 = vmatpush1.bf16.msra.mxu1 %v6357_v0 }
 0x91f   :  { %v3999_v23 = vpop.eup %3998  ;;  %v3242_v22 = vmul.f32 %v3997_v54, %v3995_v18  ;;  %3336 = vmatprep.subr.bf16.mxu0 %v6363_v29  ;;  %3377 = vmatprep.subr.bf16.mxu1 %v6369_v16 }
 0x920   :  { %v3241_v20 = vmul.f32 %v3999_v23, %v6671_v25 }
 0x922   :  { %v3243_v45 = vadd.f32 %v3242_v22, %v3241_v20  ;;  %3337 = vmatpush1.bf16.msra.mxu0 %v6378_v42  ;;  %3378 = vmatpush1.bf16.msra.mxu1 %v6384_v19 }
 0x923   :  { %3338 = vmatprep.subr.bf16.mxu0 %v6390_v36  ;;  %3379 = vmatprep.subr.bf16.mxu1 %v7488_v56  ;;  %v4001_v38 = vpop.eup %4000 }
 0x924   :  { %4002 = vtanh.f32 %v3243_v45 }
 0x926   :  { %3339 = vmatpush1.bf16.msra.mxu0 %v7489_v46  ;;  %3380 = vmatpush1.bf16.msra.mxu1 %v7490_v47 }
 0x927   :  { %3340 = vmatprep.subr.bf16.mxu0 %v7491_v15  ;;  %3381 = vmatprep.subr.bf16.mxu1 %v7492_v21 }
 0x92a   :  { %3341 = vmatpush1.bf16.msra.mxu0 %v7493_v14  ;;  %3382 = vmatpush1.bf16.msra.mxu1 %v7494_v52 }
 0x92b   :  { %3342 = vmatprep.subr.bf16.mxu0 %v7495_v1  ;;  %3383 = vmatprep.subr.bf16.mxu1 %v7496_v35 }
 0x92e   :  { %v4003_v11 = vpop.eup %4002  ;;  %3343 = vmatpush1.bf16.msra.mxu0 %v7497_v27  ;;  %3384 = vmatpush1.bf16.msra.mxu1 %v7498_v28 }
 0x92f   :  { %3344 = vmatprep.subr.bf16.mxu0 %v7499_v7  ;;  %3385 = vmatprep.subr.bf16.mxu1 %v6469_v6  ;;  %v3245_v49 = vmul.f32 %v4003_v11, %v4001_v38 }
 0x931   :  { %v3246_v12 = vpack.c.bf16 %v3245_v49, %v3245_v49 }
 0x932   :  { %3345 = vmatpush1.bf16.msra.mxu0 %v6475_v40  ;;  %3386 = vmatpush1.bf16.msra.mxu1 %v6481_v17 }
 0x935   :  { %3363 = vmatmul.mubr.bf16.vlgmr.msra.gmra.mrb[108].mxu0 %v3246_v12  ;;  %3404 = vmatmul.mubr.bf16.vlgmr.msra.gmra.mrb[108].mxu1 %v3246_v12 }
 0x9e8   :  { %v3282_v0 = vpop.f32.mrb[104].mxu0  ;;  %v3323_v29 = vpop.f32.mrb[104].mxu1 }
 0x9e9   :  { %v3284_v16 = vpop.f32.mrb[105].mxu0  ;;  %v3325_v42 = vpop.f32.mrb[105].mxu1 }
 0x9ea   :  { %v3286_v19 = vpop.f32.mrb[106].mxu0  ;;  %v3327_v36 = vpop.f32.mrb[106].mxu1 }
 0x9eb   :  { %v3287_v25 = vpop.f32.mrb[107].mxu0  ;;  %v3328_v56 = vpop.f32.mrb[107].mxu1 }
 0xa08   :  { %v3364_v46 = vpop.f32.mrb[108].mxu0  ;;  %v3405_v47 = vpop.f32.mrb[108].mxu1 }
 0xa09   :  { %v3365_v15 = vadd.f32 %v3364_v46, %v3282_v0  ;;  %v3406_v6 = vadd.f32 %v3405_v47, %v3323_v29  ;;  %v3366_v21 = vpop.f32.mrb[109].mxu0  ;;  %v3407_v14 = vpop.f32.mrb[109].mxu1 }
 0xa0a   :  { %v3367_v52 = vadd.f32 %v3366_v21, %v3284_v16  ;;  %v3408_v40 = vadd.f32 %v3407_v14, %v3325_v42  ;;  %v3368_v1 = vpop.f32.mrb[110].mxu0  ;;  %v3409_v17 = vpop.f32.mrb[110].mxu1 }
 0xa0b   :  { %v3412_v35 = vadd.f32 %v3365_v15, %v5069_v53  ;;  %v3369_v27 = vpop.f32.mrb[111].mxu0  ;;  %v3410_v28 = vpop.f32.mrb[111].mxu1  ;;  %v3414_v34 = vadd.f32 %v3406_v6, %v5084_v55 }
 0xa0c   :  { %v3413_v7 = vadd.f32 %v3367_v52, %v5073_v58  ;;  %v3415_v63 = vadd.f32 %v3408_v40, %v5079_v60 }
 0xa0d   :  { %v3613_v59 = vmul.f32 -1.442695, %v3412_v35 }
 0xa0e   :  { %v3614_v39 = vmul.f32 -1.442695, %v3413_v7  ;;  %v3615_v61 = vmul.f32 -1.442695, %v3415_v63 }
 0xa0f   :  { %4004 = vpow2.f32 %v3613_v59 }
 0xa10   :  { %4006 = vpow2.f32 %v3614_v39 }
 0xa11   :  { %4008 = vpow2.f32 %v3615_v61 }
 0xa12   :  { %4010 = vtanh.f32 %v3414_v34 }
 0xa19   :  { %v4005_v48 = vpop.eup %4004 }
 0xa1a   :  { %v4007_v2 = vpop.eup %4006  ;;  %v3419_v3 = vadd.f32 1.0, %v4005_v48 }
 0xa1b   :  { %v3425_v50 = vadd.f32 1.0, %v4007_v2  ;;  %v4009_v53 = vpop.eup %4008 }
 0xa1c   :  { %4012 = vrcp.f32 %v3419_v3  ;;  %v4011_v13 = vpop.eup %4010  ;;  %v3432_v51 = vadd.f32 1.0, %v4009_v53 }
 0xa1d   :  { %4014 = vrcp.f32 %v3425_v50 }
 0xa1e   :  { %4016 = vrcp.f32 %v3432_v51 }
 0xa26   :  { %v4013_v58 = vpop.eup %4012 }
 0xa27   :  { %v4015_v31 = vpop.eup %4014  ;;  %v3436_v33 = vmul.f32 %v4013_v58, %v4011_v13 }
 0xa28   :  { %v3435_v37 = vmul.f32 %v4015_v31, %v6769_v4  ;;  %v4017_v55 = vpop.eup %4016 }
 0xa2a   :  { %v3437_v60 = vadd.f32 %v3436_v33, %v3435_v37 }
 0xa2c   :  { %4018 = vtanh.f32 %v3437_v60 }
 0xa36   :  { %v4019_v30 = vpop.eup %4018 }
 0xa37   :  { %v3439_v9 = vmul.f32 %v4019_v30, %v4017_v55 }
 0xa39   :  { %3440 = vst [vmem:[%s6822_s7] sm:$0xff] %v3439_v9 }

</bundles_post_ra>
